<compile_context>
chip_gen: v7x
topology: tpu7x:2x2x1
jax: 0.10.0
libtpu: 0.0.40
codegen_flags: <defaults>
</compile_context>

<pallas_src>
import jax
import jax.numpy as jnp
from jax.experimental import pallas as pl
from jax.experimental.pallas import tpu as pltpu


def basic_block_kernel(x_ref, w1_ref, b1_ref, w2_ref, b2_ref, out_ref,
                       xpad_s, mid_s):
    """One batch element per grid step.

    x_ref  : (1, H, W, C1)   bf16 input (also serves as the identity residual)
    w1_ref : (3, 3*C1, C2)   bf16 conv1 weights [kh, kw*C1+cin, cout], BN1 scale folded in
    b1_ref : (1, C2)         f32 folded BN1 bias
    w2_ref : (3, 3*C2, C2)   bf16 conv2 weights, BN2 scale folded in
    b2_ref : (1, C2)         f32 folded BN2 bias
    out_ref: (1, H, W, C2)   f32 output
    xpad_s : (H+2, W+2, C1)  bf16 scratch: zero-padded input
    mid_s  : (H+2, W+2, C2)  bf16 scratch: zero-padded conv1 output
    """
    H, W, C2 = out_ref.shape[1], out_ref.shape[2], out_ref.shape[3]

    def pad_into(dst, interior):
        # Zero only the 1-wide border (O(perimeter)); the interior is fully
        # overwritten every step.  Border zeroing is done every step (not just
        # step 0) so the kernel stays correct if the 'parallel' batch axis is
        # split across TensorCores (each core owns its own scratch buffer).
        C = dst.shape[2]
        zrow = jnp.zeros((1, W + 2, C), dst.dtype)
        zcol = jnp.zeros((H, 1, C), dst.dtype)
        dst[0:1, :, :] = zrow
        dst[H + 1:H + 2, :, :] = zrow
        dst[1:H + 1, 0:1, :] = zcol
        dst[1:H + 1, W + 1:W + 2, :] = zcol
        dst[1:H + 1, 1:W + 1, :] = interior

    def conv3x3(src, w_ref):
        # 3x3 conv (padding already present in `src`) as 3 matmuls:
        # for each kh, the 3 kw taps are concatenated along the channel axis
        # (im2col over kw), so the MXU contracts K = 3*C_in per matmul.
        acc = None
        for kh in range(3):
            slab = src[kh:kh + H, :, :]                          # (H, W+2, Cin)
            cat = jnp.concatenate(
                [slab[:, 0:W, :], slab[:, 1:W + 1, :], slab[:, 2:W + 2, :]],
                axis=-1)                                         # (H, W, 3*Cin)
            part = jnp.einsum('hwc,cd->hwd', cat, w_ref[kh],
                              preferred_element_type=jnp.float32)
            acc = part if acc is None else acc + part            # seeded, no zeros pass
        return acc                                               # (H, W, C2) f32

    x = x_ref[0]                                                 # (H, W, C1) bf16

    # ---- conv1 + BN1 (scale folded into w1) + ReLU ----
    pad_into(xpad_s, x)
    y1 = jnp.maximum(conv3x3(xpad_s, w1_ref) + b1_ref[0], 0.0)   # f32

    # ---- conv2 + BN2 (scale folded into w2) ----
    pad_into(mid_s, y1.astype(mid_s.dtype))
    y2 = conv3x3(mid_s, w2_ref) + b2_ref[0]

    # ---- identity residual (downsample=None) + final ReLU ----
    out_ref[0] = jnp.maximum(y2 + x.astype(jnp.float32), 0.0).astype(out_ref.dtype)


def basic_block(x_nchw, params, eps=1e-5):
    """Pallas implementation of BasicBlock.forward (NCHW in / NCHW out)."""
    N, C1, H, W = x_nchw.shape
    C2 = params['w1'].shape[0]
    assert C1 == C2, "identity residual (downsample=None) requires c1 == c2"

    # NHWC activations; bf16 halves activation HBM traffic and feeds the MXU.
    x = jnp.transpose(x_nchw, (0, 2, 3, 1)).astype(jnp.bfloat16)

    # Fold eval-mode BatchNorm: scale into the conv weights, bias kept separate.
    s1 = params['g1'] / jnp.sqrt(params['v1'] + eps)
    s2 = params['g2'] / jnp.sqrt(params['v2'] + eps)
    b1 = (params['b1'] - params['m1'] * s1).astype(jnp.float32).reshape(1, C2)
    b2 = (params['b2'] - params['m2'] * s2).astype(jnp.float32).reshape(1, C2)

    # (C_out, C_in, 3, 3) -> (kh, kw, C_in, C_out), fold BN scale over C_out,
    # then pack (kw, C_in) together so each kh is one (3*C_in, C2) matmul.
    w1 = (jnp.transpose(params['w1'], (2, 3, 1, 0)) * s1) \
        .reshape(3, 3 * C1, C2).astype(jnp.bfloat16)
    w2 = (jnp.transpose(params['w2'], (2, 3, 1, 0)) * s2) \
        .reshape(3, 3 * C2, C2).astype(jnp.bfloat16)

    out_nhwc = pl.pallas_call(
        basic_block_kernel,
        out_shape=jax.ShapeDtypeStruct((N, H, W, C2), jnp.float32),
        grid_spec=pltpu.PrefetchScalarGridSpec(
            num_scalar_prefetch=0,
            grid=(N,),
            in_specs=[
                pl.BlockSpec((1, H, W, C1), lambda n: (n, 0, 0, 0)),
                pl.BlockSpec((3, 3 * C1, C2), lambda n: (0, 0, 0)),
                pl.BlockSpec((1, C2), lambda n: (0, 0)),
                pl.BlockSpec((3, 3 * C2, C2), lambda n: (0, 0, 0)),
                pl.BlockSpec((1, C2), lambda n: (0, 0)),
            ],
            out_specs=pl.BlockSpec((1, H, W, C2), lambda n: (n, 0, 0, 0)),
            scratch_shapes=[
                pltpu.VMEM((H + 2, W + 2, C1), jnp.bfloat16),
                pltpu.VMEM((H + 2, W + 2, C2), jnp.bfloat16),
            ],
        ),
        compiler_params=pltpu.CompilerParams(
            dimension_semantics=("parallel",),
            vmem_limit_bytes=32 * 1024 * 1024),
    )(x, w1, b1, w2, b2)

    return jnp.transpose(out_nhwc, (0, 3, 1, 2)).astype(x_nchw.dtype)


def basic_block_reference(x_nchw, params, eps=1e-5):
    """Pure-JAX f32 reference (mirrors the PyTorch forward in eval mode)."""
    def conv(x, w):
        return jax.lax.conv_general_dilated(
            x, w, window_strides=(1, 1), padding=((1, 1), (1, 1)),
            dimension_numbers=('NCHW', 'OIHW', 'NCHW'))

    def bn(x, g, b, m, v):
        g = g[None, :, None, None]
        b = b[None, :, None, None]
        m = m[None, :, None, None]
        v = v[None, :, None, None]
        return (x - m) / jnp.sqrt(v + eps) * g + b

    out = jax.nn.relu(bn(conv(x_nchw, params['w1']),
                         params['g1'], params['b1'], params['m1'], params['v1']))
    out = bn(conv(out, params['w2']),
             params['g2'], params['b2'], params['m2'], params['v2'])
    return jax.nn.relu(out + x_nchw)


if __name__ == "__main__":
    # Small shapes consistent with the module: batch=2, c1=c2=4, 16x16 spatial.
    N, C1, C2, H, W = 2, 4, 4, 16, 16

    key = jax.random.PRNGKey(0)
    keys = jax.random.split(key, 11)

    x = jax.random.normal(keys[0], (N, C1, H, W), jnp.float32)

    params = {
        # conv weights in PyTorch OIHW layout
        'w1': jax.random.normal(keys[1], (C2, C1, 3, 3), jnp.float32) * 0.1,
        'w2': jax.random.normal(keys[2], (C2, C2, 3, 3), jnp.float32) * 0.1,
        # BN1: gamma, beta, running_mean, running_var
        'g1': jax.random.uniform(keys[3], (C2,), jnp.float32, 0.5, 1.5),
        'b1': jax.random.normal(keys[4], (C2,), jnp.float32) * 0.1,
        'm1': jax.random.normal(keys[5], (C2,), jnp.float32) * 0.1,
        'v1': jax.random.uniform(keys[6], (C2,), jnp.float32, 0.5, 1.5),
        # BN2
        'g2': jax.random.uniform(keys[7], (C2,), jnp.float32, 0.5, 1.5),
        'b2': jax.random.normal(keys[8], (C2,), jnp.float32) * 0.1,
        'm2': jax.random.normal(keys[9], (C2,), jnp.float32) * 0.1,
        'v2': jax.random.uniform(keys[10], (C2,), jnp.float32, 0.5, 1.5),
    }

    out = jax.block_until_ready(basic_block(x, params))
    ref = jax.block_until_ready(basic_block_reference(x, params))

    assert out.shape == (N, C2, H, W), out.shape
    # bf16 MXU inputs / bf16 residual => widened tolerance vs. the f32 reference.
    assert jnp.allclose(out, ref, atol=5e-2, rtol=5e-2), (
        float(jnp.max(jnp.abs(out - ref))))

    print("KERNEL_OK")
</pallas_src>

<mosaic_0001>
module attributes {stable_mosaic.version = 11 : i64} {
  func.func @basic_block_kernel(%arg0: i32, %arg1: memref<1x16x16x4xbf16, #tpu.memory_space<vmem>>, %arg2: memref<3x12x4xbf16, #tpu.memory_space<vmem>>, %arg3: memref<1x4xf32, #tpu.memory_space<vmem>>, %arg4: memref<3x12x4xbf16, #tpu.memory_space<vmem>>, %arg5: memref<1x4xf32, #tpu.memory_space<vmem>>, %arg6: memref<1x16x16x4xf32, #tpu.memory_space<vmem>>, %arg7: memref<18x18x4xbf16, #tpu.memory_space<vmem>>, %arg8: memref<18x18x4xbf16, #tpu.memory_space<vmem>>) attributes {dimension_semantics = [#tpu.dimension_semantics<parallel>], iteration_bounds = array<i64: 2>, scalar_prefetch = 0 : i64, scratch_operands = 2 : i64, tpu.core_type = #tpu.core_type<tc>, window_params = [{transform_indices = @transform_0, window_bounds = array<i64: 1, 16, 16, 4>}, {pipeline_mode = #tpu.pipeline_mode<synchronous>, transform_indices = @transform_1, window_bounds = array<i64: 3, 12, 4>}, {pipeline_mode = #tpu.pipeline_mode<synchronous>, transform_indices = @transform_2, window_bounds = array<i64: 1, 4>}, {pipeline_mode = #tpu.pipeline_mode<synchronous>, transform_indices = @transform_3, window_bounds = array<i64: 3, 12, 4>}, {pipeline_mode = #tpu.pipeline_mode<synchronous>, transform_indices = @transform_4, window_bounds = array<i64: 1, 4>}, {transform_indices = @transform_5, window_bounds = array<i64: 1, 16, 16, 4>}]} {
    %c0 = arith.constant 0 : index
    %c0_0 = arith.constant 0 : index
    %c0_1 = arith.constant 0 : index
    %c0_2 = arith.constant 0 : index
    %0 = vector.load %arg1[%c0, %c0_0, %c0_1, %c0_2] : memref<1x16x16x4xbf16, #tpu.memory_space<vmem>>, vector<1x16x16x4xbf16>
    %1 = vector.shape_cast %0 : vector<1x16x16x4xbf16> to vector<16x16x4xbf16>
    %cst = arith.constant 0.000000e+00 : bf16
    %2 = vector.broadcast %cst : bf16 to vector<1x18x4xbf16>
    %cst_3 = arith.constant 0.000000e+00 : bf16
    %3 = vector.broadcast %cst_3 : bf16 to vector<16x1x4xbf16>
    %c0_4 = arith.constant 0 : index
    %c0_5 = arith.constant 0 : index
    %c0_6 = arith.constant 0 : index
    %4 = vector.load %arg7[%c0_4, %c0_5, %c0_6] : memref<18x18x4xbf16, #tpu.memory_space<vmem>>, vector<1x18x4xbf16>
    tpu.vector_store %arg7[%c0_4, %c0_5, %c0_6], %2 {strides = array<i32>} : memref<18x18x4xbf16, #tpu.memory_space<vmem>>, vector<1x18x4xbf16>,
    %c17 = arith.constant 17 : index
    %c0_7 = arith.constant 0 : index
    %c0_8 = arith.constant 0 : index
    %5 = vector.load %arg7[%c17, %c0_7, %c0_8] : memref<18x18x4xbf16, #tpu.memory_space<vmem>>, vector<1x18x4xbf16>
    tpu.vector_store %arg7[%c17, %c0_7, %c0_8], %2 {strides = array<i32>} : memref<18x18x4xbf16, #tpu.memory_space<vmem>>, vector<1x18x4xbf16>,
    %c1 = arith.constant 1 : index
    %c0_9 = arith.constant 0 : index
    %c0_10 = arith.constant 0 : index
    %6 = vector.load %arg7[%c1, %c0_9, %c0_10] : memref<18x18x4xbf16, #tpu.memory_space<vmem>>, vector<16x1x4xbf16>
    tpu.vector_store %arg7[%c1, %c0_9, %c0_10], %3 {strides = array<i32>} : memref<18x18x4xbf16, #tpu.memory_space<vmem>>, vector<16x1x4xbf16>,
    %c1_11 = arith.constant 1 : index
    %c17_12 = arith.constant 17 : index
    %c0_13 = arith.constant 0 : index
    %7 = vector.load %arg7[%c1_11, %c17_12, %c0_13] : memref<18x18x4xbf16, #tpu.memory_space<vmem>>, vector<16x1x4xbf16>
    tpu.vector_store %arg7[%c1_11, %c17_12, %c0_13], %3 {strides = array<i32>} : memref<18x18x4xbf16, #tpu.memory_space<vmem>>, vector<16x1x4xbf16>,
    %c1_14 = arith.constant 1 : index
    %c1_15 = arith.constant 1 : index
    %c0_16 = arith.constant 0 : index
    %8 = vector.load %arg7[%c1_14, %c1_15, %c0_16] : memref<18x18x4xbf16, #tpu.memory_space<vmem>>, vector<16x16x4xbf16>
    tpu.vector_store %arg7[%c1_14, %c1_15, %c0_16], %1 {strides = array<i32>} : memref<18x18x4xbf16, #tpu.memory_space<vmem>>, vector<16x16x4xbf16>,
    %c0_17 = arith.constant 0 : index
    %c0_18 = arith.constant 0 : index
    %c0_19 = arith.constant 0 : index
    %9 = vector.load %arg7[%c0_17, %c0_18, %c0_19] : memref<18x18x4xbf16, #tpu.memory_space<vmem>>, vector<16x18x4xbf16>
    %10 = vector.extract_strided_slice %9 {offsets = [0, 0, 0], sizes = [16, 16, 4], strides = [1, 1, 1]} : vector<16x18x4xbf16> to vector<16x16x4xbf16>
    %11 = vector.extract_strided_slice %9 {offsets = [0, 1, 0], sizes = [16, 16, 4], strides = [1, 1, 1]} : vector<16x18x4xbf16> to vector<16x16x4xbf16>
    %12 = vector.extract_strided_slice %9 {offsets = [0, 2, 0], sizes = [16, 16, 4], strides = [1, 1, 1]} : vector<16x18x4xbf16> to vector<16x16x4xbf16>
    %13 = tpu.concatenate %10, %11, %12 in 2 : vector<16x16x4xbf16>, vector<16x16x4xbf16>, vector<16x16x4xbf16> -> vector<16x16x12xbf16>
    %c0_20 = arith.constant 0 : index
    %c0_21 = arith.constant 0 : index
    %c0_22 = arith.constant 0 : index
    %14 = vector.load %arg2[%c0_20, %c0_21, %c0_22] : memref<3x12x4xbf16, #tpu.memory_space<vmem>>, vector<1x12x4xbf16>
    %15 = vector.shape_cast %14 : vector<1x12x4xbf16> to vector<12x4xbf16>
    "tpu.trace_start"() <{level = 10 : i32, message = "hwc,cd->hwd"}> : () -> ()
    %cst_23 = arith.constant dense<0.000000e+00> : vector<16x16x4xf32>
    %16 = tpu.matmul %13, %15, %cst_23 {dimension_numbers = #tpu.dot_dimension_numbers<[2], [0], [0, 1], [1], [0, 0, 0, 1, 1, 1], [], []>} : vector<16x16x12xbf16>, vector<12x4xbf16>, vector<16x16x4xf32> -> vector<16x16x4xf32>
    "tpu.trace_stop"() : () -> ()
    %c1_24 = arith.constant 1 : index
    %c0_25 = arith.constant 0 : index
    %c0_26 = arith.constant 0 : index
    %17 = vector.load %arg7[%c1_24, %c0_25, %c0_26] : memref<18x18x4xbf16, #tpu.memory_space<vmem>>, vector<16x18x4xbf16>
    %18 = vector.extract_strided_slice %17 {offsets = [0, 0, 0], sizes = [16, 16, 4], strides = [1, 1, 1]} : vector<16x18x4xbf16> to vector<16x16x4xbf16>
    %19 = vector.extract_strided_slice %17 {offsets = [0, 1, 0], sizes = [16, 16, 4], strides = [1, 1, 1]} : vector<16x18x4xbf16> to vector<16x16x4xbf16>
    %20 = vector.extract_strided_slice %17 {offsets = [0, 2, 0], sizes = [16, 16, 4], strides = [1, 1, 1]} : vector<16x18x4xbf16> to vector<16x16x4xbf16>
    %21 = tpu.concatenate %18, %19, %20 in 2 : vector<16x16x4xbf16>, vector<16x16x4xbf16>, vector<16x16x4xbf16> -> vector<16x16x12xbf16>
    %c1_27 = arith.constant 1 : index
    %c0_28 = arith.constant 0 : index
    %c0_29 = arith.constant 0 : index
    %22 = vector.load %arg2[%c1_27, %c0_28, %c0_29] : memref<3x12x4xbf16, #tpu.memory_space<vmem>>, vector<1x12x4xbf16>
    %23 = vector.shape_cast %22 : vector<1x12x4xbf16> to vector<12x4xbf16>
    "tpu.trace_start"() <{level = 10 : i32, message = "hwc,cd->hwd"}> : () -> ()
    %cst_30 = arith.constant dense<0.000000e+00> : vector<16x16x4xf32>
    %24 = tpu.matmul %21, %23, %cst_30 {dimension_numbers = #tpu.dot_dimension_numbers<[2], [0], [0, 1], [1], [0, 0, 0, 1, 1, 1], [], []>} : vector<16x16x12xbf16>, vector<12x4xbf16>, vector<16x16x4xf32> -> vector<16x16x4xf32>
    "tpu.trace_stop"() : () -> ()
    %25 = arith.addf %16, %24 : vector<16x16x4xf32>
    %c2 = arith.constant 2 : index
    %c0_31 = arith.constant 0 : index
    %c0_32 = arith.constant 0 : index
    %26 = vector.load %arg7[%c2, %c0_31, %c0_32] : memref<18x18x4xbf16, #tpu.memory_space<vmem>>, vector<16x18x4xbf16>
    %27 = vector.extract_strided_slice %26 {offsets = [0, 0, 0], sizes = [16, 16, 4], strides = [1, 1, 1]} : vector<16x18x4xbf16> to vector<16x16x4xbf16>
    %28 = vector.extract_strided_slice %26 {offsets = [0, 1, 0], sizes = [16, 16, 4], strides = [1, 1, 1]} : vector<16x18x4xbf16> to vector<16x16x4xbf16>
    %29 = vector.extract_strided_slice %26 {offsets = [0, 2, 0], sizes = [16, 16, 4], strides = [1, 1, 1]} : vector<16x18x4xbf16> to vector<16x16x4xbf16>
    %30 = tpu.concatenate %27, %28, %29 in 2 : vector<16x16x4xbf16>, vector<16x16x4xbf16>, vector<16x16x4xbf16> -> vector<16x16x12xbf16>
    %c2_33 = arith.constant 2 : index
    %c0_34 = arith.constant 0 : index
    %c0_35 = arith.constant 0 : index
    %31 = vector.load %arg2[%c2_33, %c0_34, %c0_35] : memref<3x12x4xbf16, #tpu.memory_space<vmem>>, vector<1x12x4xbf16>
    %32 = vector.shape_cast %31 : vector<1x12x4xbf16> to vector<12x4xbf16>
    "tpu.trace_start"() <{level = 10 : i32, message = "hwc,cd->hwd"}> : () -> ()
    %cst_36 = arith.constant dense<0.000000e+00> : vector<16x16x4xf32>
    %33 = tpu.matmul %30, %32, %cst_36 {dimension_numbers = #tpu.dot_dimension_numbers<[2], [0], [0, 1], [1], [0, 0, 0, 1, 1, 1], [], []>} : vector<16x16x12xbf16>, vector<12x4xbf16>, vector<16x16x4xf32> -> vector<16x16x4xf32>
    "tpu.trace_stop"() : () -> ()
    %34 = arith.addf %25, %33 : vector<16x16x4xf32>
    %c0_37 = arith.constant 0 : index
    %c0_38 = arith.constant 0 : index
    %35 = vector.load %arg3[%c0_37, %c0_38] : memref<1x4xf32, #tpu.memory_space<vmem>>, vector<1x4xf32>
    %36 = vector.shape_cast %35 : vector<1x4xf32> to vector<4xf32>
    %37 = vector.shape_cast %36 : vector<4xf32> to vector<1x1x4xf32>
    %38 = vector.broadcast %37 : vector<1x1x4xf32> to vector<16x16x4xf32>
    %39 = arith.addf %34, %38 : vector<16x16x4xf32>
    %cst_39 = arith.constant 0.000000e+00 : f32
    %40 = vector.broadcast %cst_39 : f32 to vector<16x16x4xf32>
    %41 = arith.maximumf %39, %40 : vector<16x16x4xf32>
    %42 = arith.truncf %41 : vector<16x16x4xf32> to vector<16x16x4xbf16>
    %cst_40 = arith.constant 0.000000e+00 : bf16
    %43 = vector.broadcast %cst_40 : bf16 to vector<1x18x4xbf16>
    %cst_41 = arith.constant 0.000000e+00 : bf16
    %44 = vector.broadcast %cst_41 : bf16 to vector<16x1x4xbf16>
    %c0_42 = arith.constant 0 : index
    %c0_43 = arith.constant 0 : index
    %c0_44 = arith.constant 0 : index
    %45 = vector.load %arg8[%c0_42, %c0_43, %c0_44] : memref<18x18x4xbf16, #tpu.memory_space<vmem>>, vector<1x18x4xbf16>
    tpu.vector_store %arg8[%c0_42, %c0_43, %c0_44], %43 {strides = array<i32>} : memref<18x18x4xbf16, #tpu.memory_space<vmem>>, vector<1x18x4xbf16>,
    %c17_45 = arith.constant 17 : index
    %c0_46 = arith.constant 0 : index
    %c0_47 = arith.constant 0 : index
    %46 = vector.load %arg8[%c17_45, %c0_46, %c0_47] : memref<18x18x4xbf16, #tpu.memory_space<vmem>>, vector<1x18x4xbf16>
    tpu.vector_store %arg8[%c17_45, %c0_46, %c0_47], %43 {strides = array<i32>} : memref<18x18x4xbf16, #tpu.memory_space<vmem>>, vector<1x18x4xbf16>,
    %c1_48 = arith.constant 1 : index
    %c0_49 = arith.constant 0 : index
    %c0_50 = arith.constant 0 : index
    %47 = vector.load %arg8[%c1_48, %c0_49, %c0_50] : memref<18x18x4xbf16, #tpu.memory_space<vmem>>, vector<16x1x4xbf16>
    tpu.vector_store %arg8[%c1_48, %c0_49, %c0_50], %44 {strides = array<i32>} : memref<18x18x4xbf16, #tpu.memory_space<vmem>>, vector<16x1x4xbf16>,
    %c1_51 = arith.constant 1 : index
    %c17_52 = arith.constant 17 : index
    %c0_53 = arith.constant 0 : index
    %48 = vector.load %arg8[%c1_51, %c17_52, %c0_53] : memref<18x18x4xbf16, #tpu.memory_space<vmem>>, vector<16x1x4xbf16>
    tpu.vector_store %arg8[%c1_51, %c17_52, %c0_53], %44 {strides = array<i32>} : memref<18x18x4xbf16, #tpu.memory_space<vmem>>, vector<16x1x4xbf16>,
    %c1_54 = arith.constant 1 : index
    %c1_55 = arith.constant 1 : index
    %c0_56 = arith.constant 0 : index
    %49 = vector.load %arg8[%c1_54, %c1_55, %c0_56] : memref<18x18x4xbf16, #tpu.memory_space<vmem>>, vector<16x16x4xbf16>
    tpu.vector_store %arg8[%c1_54, %c1_55, %c0_56], %42 {strides = array<i32>} : memref<18x18x4xbf16, #tpu.memory_space<vmem>>, vector<16x16x4xbf16>,
    %c0_57 = arith.constant 0 : index
    %c0_58 = arith.constant 0 : index
    %c0_59 = arith.constant 0 : index
    %50 = vector.load %arg8[%c0_57, %c0_58, %c0_59] : memref<18x18x4xbf16, #tpu.memory_space<vmem>>, vector<16x18x4xbf16>
    %51 = vector.extract_strided_slice %50 {offsets = [0, 0, 0], sizes = [16, 16, 4], strides = [1, 1, 1]} : vector<16x18x4xbf16> to vector<16x16x4xbf16>
    %52 = vector.extract_strided_slice %50 {offsets = [0, 1, 0], sizes = [16, 16, 4], strides = [1, 1, 1]} : vector<16x18x4xbf16> to vector<16x16x4xbf16>
    %53 = vector.extract_strided_slice %50 {offsets = [0, 2, 0], sizes = [16, 16, 4], strides = [1, 1, 1]} : vector<16x18x4xbf16> to vector<16x16x4xbf16>
    %54 = tpu.concatenate %51, %52, %53 in 2 : vector<16x16x4xbf16>, vector<16x16x4xbf16>, vector<16x16x4xbf16> -> vector<16x16x12xbf16>
    %c0_60 = arith.constant 0 : index
    %c0_61 = arith.constant 0 : index
    %c0_62 = arith.constant 0 : index
    %55 = vector.load %arg4[%c0_60, %c0_61, %c0_62] : memref<3x12x4xbf16, #tpu.memory_space<vmem>>, vector<1x12x4xbf16>
    %56 = vector.shape_cast %55 : vector<1x12x4xbf16> to vector<12x4xbf16>
    "tpu.trace_start"() <{level = 10 : i32, message = "hwc,cd->hwd"}> : () -> ()
    %cst_63 = arith.constant dense<0.000000e+00> : vector<16x16x4xf32>
    %57 = tpu.matmul %54, %56, %cst_63 {dimension_numbers = #tpu.dot_dimension_numbers<[2], [0], [0, 1], [1], [0, 0, 0, 1, 1, 1], [], []>} : vector<16x16x12xbf16>, vector<12x4xbf16>, vector<16x16x4xf32> -> vector<16x16x4xf32>
    "tpu.trace_stop"() : () -> ()
    %c1_64 = arith.constant 1 : index
    %c0_65 = arith.constant 0 : index
    %c0_66 = arith.constant 0 : index
    %58 = vector.load %arg8[%c1_64, %c0_65, %c0_66] : memref<18x18x4xbf16, #tpu.memory_space<vmem>>, vector<16x18x4xbf16>
    %59 = vector.extract_strided_slice %58 {offsets = [0, 0, 0], sizes = [16, 16, 4], strides = [1, 1, 1]} : vector<16x18x4xbf16> to vector<16x16x4xbf16>
    %60 = vector.extract_strided_slice %58 {offsets = [0, 1, 0], sizes = [16, 16, 4], strides = [1, 1, 1]} : vector<16x18x4xbf16> to vector<16x16x4xbf16>
    %61 = vector.extract_strided_slice %58 {offsets = [0, 2, 0], sizes = [16, 16, 4], strides = [1, 1, 1]} : vector<16x18x4xbf16> to vector<16x16x4xbf16>
    %62 = tpu.concatenate %59, %60, %61 in 2 : vector<16x16x4xbf16>, vector<16x16x4xbf16>, vector<16x16x4xbf16> -> vector<16x16x12xbf16>
    %c1_67 = arith.constant 1 : index
    %c0_68 = arith.constant 0 : index
    %c0_69 = arith.constant 0 : index
    %63 = vector.load %arg4[%c1_67, %c0_68, %c0_69] : memref<3x12x4xbf16, #tpu.memory_space<vmem>>, vector<1x12x4xbf16>
    %64 = vector.shape_cast %63 : vector<1x12x4xbf16> to vector<12x4xbf16>
    "tpu.trace_start"() <{level = 10 : i32, message = "hwc,cd->hwd"}> : () -> ()
    %cst_70 = arith.constant dense<0.000000e+00> : vector<16x16x4xf32>
    %65 = tpu.matmul %62, %64, %cst_70 {dimension_numbers = #tpu.dot_dimension_numbers<[2], [0], [0, 1], [1], [0, 0, 0, 1, 1, 1], [], []>} : vector<16x16x12xbf16>, vector<12x4xbf16>, vector<16x16x4xf32> -> vector<16x16x4xf32>
    "tpu.trace_stop"() : () -> ()
    %66 = arith.addf %57, %65 : vector<16x16x4xf32>
    %c2_71 = arith.constant 2 : index
    %c0_72 = arith.constant 0 : index
    %c0_73 = arith.constant 0 : index
    %67 = vector.load %arg8[%c2_71, %c0_72, %c0_73] : memref<18x18x4xbf16, #tpu.memory_space<vmem>>, vector<16x18x4xbf16>
    %68 = vector.extract_strided_slice %67 {offsets = [0, 0, 0], sizes = [16, 16, 4], strides = [1, 1, 1]} : vector<16x18x4xbf16> to vector<16x16x4xbf16>
    %69 = vector.extract_strided_slice %67 {offsets = [0, 1, 0], sizes = [16, 16, 4], strides = [1, 1, 1]} : vector<16x18x4xbf16> to vector<16x16x4xbf16>
    %70 = vector.extract_strided_slice %67 {offsets = [0, 2, 0], sizes = [16, 16, 4], strides = [1, 1, 1]} : vector<16x18x4xbf16> to vector<16x16x4xbf16>
    %71 = tpu.concatenate %68, %69, %70 in 2 : vector<16x16x4xbf16>, vector<16x16x4xbf16>, vector<16x16x4xbf16> -> vector<16x16x12xbf16>
    %c2_74 = arith.constant 2 : index
    %c0_75 = arith.constant 0 : index
    %c0_76 = arith.constant 0 : index
    %72 = vector.load %arg4[%c2_74, %c0_75, %c0_76] : memref<3x12x4xbf16, #tpu.memory_space<vmem>>, vector<1x12x4xbf16>
    %73 = vector.shape_cast %72 : vector<1x12x4xbf16> to vector<12x4xbf16>
    "tpu.trace_start"() <{level = 10 : i32, message = "hwc,cd->hwd"}> : () -> ()
    %cst_77 = arith.constant dense<0.000000e+00> : vector<16x16x4xf32>
    %74 = tpu.matmul %71, %73, %cst_77 {dimension_numbers = #tpu.dot_dimension_numbers<[2], [0], [0, 1], [1], [0, 0, 0, 1, 1, 1], [], []>} : vector<16x16x12xbf16>, vector<12x4xbf16>, vector<16x16x4xf32> -> vector<16x16x4xf32>
    "tpu.trace_stop"() : () -> ()
    %75 = arith.addf %66, %74 : vector<16x16x4xf32>
    %c0_78 = arith.constant 0 : index
    %c0_79 = arith.constant 0 : index
    %76 = vector.load %arg5[%c0_78, %c0_79] : memref<1x4xf32, #tpu.memory_space<vmem>>, vector<1x4xf32>
    %77 = vector.shape_cast %76 : vector<1x4xf32> to vector<4xf32>
    %78 = vector.shape_cast %77 : vector<4xf32> to vector<1x1x4xf32>
    %79 = vector.broadcast %78 : vector<1x1x4xf32> to vector<16x16x4xf32>
    %80 = arith.addf %75, %79 : vector<16x16x4xf32>
    %81 = arith.extf %1 : vector<16x16x4xbf16> to vector<16x16x4xf32>
    %82 = arith.addf %80, %81 : vector<16x16x4xf32>
    %cst_80 = arith.constant 0.000000e+00 : f32
    %83 = vector.broadcast %cst_80 : f32 to vector<16x16x4xf32>
    %84 = arith.maximumf %82, %83 : vector<16x16x4xf32>
    %c0_81 = arith.constant 0 : index
    %c0_82 = arith.constant 0 : index
    %c0_83 = arith.constant 0 : index
    %c0_84 = arith.constant 0 : index
    %85 = vector.load %arg6[%c0_81, %c0_82, %c0_83, %c0_84] : memref<1x16x16x4xf32, #tpu.memory_space<vmem>>, vector<1x16x16x4xf32>
    %86 = vector.shape_cast %85 : vector<1x16x16x4xf32> to vector<16x16x4xf32>
    %87 = vector.shape_cast %84 : vector<16x16x4xf32> to vector<1x16x16x4xf32>
    tpu.vector_store %arg6[%c0_81, %c0_82, %c0_83, %c0_84], %87 {strides = array<i32>} : memref<1x16x16x4xf32, #tpu.memory_space<vmem>>, vector<1x16x16x4xf32>,
    return
  }
  func.func @transform_0(%arg0: i32) -> (i32, i32, i32, i32) {
    %c0_i32 = arith.constant 0 : i32
    %c0_i32_0 = arith.constant 0 : i32
    %c0_i32_1 = arith.constant 0 : i32
    %c0_i32_2 = arith.constant 0 : i32
    return %arg0, %c0_i32, %c0_i32_0, %c0_i32_1 : i32, i32, i32, i32
  }
  func.func @transform_1(%arg0: i32) -> (i32, i32, i32) {
    %c0_i32 = arith.constant 0 : i32
    %c0_i32_0 = arith.constant 0 : i32
    %c0_i32_1 = arith.constant 0 : i32
    %c0_i32_2 = arith.constant 0 : i32
    return %c0_i32, %c0_i32_0, %c0_i32_1 : i32, i32, i32
  }
  func.func @transform_2(%arg0: i32) -> (i32, i32) {
    %c0_i32 = arith.constant 0 : i32
    %c0_i32_0 = arith.constant 0 : i32
    %c0_i32_1 = arith.constant 0 : i32
    return %c0_i32, %c0_i32_0 : i32, i32
  }
  func.func @transform_3(%arg0: i32) -> (i32, i32, i32) {
    %c0_i32 = arith.constant 0 : i32
    %c0_i32_0 = arith.constant 0 : i32
    %c0_i32_1 = arith.constant 0 : i32
    %c0_i32_2 = arith.constant 0 : i32
    return %c0_i32, %c0_i32_0, %c0_i32_1 : i32, i32, i32
  }
  func.func @transform_4(%arg0: i32) -> (i32, i32) {
    %c0_i32 = arith.constant 0 : i32
    %c0_i32_0 = arith.constant 0 : i32
    %c0_i32_1 = arith.constant 0 : i32
    return %c0_i32, %c0_i32_0 : i32, i32
  }
  func.func @transform_5(%arg0: i32) -> (i32, i32, i32, i32) {
    %c0_i32 = arith.constant 0 : i32
    %c0_i32_0 = arith.constant 0 : i32
    %c0_i32_1 = arith.constant 0 : i32
    %c0_i32_2 = arith.constant 0 : i32
    return %arg0, %c0_i32, %c0_i32_0, %c0_i32_1 : i32, i32, i32, i32
  }
}

</mosaic_0001>

<bundles_post_ra>
// kernel: tpu_custom_call.1
= control target key start
LH: loop header
LB: loop body
LE: loop exit
PB: predicated region body
PF: predicated region fallthrough
CT: control target
= control target key end

     0   :  { %s7446_s18 = smov 0   ;;  %s9513_s0 = inlined_call_operand.vmem [shape: bf16[2,16,16,4], index: 0, kind: input, shape index: {}]   ;;  %s9514_s1 = inlined_call_operand.vmem [shape: bf16[3,12,4], index: 1, kind: input, shape index: {}]   ;;  %s9515_s2 = inlined_call_operand.vmem [shape: f32[1,4], index: 2, kind: input, shape index: {}]   ;;  %s9516_s3 = inlined_call_operand.vmem [shape: bf16[3,12,4], index: 3, kind: input, shape index: {}]   ;;  %s9517_s4 = inlined_call_operand.vmem [shape: f32[1,4], index: 4, kind: input, shape index: {}]   ;;  %s9518_s5 = inlined_call_operand.vmem [shape: f32[2,16,16,4], index: 5, kind: output, shape index: {}]  }
   0x1 LB: > { %s6288_s19 = sadd.s32 4294967295, %s7411_s18   ;;  %p6292_p0 = scmp.ge.s32.totalorder %s7411_s18, 1  ;;  %s7411_s18 = sphi %s7446_s18, %s15_s18  }
   0x2   : > { %p187_p1 = scmp.lt.s32.totalorder %s7411_s18, 3 }
   0x4   : > { %p188_p2 = pnand %p6292_p0, %p187_p1 }
   0x5   : > { %p215_p3 = scmp.lt.s32.totalorder (!%p188_p2), %s6288_s19, 1  ;;  %vm261_vm0 = vcmask (!%p188_p2), 24576   ;;  %vm269_vm1 = vsmask.f32 (!%p188_p2), 256  ;;  %v271_v1 = vld [vmem:[#allocation2 + $0xc] sm:$0x1] (!%p188_p2) }
   0x6   : > { %191 = sbr.rel (%p188_p2) target bundleno = 1151 (0x47f), region = 40  ;;  %vm7456_vm2 = vmand (!%p188_p2), %vm261_vm0, %vm269_vm1  ;;  %vm319_vm3 = vsmask.f32 (!%p188_p2), 7938  ;;  %v321_v2 = vld [vmem:[#allocation2 + $0x14] sm:$0x1] (!%p188_p2)  ;;  %vm258_vm5 = vcmask (!%p188_p2), 27648  }
   0x7   : > { %v272_v3 = vsel (!%p188_p2), %vm7456_vm2, 0, %v271_v1  ;;  %vm7466_vm4 = vmand (!%p188_p2), %vm261_vm0, %vm319_vm3  ;;  %v274_v6 = vld [vmem:[#allocation2 + $0x18] sm:$0x1] (!%p188_p2)  ;;  %v324_v8 = vld [vmem:[#allocation2 + $0x20] sm:$0x1] (!%p188_p2)  ;;  %v7413_v10 = vmov (!%p188_p2), 0  }
   0x8   : > { %273 = vst [vmem:[#allocation2 + $0xc] sm:$0x1] (!%p188_p2), %v272_v3  ;;  %v322_v5 = vsel (!%p188_p2), %vm7466_vm4, 0, %v321_v2  ;;  %v275_v7 = vsel (!%p188_p2), %vm7456_vm2, 0, %v274_v6  ;;  %v280_v9 = vld [vmem:[#allocation2 + $0x30] sm:$0x1] (!%p188_p2)  ;;  %vm7512_vm8 = vmand (!%p188_p2), %vm258_vm5, %vm319_vm3 }
   0x9   : > { %323 = vst [vmem:[#allocation2 + $0x14] sm:$0x1] (!%p188_p2), %v322_v5  ;;  %259 = vst.msk [vmem:[#allocation2] sm:$0xf] (!%p188_p2), %vm258_vm5, %v7413_v10  ;;  %vm369_vm6 = vsmask.f32 (!%p188_p2), 4368 }
   0xa   : > { %260 = vst.msk [vmem:[#allocation2 + $0x4] sm:$0xf] (!%p188_p2), %vm258_vm5, %v7413_v10  ;;  %264 = vst.msk [vmem:[#allocation2 + $0xcc] sm:$0xf] (!%p188_p2), %vm258_vm5, %v7413_v10  ;;  %v325_v11 = vsel (!%p188_p2), %vm7466_vm4, 0, %v324_v8  ;;  %v281_v12 = vsel (!%p188_p2), %vm7456_vm2, 0, %v280_v9 }
   0xb   : > { %262 = vst.msk [vmem:[#allocation2 + $0x8] sm:$0x1] (!%p188_p2), %vm261_vm0, %v7413_v10  ;;  %266 = vst.msk [vmem:[#allocation2 + $0xd4] sm:$0x1] (!%p188_p2), %vm261_vm0, %v7413_v10  ;;  %v330_v13 = vld [vmem:[#allocation2 + $0x38] sm:$0x1] (!%p188_p2) }
   0xc   : > { %265 = vst.msk [vmem:[#allocation2 + $0xd0] sm:$0xf] (!%p188_p2), %vm258_vm5, %v7413_v10  ;;  %3174 = vst.msk [vmem:[#allocation3] sm:$0xf] (!%p188_p2), %vm258_vm5, %v7413_v10  ;;  %v331_v31 = vsel (!%p188_p2), %vm7466_vm4, 0, %v330_v13  ;;  %vm1206_vm9 = vcmask (!%p188_p2), 1046528  }
   0xd   : > { %s9528_s19 = smov (!%p215_p3, %s6288_s19), 1  ;;  %3175 = vst.msk [vmem:[#allocation3 + $0x4] sm:$0xf] %vm258_vm5, %v7413_v10  ;;  %3178 = vst.msk [vmem:[#allocation3 + $0xcc] sm:$0xf] %vm258_vm5, %v7413_v10  ;;  %s7414_s24 = smov 8  }
   0xe   : > { %s6635_s20 = sshll.u32 %s9528_s19, 7  ;;  %3176 = vst.msk [vmem:[#allocation3 + $0x8] sm:$0x1] %vm261_vm0, %v7413_v10  ;;  %3180 = vst.msk [vmem:[#allocation3 + $0xd4] sm:$0x1] %vm261_vm0, %v7413_v10  ;;  %s7415_s25 = smov 4  }
   0xf   : > { %3179 = vst.msk [vmem:[#allocation3 + $0xd0] sm:$0xf] %vm258_vm5, %v7413_v10  ;;  %s7490_s23 = scalar_lea.vmem %s9513_s0, %s6635_s20  ;;  %276 = vst [vmem:[#allocation2 + $0x18] sm:$0x1] %v275_v7  ;;  %v693_v34 = vld [vmem:[#allocation2 + $0xc] sm:$0xf] }
  0x10   : > { %v226_v14 = vld [vmem:[%s7490_s23] sm:$0xf]  ;;  %v227_v15 = vld [vmem:[%s7490_s23 + $0x4] sm:$0xf]  ;;  %v228_v16 = vld [vmem:[%s7490_s23 + $0x8] sm:$0xf] }
  0x11   : > { %326 = vst [vmem:[#allocation2 + $0x20] sm:$0x1] %v325_v11  ;;  %282 = vst [vmem:[#allocation2 + $0x30] sm:$0x1] %v281_v12  ;;  %v372_v17 = vshrl.u32 %v226_v14, 16  ;;  %v375_v18 = vshll.u32 %v226_v14, 16 }
  0x12   : > { %v380_v19 = vshrl.u32 %v227_v15, 16  ;;  %v383_v20 = vshll.u32 %v227_v15, 16  ;;  %v229_v21 = vld [vmem:[%s7490_s23 + $0xc] sm:$0xf]  ;;  %v389_v22 = vshrl.u32 %v228_v16, 16  ;;  %v392_v23 = vshll.u32 %v228_v16, 16  ;;  %vm7503_vm7 = vmor %vm269_vm1, %vm369_vm6 }
  0x13   : > { %v397_v24 = vshrl.u32 %v229_v21, 16  ;;  %v400_v25 = vshll.u32 %v229_v21, 16  ;;  %v232_v26 = vld [vmem:[%s7490_s23 + $0x18] sm:$0xf]  ;;  %v374_v28 = vrot.slane %v372_v17, 7  ;;  %vm1287_vm11 = vcmask 31744  }
  0x14   : > { %v382_v29 = vrot.slane %v380_v19, 7  ;;  %v233_v30 = vld [vmem:[%s7490_s23 + $0x1c] sm:$0xf]  ;;  %v423_v32 = vshrl.u32 %v232_v26, 16  ;;  %v391_v35 = vrot.slane %v389_v22, 7  ;;  %v426_v37 = vshll.u32 %v232_v26, 16 }
  0x15   : > { %v399_v36 = vrot.slane %v397_v24, 7  ;;  %332 = vst [vmem:[#allocation2 + $0x38] sm:$0x1] %v331_v31  ;;  %v431_v38 = vshrl.u32 %v233_v30, 16  ;;  %v277_v39 = vld [vmem:[#allocation2 + $0x24] sm:$0x1]  ;;  %v377_v40 = vor.u32 %v375_v18, %v374_v28 }
  0x16   : > { %v378_v41 = vrot.slane %v374_v28, 4  ;;  %v385_v42 = vor.u32 %v383_v20, %v382_v29  ;;  %v387_v43 = vrot.slane %v382_v29, 4  ;;  %v697_v44 = vld [vmem:[#allocation2 + $0x14] sm:$0x1]  ;;  %v230_v45 = vld [vmem:[%s7490_s23 + $0x10] sm:$0xf]  ;;  %v394_v46 = vor.u32 %v392_v23, %v391_v35 }
  0x17   : > { %v395_v47 = vrot.slane %v391_v35, 4  ;;  %v402_v48 = vor.u32 %v400_v25, %v399_v36  ;;  %v404_v49 = vrot.slane %v399_v36, 4  ;;  %v700_v50 = vld [vmem:[#allocation2 + $0x18] sm:$0xf]  ;;  %v231_v51 = vld [vmem:[%s7490_s23 + $0x14] sm:$0xf]  ;;  %v694_v53 = vsel %vm7512_vm8, %v377_v40, %v693_v34 }
  0x18   : > { %v386_v52 = vsel %vm7503_vm7, %v378_v41, %v385_v42  ;;  %v698_v54 = vsel %vm7456_vm2, %v387_v43, %v697_v44  ;;  %v704_v55 = vld [vmem:[#allocation2 + $0x20] sm:$0x1]  ;;  %v425_v56 = vrot.slane %v423_v32, 7  ;;  %v714_v57 = vld [vmem:[#allocation2 + $0x30] sm:$0xf]  ;;  %v701_v59 = vsel %vm7512_vm8, %v394_v46, %v700_v50  ;;  %s6636_s21 = sshll.u32 %s9528_s19, 8 }
  0x19   : > { %695 = vst [vmem:[#allocation2 + $0xc] sm:$0xf] %v694_v53  ;;  %696 = vst.msk [vmem:[#allocation2 + $0x10] sm:$0xf] %vm258_vm5, %v386_v52  ;;  %v403_v58 = vsel %vm7503_vm7, %v395_v47, %v402_v48  ;;  %v705_v60 = vsel %vm7456_vm2, %v404_v49, %v704_v55  ;;  %v433_v61 = vrot.slane %v431_v38, 7  ;;  %v434_v3 = vshll.u32 %v233_v30, 16  ;;  %s9387_s19 = scalar_lea.vmem %s9518_s5, %s6636_s21 }
  0x1a   : > { %699 = vst [vmem:[#allocation2 + $0x14] sm:$0x1] %v698_v54  ;;  %v327_v62 = vld [vmem:[#allocation2 + $0x2c] sm:$0x1]  ;;  %v7532_v63 = vld [vmem:[%s7490_s23 + $0x28] sm:$0xf]  ;;  %v428_v1 = vor.u32 %v426_v37, %v425_v56 }
  0x1b   : > { %702 = vst [vmem:[#allocation2 + $0x18] sm:$0xf] %v701_v59  ;;  %703 = vst.msk [vmem:[#allocation2 + $0x1c] sm:$0xf] %vm258_vm5, %v403_v58  ;;  %v429_v2 = vrot.slane %v425_v56, 4  ;;  %v278_v5 = vsel %vm7456_vm2, 0, %v277_v39  ;;  %v436_v12 = vor.u32 %v434_v3, %v433_v61 }
  0x1c   : > { %706 = vst [vmem:[#allocation2 + $0x20] sm:$0x1] %v705_v60  ;;  %v7538_v6 = vld [vmem:[%s7490_s23 + $0x2c] sm:$0xf]  ;;  %v438_v7 = vrot.slane %v433_v61, 4  ;;  %v328_v8 = vsel %vm7466_vm4, 0, %v327_v62  ;;  %v715_v13 = vsel %vm7512_vm8, %v428_v1, %v714_v57 }
  0x1d   : > { %279 = vst [vmem:[#allocation2 + $0x24] sm:$0x1] %v278_v5  ;;  %v406_v9 = vshrl.u32 %v230_v45, 16  ;;  %v409_v10 = vshll.u32 %v230_v45, 16  ;;  %v286_v11 = vld [vmem:[#allocation2 + $0x48] sm:$0x1]  ;;  %v437_v22 = vsel %vm7503_vm7, %v429_v2, %v436_v12 }
  0x1e   : > { %v718_v14 = vld [vmem:[#allocation2 + $0x38] sm:$0x1]  ;;  %329 = vst [vmem:[#allocation2 + $0x2c] sm:$0x1] %v328_v8  ;;  %v414_v15 = vshrl.u32 %v231_v51, 16  ;;  %v417_v16 = vshll.u32 %v231_v51, 16 }
  0x1f   : > { %v336_v17 = vld [vmem:[#allocation2 + $0x50] sm:$0x1]  ;;  %716 = vst [vmem:[#allocation2 + $0x30] sm:$0xf] %v715_v13  ;;  %v719_v18 = vsel %vm7456_vm2, %v438_v7, %v718_v14  ;;  %v408_v19 = vrot.slane %v406_v9, 7  ;;  %v287_v20 = vsel %vm7456_vm2, 0, %v286_v11 }
  0x20   : > { %v337_v21 = vsel %vm7466_vm4, 0, %v336_v17  ;;  %vm981_vm10 = vsmask.f32 7424  ;;  %720 = vst [vmem:[#allocation2 + $0x38] sm:$0x1] %v719_v18  ;;  %v416_v23 = vrot.slane %v414_v15, 7 }
  0x21   : > { %288 = vst [vmem:[#allocation2 + $0x48] sm:$0x1] %v287_v20  ;;  %338 = vst [vmem:[#allocation2 + $0x50] sm:$0x1] %v337_v21  ;;  %v457_v24 = vshrl.u32 %v7532_v63, 16  ;;  %v412_v25 = vrot.slane %v408_v19, 4  ;;  %v411_v30 = vor.u32 %v409_v10, %v408_v19 }
  0x22   : > { %717 = vst.msk [vmem:[#allocation2 + $0x34] sm:$0xf] %vm258_vm5, %v437_v22  ;;  %v460_v26 = vshll.u32 %v7532_v63, 16  ;;  %v465_v28 = vshrl.u32 %v7538_v6, 16  ;;  %v468_v29 = vshll.u32 %v7538_v6, 16  ;;  %v419_v31 = vor.u32 %v417_v16, %v416_v23  ;;  %v7120_v32 = vld [vmem:[#allocation2 + $0xc] sm:$0xff]  }
  0x23   : > { %v7121_v34 = vld [vmem:[#allocation2 + $0x14] ss:$0 sps:$4 sm:$0x11]   ;;  %v7122_v35 = vld [vmem:[#allocation2 + $0x18] sm:$0xff]   ;;  %v421_v37 = vrot.slane %v416_v23, 4  ;;  %v1755_v38 = vrot.slane %v7120_v32, 1 }
  0x24   : > { %v420_v36 = vsel %vm7503_vm7, %v412_v25, %v419_v31  ;;  %v1756_v39 = vrot.slane %v7121_v34, 1  ;;  %v1532_v40 = vshrl.u32 %v7120_v32, 16  ;;  %v1534_v41 = vshll.u32 %v7120_v32, 16  ;;  %v707_v42 = vld [vmem:[#allocation2 + $0x24] sm:$0xf] }
  0x25   : > { %710 = vst.msk [vmem:[#allocation2 + $0x28] sm:$0xf] %vm258_vm5, %v420_v36  ;;  %v1539_v43 = vshll.u32 %v7121_v34, 16  ;;  %v7123_v44 = vld [vmem:[#allocation2 + $0x20] ss:$0 sps:$4 sm:$0x11]   ;;  %v708_v47 = vsel %vm7512_vm8, %v411_v30, %v707_v42 }
  0x26   : > { %v1758_v45 = vrot.slane %v7122_v35, 1  ;;  %v1544_v46 = vshrl.u32 %v7122_v35, 16  ;;  %v1757_v48 = vsel %vm1206_vm9, %v1755_v38, %v1756_v39  ;;  %v1536_v49 = vrot.slane %v1534_v41, 1  ;;  %709 = vst [vmem:[#allocation2 + $0x24] sm:$0xf] %v708_v47 }
  0x27   : > { %v1546_v50 = vshll.u32 %v7122_v35, 16  ;;  %1803 = vrot.lane.b32.xlu1 %v1757_v48, %s7414_s24  ;;  %v1541_v51 = vrot.slane %v1539_v43, 1  ;;  %v1759_v52 = vrot.slane %v7123_v44, 1  ;;  %v1551_v53 = vshll.u32 %v7123_v44, 16  ;;  %v711_v58 = vld [vmem:[#allocation2 + $0x2c] sm:$0x1] }
  0x28   : > { %v1537_v55 = vor.u32 %v1536_v49, %v1532_v40  ;;  %v7125_v57 = vld [vmem:[#allocation2 + $0x38] ss:$0 sps:$4 sm:$0x11]   ;;  %v283_v1 = vld [vmem:[#allocation2 + $0x3c] sm:$0x1]  ;;  %v712_v7 = vsel %vm7456_vm2, %v421_v37, %v711_v58  ;;  %v459_v13 = vrot.slane %v457_v24, 7 }
  0x29   : > { %v7124_v54 = vld [vmem:[#allocation2 + $0x30] sm:$0xff]   ;;  %v1548_v56 = vrot.slane %v1546_v50, 1  ;;  %v1760_v59 = vsel %vm1206_vm9, %v1758_v45, %v1759_v52  ;;  %v1553_v60 = vrot.slane %v1551_v53, 1  ;;  %v1575_v5 = vshll.u32 %v7125_v57, 16  ;;  %v234_v8 = vld [vmem:[%s7490_s23 + $0x20] sm:$0xf] }
  0x2a   : > { %v1568_v61 = vshrl.u32 %v7124_v54, 16  ;;  %v1570_v62 = vshll.u32 %v7124_v54, 16  ;;  %v1542_v2 = vsel %vm981_vm10, %v1537_v55, %v1541_v51  ;;  %v333_v9 = vld [vmem:[#allocation2 + $0x44] sm:$0x1]  ;;  %713 = vst [vmem:[#allocation2 + $0x2c] sm:$0x1] %v712_v7  ;;  %v462_v22 = vor.u32 %v460_v26, %v459_v13 }
  0x2b   : > { %v1549_v3 = vor.u32 %v1548_v56, %v1544_v46  ;;  %1723 = vrot.lane.b32.xlu0 %v1542_v2, %s7415_s25  ;;  %1805 = vrot.lane.b32.xlu1 %v1760_v59, %s7414_s24  ;;  %v1764_v11 = vrot.slane %v7124_v54, 1  ;;  %v1765_v12 = vrot.slane %v7125_v57, 1  ;;  %v1577_v15 = vrot.slane %v1575_v5, 1  ;;  %v728_v17 = vld [vmem:[#allocation2 + $0x48] sm:$0xf] }
  0x2c   : > { %v1572_v10 = vrot.slane %v1570_v62, 1  ;;  %v467_v16 = vrot.slane %v465_v28, 7  ;;  %v284_v18 = vsel %vm7456_vm2, 0, %v283_v1  ;;  %v463_v23 = vrot.slane %v459_v13, 4  ;;  %v732_v25 = vld [vmem:[#allocation2 + $0x50] sm:$0x1] }
  0x2d   : > { %v1554_v14 = vsel %vm981_vm10, %v1549_v3, %v1553_v60  ;;  %v7574_v20 = vld [vmem:[#allocation2 + $0x24] sm:$0xff]   ;;  %v1766_v21 = vsel %vm1206_vm9, %v1764_v11, %v1765_v12  ;;  %285 = vst [vmem:[#allocation2 + $0x3c] sm:$0x1] %v284_v18  ;;  %v334_v31 = vsel %vm7466_vm4, 0, %v333_v9  ;;  %v440_v32 = vshrl.u32 %v234_v8, 16 }
  0x2e   : > { %v1573_v19 = vor.u32 %v1572_v10, %v1568_v61  ;;  %v470_v24 = vor.u32 %v468_v29, %v467_v16  ;;  %v472_v28 = vrot.slane %v467_v16, 4  ;;  %v235_v30 = vld [vmem:[%s7490_s23 + $0x24] sm:$0xf]  ;;  %v1556_v63 = vshrl.u32 %v7574_v20, 16  ;;  %335 = vst [vmem:[#allocation2 + $0x44] sm:$0x1] %v334_v31 }
  0x2f   : > { %1725 = vrot.lane.b32.xlu0 %v1554_v14, %s7415_s25  ;;  %v1558_v26 = vshll.u32 %v7574_v20, 16  ;;  %v1761_v35 = vrot.slane %v7574_v20, 1  ;;  %v729_v29 = vsel %vm7512_vm8, %v462_v22, %v728_v17  ;;  %v442_v37 = vrot.slane %v440_v32, 7  ;;  %v240_v38 = vld [vmem:[%s7490_s23 + $0x38] sm:$0xf] }
  0x30   : > { %v1578_v34 = vsel %vm981_vm10, %v1573_v19, %v1577_v15  ;;  %v471_v6 = vsel %vm7503_vm7, %v463_v23, %v470_v24  ;;  %v733_v36 = vsel %vm7456_vm2, %v472_v28, %v732_v25  ;;  %v292_v39 = vld [vmem:[#allocation2 + $0x60] sm:$0x1]  ;;  %730 = vst [vmem:[#allocation2 + $0x48] sm:$0xf] %v729_v29  ;;  %v443_v41 = vshll.u32 %v234_v8, 16 }
  0x31   : > { %1729 = vrot.lane.b32.xlu1 %v1578_v34, %s7415_s25  ;;  %v1560_v40 = vrot.slane %v1558_v26, 1  ;;  %731 = vst.msk [vmem:[#allocation2 + $0x4c] sm:$0xf] %vm258_vm5, %v471_v6  ;;  %734 = vst [vmem:[#allocation2 + $0x50] sm:$0x1] %v733_v36  ;;  %v448_v42 = vshrl.u32 %v235_v30, 16 }
  0x32   : > { %v451_v43 = vshll.u32 %v235_v30, 16  ;;  %v342_v44 = vld [vmem:[#allocation2 + $0x68] sm:$0x1]  ;;  %v7127_v45 = vld [vmem:[#allocation2 + $0x2c] ss:$0 sps:$4 sm:$0x11]   ;;  %v445_v48 = vor.u32 %v443_v41, %v442_v37 }
  0x33   : > { %v446_v46 = vrot.slane %v442_v37, 4  ;;  %v1561_v47 = vor.u32 %v1560_v40, %v1556_v63  ;;  %v450_v49 = vrot.slane %v448_v42, 7  ;;  %v241_v50 = vld [vmem:[%s7490_s23 + $0x3c] sm:$0xf]  ;;  %v293_v51 = vsel %vm7456_vm2, 0, %v292_v39 }
  0x34   : > { %v289_v52 = vld [vmem:[#allocation2 + $0x54] sm:$0x1]  ;;  %v1563_v53 = vshll.u32 %v7127_v45, 16  ;;  %v1762_v54 = vrot.slane %v7127_v45, 1  ;;  %v721_v55 = vld [vmem:[#allocation2 + $0x3c] sm:$0xf] }
  0x35   : > { %1809 = vrot.lane.b32.xlu1 %v1766_v21, %s7414_s24  ;;  %294 = vst [vmem:[#allocation2 + $0x60] sm:$0x1] %v293_v51  ;;  %v343_v56 = vsel %vm7466_vm4, 0, %v342_v44  ;;  %v491_v57 = vshrl.u32 %v240_v38, 16  ;;  %v453_v58 = vor.u32 %v451_v43, %v450_v49  ;;  %v455_v59 = vrot.slane %v450_v49, 4 }
  0x36   : > { %v722_v60 = vsel %vm7512_vm8, %v445_v48, %v721_v55  ;;  %344 = vst [vmem:[#allocation2 + $0x68] sm:$0x1] %v343_v56  ;;  %v494_v61 = vshll.u32 %v240_v38, 16  ;;  %v238_v62 = vld [vmem:[%s7490_s23 + $0x30] sm:$0xf]  ;;  %v1565_v1 = vrot.slane %v1563_v53, 1  ;;  %v1763_v15 = vsel %vm1206_vm9, %v1761_v35, %v1762_v54 }
  0x37   : > { %723 = vst [vmem:[#allocation2 + $0x3c] sm:$0xf] %v722_v60  ;;  %v725_v2 = vld [vmem:[#allocation2 + $0x44] sm:$0x1]  ;;  %v493_v3 = vrot.slane %v491_v57, 7  ;;  %v499_v5 = vshrl.u32 %v241_v50, 16  ;;  %v454_v7 = vsel %vm7503_vm7, %v446_v46, %v453_v58 }
  0x38   : > { %v726_v8 = vsel %vm7456_vm2, %v455_v59, %v725_v2  ;;  %v502_v9 = vshll.u32 %v241_v50, 16  ;;  %v239_v10 = vld [vmem:[%s7490_s23 + $0x34] sm:$0xf]  ;;  %v290_v11 = vsel %vm7456_vm2, 0, %v289_v52  ;;  %v339_v12 = vld [vmem:[#allocation2 + $0x5c] sm:$0x1]  ;;  %v1566_v13 = vsel %vm981_vm10, %v1561_v47, %v1565_v1 }
  0x39   : > { %724 = vst.msk [vmem:[#allocation2 + $0x40] sm:$0xf] %vm258_vm5, %v454_v7  ;;  %727 = vst [vmem:[#allocation2 + $0x44] sm:$0x1] %v726_v8  ;;  %v496_v14 = vor.u32 %v494_v61, %v493_v3  ;;  %1727 = vrot.lane.b32.xlu0 %v1566_v13, %s7415_s25  ;;  %v7128_v16 = vld [vmem:[#allocation2 + $0x48] sm:$0xff]   ;;  %v497_v18 = vrot.slane %v493_v3, 4 }
  0x3a   : > { %291 = vst [vmem:[#allocation2 + $0x54] sm:$0x1] %v290_v11  ;;  %v7129_v17 = vld [vmem:[#allocation2 + $0x50] ss:$0 sps:$4 sm:$0x11]   ;;  %v501_v19 = vrot.slane %v499_v5, 7 }
  0x3b   : > { %v340_v20 = vsel %vm7466_vm4, 0, %v339_v12  ;;  %v474_v21 = vshrl.u32 %v238_v62, 16  ;;  %v477_v22 = vshll.u32 %v238_v62, 16  ;;  %v482_v23 = vshrl.u32 %v239_v10, 16  ;;  %v298_v41 = vld [vmem:[#allocation2 + $0x78] sm:$0x1] }
  0x3c   : > { %v1592_v25 = vshrl.u32 %v7128_v16, 16  ;;  %v1594_v24 = vshll.u32 %v7128_v16, 16  ;;  %v1599_v28 = vshll.u32 %v7129_v17, 16  ;;  %v1770_v30 = vrot.slane %v7128_v16, 1  ;;  %v742_v31 = vld [vmem:[#allocation2 + $0x60] sm:$0xf] }
  0x3d   : > { %341 = vst [vmem:[#allocation2 + $0x5c] sm:$0x1] %v340_v20  ;;  %v1771_v32 = vrot.slane %v7129_v17, 1  ;;  %v504_v34 = vor.u32 %v502_v9, %v501_v19  ;;  %v506_v63 = vrot.slane %v501_v19, 4  ;;  %v743_v26 = vsel %vm7512_vm8, %v496_v14, %v742_v31  ;;  %v746_v35 = vld [vmem:[#allocation2 + $0x68] sm:$0x1]  ;;  %1807 = vrot.lane.b32.xlu0 %v1763_v15, %s7414_s24 }
  0x3e   : > { %v1596_v6 = vrot.slane %v1594_v24, 1  ;;  %v1601_v29 = vrot.slane %v1599_v28, 1  ;;  %744 = vst [vmem:[#allocation2 + $0x60] sm:$0xf] %v743_v26  ;;  %v476_v36 = vrot.slane %v474_v21, 7  ;;  %v484_v37 = vrot.slane %v482_v23, 7 }
  0x3f   : > { %v505_v38 = vsel %vm7503_vm7, %v497_v18, %v504_v34  ;;  %v747_v39 = vsel %vm7456_vm2, %v506_v63, %v746_v35  ;;  %v485_v40 = vshll.u32 %v239_v10, 16  ;;  %v348_v42 = vld [vmem:[#allocation2 + $0x80] sm:$0x1]  ;;  %v244_v47 = vld [vmem:[%s7490_s23 + $0x48] sm:$0xf]  ;;  %v1772_v49 = vsel %vm1206_vm9, %v1770_v30, %v1771_v32 }
  0x40   : > { %v1597_v43 = vor.u32 %v1596_v6, %v1592_v25  ;;  %v7130_v44 = vld [vmem:[#allocation2 + $0x3c] sm:$0xff]   ;;  %745 = vst.msk [vmem:[#allocation2 + $0x64] sm:$0xf] %vm258_vm5, %v505_v38  ;;  %748 = vst [vmem:[#allocation2 + $0x68] sm:$0x1] %v747_v39  ;;  %v479_v45 = vor.u32 %v477_v22, %v476_v36  ;;  %v480_v46 = vrot.slane %v476_v36, 4 }
  0x41   : > { %v7131_v48 = vld [vmem:[#allocation2 + $0x44] ss:$0 sps:$4 sm:$0x11]   ;;  %v487_v50 = vor.u32 %v485_v40, %v484_v37  ;;  %v489_v51 = vrot.slane %v484_v37, 4  ;;  %v735_v52 = vld [vmem:[#allocation2 + $0x54] sm:$0xf] }
  0x42   : > { %v1602_v53 = vsel %vm981_vm10, %v1597_v43, %v1601_v29  ;;  %v1580_v54 = vshrl.u32 %v7130_v44, 16  ;;  %v1582_v55 = vshll.u32 %v7130_v44, 16  ;;  %v1767_v56 = vrot.slane %v7130_v44, 1  ;;  %v245_v57 = vld [vmem:[%s7490_s23 + $0x4c] sm:$0xf] }
  0x43   : > { %1733 = vrot.lane.b32.xlu1 %v1602_v53, %s7415_s25  ;;  %v1587_v58 = vshll.u32 %v7131_v48, 16  ;;  %v1768_v59 = vrot.slane %v7131_v48, 1  ;;  %v488_v60 = vsel %vm7503_vm7, %v480_v46, %v487_v50  ;;  %v736_v61 = vsel %vm7512_vm8, %v479_v45, %v735_v52  ;;  %v7638_v1 = vld [vmem:[%s7490_s23 + $0x40] sm:$0xf]  ;;  %v295_v2 = vld [vmem:[#allocation2 + $0x6c] sm:$0x1] }
  0x44   : > { %v739_v62 = vld [vmem:[#allocation2 + $0x5c] sm:$0x1]  ;;  %v1584_v3 = vrot.slane %v1582_v55, 1  ;;  %737 = vst [vmem:[#allocation2 + $0x54] sm:$0xf] %v736_v61  ;;  %v299_v7 = vsel %vm7456_vm2, 0, %v298_v41 }
  0x45   : > { %738 = vst.msk [vmem:[#allocation2 + $0x58] sm:$0xf] %vm258_vm5, %v488_v60  ;;  %v740_v5 = vsel %vm7456_vm2, %v489_v51, %v739_v62  ;;  %v349_v8 = vsel %vm7466_vm4, 0, %v348_v42  ;;  %v345_v9 = vld [vmem:[#allocation2 + $0x74] sm:$0x1]  ;;  %v1589_v10 = vrot.slane %v1587_v58, 1  ;;  %v1769_v17 = vsel %vm1206_vm9, %v1767_v56, %v1768_v59 }
  0x46   : > { %741 = vst [vmem:[#allocation2 + $0x5c] sm:$0x1] %v740_v5  ;;  %300 = vst [vmem:[#allocation2 + $0x78] sm:$0x1] %v299_v7  ;;  %v525_v11 = vshrl.u32 %v244_v47, 16  ;;  %v528_v12 = vshll.u32 %v244_v47, 16  ;;  %v1585_v13 = vor.u32 %v1584_v3, %v1580_v54 }
  0x47   : > { %350 = vst [vmem:[#allocation2 + $0x80] sm:$0x1] %v349_v8  ;;  %v533_v14 = vshrl.u32 %v245_v57, 16  ;;  %v536_v15 = vshll.u32 %v245_v57, 16  ;;  %v296_v16 = vsel %vm7456_vm2, 0, %v295_v2  ;;  %1813 = vrot.lane.b32.xlu1 %v1772_v49, %s7414_s24  ;;  %v7132_v18 = vld [vmem:[#allocation2 + $0x60] sm:$0xff]  }
  0x48   : > { %v527_v19 = vrot.slane %v525_v11, 7  ;;  %297 = vst [vmem:[#allocation2 + $0x6c] sm:$0x1] %v296_v16  ;;  %v1590_v20 = vsel %vm981_vm10, %v1585_v13, %v1589_v10  ;;  %v7133_v21 = vld [vmem:[#allocation2 + $0x68] ss:$0 sps:$4 sm:$0x11]  }
  0x49   : > { %v535_v22 = vrot.slane %v533_v14, 7  ;;  %v346_v23 = vsel %vm7466_vm4, 0, %v345_v9  ;;  %v508_v25 = vshrl.u32 %v7638_v1, 16  ;;  %1731 = vrot.lane.b32.xlu0 %v1590_v20, %s7415_s25  ;;  %v1616_v24 = vshrl.u32 %v7132_v18, 16  ;;  %v243_v29 = vld [vmem:[%s7490_s23 + $0x44] sm:$0xf] }
  0x4a   : > { %v1618_v28 = vshll.u32 %v7132_v18, 16  ;;  %v1776_v30 = vrot.slane %v7132_v18, 1  ;;  %v530_v31 = vor.u32 %v528_v12, %v527_v19  ;;  %347 = vst [vmem:[#allocation2 + $0x74] sm:$0x1] %v346_v23  ;;  %v1623_v32 = vshll.u32 %v7133_v21, 16 }
  0x4b   : > { %v1777_v34 = vrot.slane %v7133_v21, 1  ;;  %v531_v63 = vrot.slane %v527_v19, 4  ;;  %v538_v26 = vor.u32 %v536_v15, %v535_v22  ;;  %v248_v45 = vld [vmem:[%s7490_s23 + $0x58] sm:$0xf]  ;;  %v304_v46 = vld [vmem:[#allocation2 + $0x90] sm:$0x1] }
  0x4c   : > { %v1620_v35 = vrot.slane %v1618_v28, 1  ;;  %v7134_v6 = vld [vmem:[#allocation2 + $0x54] sm:$0xff]   ;;  %v1625_v36 = vrot.slane %v1623_v32, 1  ;;  %v540_v49 = vrot.slane %v535_v22, 4  ;;  %v510_v54 = vrot.slane %v508_v25, 7 }
  0x4d   : > { %v7135_v37 = vld [vmem:[#allocation2 + $0x5c] ss:$0 sps:$4 sm:$0x11]   ;;  %v1778_v38 = vsel %vm1206_vm9, %v1776_v30, %v1777_v34  ;;  %v539_v39 = vsel %vm7503_vm7, %v531_v63, %v538_v26  ;;  %1811 = vrot.lane.b32.xlu0 %v1769_v17, %s7414_s24  ;;  %v1604_v41 = vshrl.u32 %v7134_v6, 16  ;;  %v1606_v42 = vshll.u32 %v7134_v6, 16 }
  0x4e   : > { %v1621_v40 = vor.u32 %v1620_v35, %v1616_v24  ;;  %v1773_v43 = vrot.slane %v7134_v6, 1  ;;  %v756_v44 = vld [vmem:[#allocation2 + $0x78] sm:$0xf]  ;;  %759 = vst.msk [vmem:[#allocation2 + $0x7c] sm:$0xf] %vm258_vm5, %v539_v39  ;;  %v1611_v47 = vshll.u32 %v7135_v37, 16 }
  0x4f   : > { %v1774_v48 = vrot.slane %v7135_v37, 1  ;;  %v757_v50 = vsel %vm7512_vm8, %v530_v31, %v756_v44  ;;  %v760_v51 = vld [vmem:[#allocation2 + $0x80] sm:$0x1]  ;;  %v1608_v53 = vrot.slane %v1606_v42, 1  ;;  %v511_v55 = vshll.u32 %v7638_v1, 16 }
  0x50   : > { %v1626_v52 = vsel %vm981_vm10, %v1621_v40, %v1625_v36  ;;  %758 = vst [vmem:[#allocation2 + $0x78] sm:$0xf] %v757_v50  ;;  %v354_v56 = vld [vmem:[#allocation2 + $0x98] sm:$0x1]  ;;  %v1613_v57 = vrot.slane %v1611_v47, 1  ;;  %v761_v59 = vsel %vm7456_vm2, %v540_v49, %v760_v51  ;;  %v516_v60 = vshrl.u32 %v243_v29, 16 }
  0x51   : > { %1737 = vrot.lane.b32.xlu1 %v1626_v52, %s7415_s25  ;;  %v1775_v58 = vsel %vm1206_vm9, %v1773_v43, %v1774_v48  ;;  %v749_v61 = vld [vmem:[#allocation2 + $0x6c] sm:$0xf]  ;;  %v249_v62 = vld [vmem:[%s7490_s23 + $0x5c] sm:$0xf]  ;;  %v1609_v2 = vor.u32 %v1608_v53, %v1604_v41  ;;  %762 = vst [vmem:[#allocation2 + $0x80] sm:$0x1] %v761_v59  ;;  %v513_v3 = vor.u32 %v511_v55, %v510_v54 }
  0x52   : > { %v514_v5 = vrot.slane %v510_v54, 4  ;;  %v519_v7 = vshll.u32 %v243_v29, 16  ;;  %v246_v8 = vld [vmem:[%s7490_s23 + $0x50] sm:$0xf]  ;;  %v301_v9 = vld [vmem:[#allocation2 + $0x84] sm:$0x1] }
  0x53   : > { %v518_v1 = vrot.slane %v516_v60, 7  ;;  %v305_v10 = vsel %vm7456_vm2, 0, %v304_v46  ;;  %v355_v11 = vsel %vm7466_vm4, 0, %v354_v56  ;;  %v559_v12 = vshrl.u32 %v248_v45, 16  ;;  %v351_v13 = vld [vmem:[#allocation2 + $0x8c] sm:$0x1] }
  0x54   : > { %v1614_v14 = vsel %vm981_vm10, %v1609_v2, %v1613_v57  ;;  %v750_v15 = vsel %vm7512_vm8, %v513_v3, %v749_v61  ;;  %v753_v16 = vld [vmem:[#allocation2 + $0x74] sm:$0x1]  ;;  %306 = vst [vmem:[#allocation2 + $0x90] sm:$0x1] %v305_v10  ;;  %356 = vst [vmem:[#allocation2 + $0x98] sm:$0x1] %v355_v11 }
  0x55   : > { %v562_v17 = vshll.u32 %v248_v45, 16  ;;  %v567_v18 = vshrl.u32 %v249_v62, 16  ;;  %1735 = vrot.lane.b32.xlu0 %v1614_v14, %s7415_s25  ;;  %1817 = vrot.lane.b32.xlu1 %v1778_v38, %s7414_s24  ;;  %v521_v19 = vor.u32 %v519_v7, %v518_v1  ;;  %v523_v20 = vrot.slane %v518_v1, 4  ;;  %751 = vst [vmem:[#allocation2 + $0x6c] sm:$0xf] %v750_v15 }
  0x56   : > { %v561_v21 = vrot.slane %v559_v12, 7  ;;  %v570_v22 = vshll.u32 %v249_v62, 16  ;;  %v302_v25 = vsel %vm7456_vm2, 0, %v301_v9  ;;  %v352_v24 = vsel %vm7466_vm4, 0, %v351_v13  ;;  %v247_v6 = vld [vmem:[%s7490_s23 + $0x54] sm:$0xf] }
  0x57   : > { %v569_v23 = vrot.slane %v567_v18, 7  ;;  %v542_v28 = vshrl.u32 %v246_v8, 16  ;;  %v7136_v30 = vld [vmem:[#allocation2 + $0x78] sm:$0xff]   ;;  %v522_v31 = vsel %vm7503_vm7, %v514_v5, %v521_v19  ;;  %v754_v32 = vsel %vm7456_vm2, %v523_v20, %v753_v16  ;;  %303 = vst [vmem:[#allocation2 + $0x84] sm:$0x1] %v302_v25 }
  0x58   : > { %v564_v34 = vor.u32 %v562_v17, %v561_v21  ;;  %v565_v63 = vrot.slane %v561_v21, 4  ;;  %353 = vst [vmem:[#allocation2 + $0x8c] sm:$0x1] %v352_v24  ;;  %752 = vst.msk [vmem:[#allocation2 + $0x70] sm:$0xf] %vm258_vm5, %v522_v31  ;;  %v545_v36 = vshll.u32 %v246_v8, 16 }
  0x59   : > { %755 = vst [vmem:[#allocation2 + $0x74] sm:$0x1] %v754_v32  ;;  %v572_v26 = vor.u32 %v570_v22, %v569_v23  ;;  %v574_v35 = vrot.slane %v569_v23, 4  ;;  %v544_v29 = vrot.slane %v542_v28, 7  ;;  %1815 = vrot.lane.b32.xlu0 %v1775_v58, %s7414_s24  ;;  %v310_v38 = vld [vmem:[#allocation2 + $0xa8] sm:$0x1] }
  0x5a   : > { %v7137_v37 = vld [vmem:[#allocation2 + $0x80] ss:$0 sps:$4 sm:$0x11]   ;;  %v1640_v39 = vshrl.u32 %v7136_v30, 16  ;;  %v1642_v40 = vshll.u32 %v7136_v30, 16  ;;  %v1782_v41 = vrot.slane %v7136_v30, 1 }
  0x5b   : > { %v573_v42 = vsel %vm7503_vm7, %v565_v63, %v572_v26  ;;  %v360_v43 = vld [vmem:[#allocation2 + $0xb0] sm:$0x1]  ;;  %v1647_v44 = vshll.u32 %v7137_v37, 16  ;;  %v1783_v45 = vrot.slane %v7137_v37, 1  ;;  %v774_v47 = vld [vmem:[#allocation2 + $0x98] sm:$0x1]  ;;  %v547_v48 = vor.u32 %v545_v36, %v544_v29 }
  0x5c   : > { %v770_v46 = vld [vmem:[#allocation2 + $0x90] sm:$0xf]  ;;  %773 = vst.msk [vmem:[#allocation2 + $0x94] sm:$0xf] %vm258_vm5, %v573_v42  ;;  %v1644_v49 = vrot.slane %v1642_v40, 1  ;;  %v775_v51 = vsel %vm7456_vm2, %v574_v35, %v774_v47  ;;  %v550_v54 = vshrl.u32 %v247_v6, 16 }
  0x5d   : > { %v771_v50 = vsel %vm7512_vm8, %v564_v34, %v770_v46  ;;  %v252_v52 = vld [vmem:[%s7490_s23 + $0x68] sm:$0xf]  ;;  %v1649_v53 = vrot.slane %v1647_v44, 1  ;;  %776 = vst [vmem:[#allocation2 + $0x98] sm:$0x1] %v775_v51  ;;  %v553_v55 = vshll.u32 %v247_v6, 16  ;;  %v1784_v2 = vsel %vm1206_vm9, %v1782_v41, %v1783_v45 }
  0x5e   : > { %772 = vst [vmem:[#allocation2 + $0x90] sm:$0xf] %v771_v50  ;;  %v253_v56 = vld [vmem:[%s7490_s23 + $0x6c] sm:$0xf]  ;;  %v1645_v57 = vor.u32 %v1644_v49, %v1640_v39  ;;  %v548_v58 = vrot.slane %v544_v29, 4  ;;  %v311_v60 = vsel %vm7456_vm2, 0, %v310_v38 }
  0x5f   : > { %v763_v59 = vld [vmem:[#allocation2 + $0x84] sm:$0xf]  ;;  %v361_v61 = vsel %vm7466_vm4, 0, %v360_v43  ;;  %v7706_v62 = vld [vmem:[#allocation2 + $0x6c] sm:$0xff]   ;;  %v552_v3 = vrot.slane %v550_v54, 7  ;;  %v593_v9 = vshrl.u32 %v252_v52, 16 }
  0x60   : > { %v764_v5 = vsel %vm7512_vm8, %v547_v48, %v763_v59  ;;  %312 = vst [vmem:[#allocation2 + $0xa8] sm:$0x1] %v311_v60  ;;  %362 = vst [vmem:[#allocation2 + $0xb0] sm:$0x1] %v361_v61  ;;  %v1650_v7 = vsel %vm981_vm10, %v1645_v57, %v1649_v53  ;;  %v596_v1 = vshll.u32 %v252_v52, 16  ;;  %v601_v10 = vshrl.u32 %v253_v56, 16 }
  0x61   : > { %v7139_v8 = vld [vmem:[#allocation2 + $0x74] ss:$0 sps:$4 sm:$0x11]   ;;  %765 = vst [vmem:[#allocation2 + $0x84] sm:$0xf] %v764_v5  ;;  %1741 = vrot.lane.b32.xlu1 %v1650_v7, %s7415_s25  ;;  %v1628_v11 = vshrl.u32 %v7706_v62, 16  ;;  %v555_v14 = vor.u32 %v553_v55, %v552_v3 }
  0x62   : > { %v1630_v12 = vshll.u32 %v7706_v62, 16  ;;  %v1779_v13 = vrot.slane %v7706_v62, 1  ;;  %v767_v15 = vld [vmem:[#allocation2 + $0x8c] sm:$0x1]  ;;  %v307_v16 = vld [vmem:[#allocation2 + $0x9c] sm:$0x1] }
  0x63   : > { %v1635_v17 = vshll.u32 %v7139_v8, 16  ;;  %v1780_v18 = vrot.slane %v7139_v8, 1  ;;  %v557_v19 = vrot.slane %v552_v3, 4  ;;  %v595_v20 = vrot.slane %v593_v9, 7  ;;  %v357_v24 = vld [vmem:[#allocation2 + $0xa4] sm:$0x1] }
  0x64   : > { %v1632_v21 = vrot.slane %v1630_v12, 1  ;;  %v556_v22 = vsel %vm7503_vm7, %v548_v58, %v555_v14  ;;  %v603_v23 = vrot.slane %v601_v10, 7  ;;  %v604_v25 = vshll.u32 %v253_v56, 16  ;;  %v250_v34 = vld [vmem:[%s7490_s23 + $0x60] sm:$0xf] }
  0x65   : > { %v1637_v28 = vrot.slane %v1635_v17, 1  ;;  %v7140_v30 = vld [vmem:[#allocation2 + $0x90] sm:$0xff]   ;;  %766 = vst.msk [vmem:[#allocation2 + $0x88] sm:$0xf] %vm258_vm5, %v556_v22  ;;  %v768_v31 = vsel %vm7456_vm2, %v557_v19, %v767_v15  ;;  %v598_v32 = vor.u32 %v596_v1, %v595_v20  ;;  %1821 = vrot.lane.b32.xlu1 %v1784_v2, %s7414_s24  ;;  %v599_v35 = vrot.slane %v595_v20, 4 }
  0x66   : > { %v1633_v63 = vor.u32 %v1632_v21, %v1628_v11  ;;  %v7141_v26 = vld [vmem:[#allocation2 + $0x98] ss:$0 sps:$4 sm:$0x11]   ;;  %769 = vst [vmem:[#allocation2 + $0x8c] sm:$0x1] %v768_v31  ;;  %v606_v6 = vor.u32 %v604_v25, %v603_v23  ;;  %v608_v29 = vrot.slane %v603_v23, 4  ;;  %v1781_v54 = vsel %vm1206_vm9, %v1779_v13, %v1780_v18 }
  0x67   : > { %v251_v36 = vld [vmem:[%s7490_s23 + $0x64] sm:$0xf]  ;;  %v316_v37 = vld [vmem:[#allocation2 + $0xc0] sm:$0x1]  ;;  %v1664_v38 = vshrl.u32 %v7140_v30, 16  ;;  %v1666_v39 = vshll.u32 %v7140_v30, 16 }
  0x68   : > { %v1788_v40 = vrot.slane %v7140_v30, 1  ;;  %v784_v41 = vld [vmem:[#allocation2 + $0xa8] sm:$0xf]  ;;  %v308_v42 = vsel %vm7456_vm2, 0, %v307_v16  ;;  %v1638_v43 = vsel %vm981_vm10, %v1633_v63, %v1637_v28  ;;  %v1671_v44 = vshll.u32 %v7141_v26, 16 }
  0x69   : > { %v1789_v45 = vrot.slane %v7141_v26, 1  ;;  %v607_v46 = vsel %vm7503_vm7, %v599_v35, %v606_v6  ;;  %v788_v47 = vld [vmem:[#allocation2 + $0xb0] sm:$0x1]  ;;  %309 = vst [vmem:[#allocation2 + $0x9c] sm:$0x1] %v308_v42  ;;  %1739 = vrot.lane.b32.xlu0 %v1638_v43, %s7415_s25  ;;  %v1668_v48 = vrot.slane %v1666_v39, 1  ;;  %v785_v49 = vsel %vm7512_vm8, %v598_v32, %v784_v41 }
  0x6a   : > { %787 = vst.msk [vmem:[#allocation2 + $0xac] sm:$0xf] %vm258_vm5, %v607_v46  ;;  %v789_v50 = vsel %vm7456_vm2, %v608_v29, %v788_v47  ;;  %v358_v51 = vsel %vm7466_vm4, 0, %v357_v24  ;;  %v256_v52 = vld [vmem:[%s7490_s23 + $0x78] sm:$0xf]  ;;  %v1673_v55 = vrot.slane %v1671_v44, 1 }
  0x6b   : > { %v366_v53 = vld [vmem:[#allocation2 + $0xc8] sm:$0x1]  ;;  %786 = vst [vmem:[#allocation2 + $0xa8] sm:$0xf] %v785_v49  ;;  %790 = vst [vmem:[#allocation2 + $0xb0] sm:$0x1] %v789_v50  ;;  %v1669_v58 = vor.u32 %v1668_v48, %v1664_v38  ;;  %v1790_v9 = vsel %vm1206_vm9, %v1788_v40, %v1789_v45 }
  0x6c   : > { %359 = vst [vmem:[#allocation2 + $0xa4] sm:$0x1] %v358_v51  ;;  %v576_v56 = vshrl.u32 %v250_v34, 16  ;;  %v579_v57 = vshll.u32 %v250_v34, 16  ;;  %v584_v59 = vshrl.u32 %v251_v36, 16  ;;  %v587_v60 = vshll.u32 %v251_v36, 16 }
  0x6d   : > { %v317_v61 = vsel %vm7456_vm2, 0, %v316_v37  ;;  %v7142_v62 = vld [vmem:[#allocation2 + $0x84] sm:$0xff]   ;;  %v367_v3 = vsel %vm7466_vm4, 0, %v366_v53  ;;  %v627_v5 = vshrl.u32 %v256_v52, 16  ;;  %1819 = vrot.lane.b32.xlu0 %v1781_v54, %s7414_s24  ;;  %v1674_v7 = vsel %vm981_vm10, %v1669_v58, %v1673_v55  ;;  %v257_v22 = vld [vmem:[%s7490_s23 + $0x7c] sm:$0xf] }
  0x6e   : > { %v578_v2 = vrot.slane %v576_v56, 7  ;;  %318 = vst [vmem:[#allocation2 + $0xc0] sm:$0x1] %v317_v61  ;;  %v7143_v8 = vld [vmem:[#allocation2 + $0x8c] ss:$0 sps:$4 sm:$0x11]   ;;  %1745 = vrot.lane.b32.xlu1 %v1674_v7, %s7415_s25 }
  0x6f   : > { %v586_v1 = vrot.slane %v584_v59, 7  ;;  %368 = vst [vmem:[#allocation2 + $0xc8] sm:$0x1] %v367_v3  ;;  %v1652_v10 = vshrl.u32 %v7142_v62, 16  ;;  %v1654_v11 = vshll.u32 %v7142_v62, 16  ;;  %v1785_v12 = vrot.slane %v7142_v62, 1 }
  0x70   : > { %v581_v13 = vor.u32 %v579_v57, %v578_v2  ;;  %v1659_v14 = vshll.u32 %v7143_v8, 16  ;;  %v1786_v15 = vrot.slane %v7143_v8, 1  ;;  %v582_v16 = vrot.slane %v578_v2, 4  ;;  %v777_v18 = vld [vmem:[#allocation2 + $0x9c] sm:$0xf] }
  0x71   : > { %v589_v17 = vor.u32 %v587_v60, %v586_v1  ;;  %v1656_v19 = vrot.slane %v1654_v11, 1  ;;  %v591_v20 = vrot.slane %v586_v1, 4  ;;  %v629_v23 = vrot.slane %v627_v5, 7  ;;  %v254_v63 = vld [vmem:[%s7490_s23 + $0x70] sm:$0xf] }
  0x72   : > { %v778_v21 = vsel %vm7512_vm8, %v581_v13, %v777_v18  ;;  %v1661_v25 = vrot.slane %v1659_v14, 1  ;;  %v7144_v24 = vld [vmem:[#allocation2 + $0xa8] sm:$0xff]   ;;  %1825 = vrot.lane.b32.xlu1 %v1790_v9, %s7414_s24  ;;  %v7145_v31 = vld [vmem:[#allocation2 + $0xb0] ss:$0 sps:$4 sm:$0x11]   ;;  %v630_v34 = vshll.u32 %v256_v52, 16  ;;  %v1787_v26 = vsel %vm1206_vm9, %v1785_v12, %v1786_v15 }
  0x73   : > { %v590_v28 = vsel %vm7503_vm7, %v582_v16, %v589_v17  ;;  %779 = vst [vmem:[#allocation2 + $0x9c] sm:$0xf] %v778_v21  ;;  %v1657_v30 = vor.u32 %v1656_v19, %v1652_v10  ;;  %v781_v32 = vld [vmem:[#allocation2 + $0xa4] sm:$0x1]  ;;  %v1688_v35 = vshrl.u32 %v7144_v24, 16  ;;  %v1690_v6 = vshll.u32 %v7144_v24, 16 }
  0x74   : > { %780 = vst.msk [vmem:[#allocation2 + $0xa0] sm:$0xf] %vm258_vm5, %v590_v28  ;;  %v782_v29 = vsel %vm7456_vm2, %v591_v20, %v781_v32  ;;  %v255_v37 = vld [vmem:[%s7490_s23 + $0x74] sm:$0xf]  ;;  %v1695_v40 = vshll.u32 %v7145_v31, 16  ;;  %v1794_v41 = vrot.slane %v7144_v24, 1  ;;  %v632_v42 = vor.u32 %v630_v34, %v629_v23 }
  0x75   : > { %v798_v36 = vld [vmem:[#allocation2 + $0xc0] sm:$0xf]  ;;  %v313_v38 = vld [vmem:[#allocation2 + $0xb4] sm:$0x1]  ;;  %v1662_v39 = vsel %vm981_vm10, %v1657_v30, %v1661_v25  ;;  %783 = vst [vmem:[#allocation2 + $0xa4] sm:$0x1] %v782_v29 }
  0x76   : > { %v363_v43 = vld [vmem:[#allocation2 + $0xbc] sm:$0x1]  ;;  %1743 = vrot.lane.b32.xlu0 %v1662_v39, %s7415_s25  ;;  %v1692_v44 = vrot.slane %v1690_v6, 1  ;;  %v1795_v45 = vrot.slane %v7145_v31, 1  ;;  %v635_v46 = vshrl.u32 %v257_v22, 16  ;;  %v638_v47 = vshll.u32 %v257_v22, 16 }
  0x77   : > { %v1697_v48 = vrot.slane %v1695_v40, 1  ;;  %v633_v49 = vrot.slane %v629_v23, 4  ;;  %v799_v50 = vsel %vm7512_vm8, %v632_v42, %v798_v36  ;;  %v802_v51 = vld [vmem:[#allocation2 + $0xc8] sm:$0x1]  ;;  %v314_v52 = vsel %vm7456_vm2, 0, %v313_v38  ;;  %v7781_v21 = vld [vmem:[#allocation2 + $0xc] sm:$0xff]  }
  0x78   : > { %v1693_v53 = vor.u32 %v1692_v44, %v1688_v35  ;;  %v637_v54 = vrot.slane %v635_v46, 7  ;;  %800 = vst [vmem:[#allocation2 + $0xc0] sm:$0xf] %v799_v50  ;;  %315 = vst [vmem:[#allocation2 + $0xb4] sm:$0x1] %v314_v52  ;;  %v364_v55 = vsel %vm7466_vm4, 0, %v363_v43  ;;  %v1796_v8 = vsel %vm1206_vm9, %v1794_v41, %v1795_v45 }
  0x79   : > { %v610_v56 = vshrl.u32 %v254_v63, 16  ;;  %365 = vst [vmem:[#allocation2 + $0xbc] sm:$0x1] %v364_v55  ;;  %v613_v57 = vshll.u32 %v254_v63, 16  ;;  %v618_v58 = vshrl.u32 %v255_v37, 16  ;;  %v621_v59 = vshll.u32 %v255_v37, 16 }
  0x7a   : > { %1823 = vrot.lane.b32.xlu0 %v1787_v26, %s7414_s24  ;;  %v1698_v60 = vsel %vm981_vm10, %v1693_v53, %v1697_v48  ;;  %v640_v62 = vor.u32 %v638_v47, %v637_v54  ;;  %v642_v2 = vrot.slane %v637_v54, 4  ;;  %v7776_v15 = vld [vmem:[#allocation2 + $0x14] ss:$0 sps:$4 sm:$0x11]   ;;  %v997_v34 = vshll.u32 %v7781_v21, 16  ;;  %v7791_v26 = vld [vmem:[#allocation2] sm:$0xff]  }
  0x7b   : > { %v7146_v61 = vld [vmem:[#allocation2 + $0x9c] sm:$0xff]   ;;  %v612_v3 = vrot.slane %v610_v56, 7  ;;  %1749 = vrot.lane.b32.xlu1 %v1698_v60, %s7415_s25  ;;  %v620_v5 = vrot.slane %v618_v58, 7  ;;  %v1002_v63 = vshll.u32 %v7776_v15, 16  ;;  %v7795_v38 = vld [vmem:[#allocation2 + $0x24] sm:$0xff]   ;;  %v995_v40 = vshrl.u32 %v7781_v21, 16 }
  0x7c   : > { %v7147_v7 = vld [vmem:[#allocation2 + $0xa4] ss:$0 sps:$4 sm:$0x11]   ;;  %v641_v9 = vsel %vm7503_vm7, %v633_v49, %v640_v62  ;;  %v803_v1 = vsel %vm7456_vm2, %v642_v2, %v802_v51  ;;  %v1676_v11 = vshrl.u32 %v7146_v61, 16  ;;  %v1678_v12 = vshll.u32 %v7146_v61, 16 }
  0x7d   : > { %v615_v10 = vor.u32 %v613_v57, %v612_v3  ;;  %801 = vst.msk [vmem:[#allocation2 + $0xc4] sm:$0xf] %vm258_vm5, %v641_v9  ;;  %804 = vst [vmem:[#allocation2 + $0xc8] sm:$0x1] %v803_v1  ;;  %v616_v13 = vrot.slane %v612_v3, 4  ;;  %v623_v14 = vor.u32 %v621_v59, %v620_v5  ;;  %v1683_v16 = vshll.u32 %v7147_v7, 16 }
  0x7e   : > { %v625_v17 = vrot.slane %v620_v5, 4  ;;  %v1680_v18 = vrot.slane %v1678_v12, 1  ;;  %v1791_v28 = vrot.slane %v7146_v61, 1  ;;  %v1792_v30 = vrot.slane %v7147_v7, 1  ;;  %v7158_v9 = vld [vmem:[#allocation2 + $0x18] sm:$0xff]  }
  0x7f   : > { %1829 = vrot.lane.b32.xlu1 %v1796_v8, %s7414_s24  ;;  %v624_v19 = vsel %vm7503_vm7, %v616_v13, %v623_v14  ;;  %v791_v20 = vld [vmem:[#allocation2 + $0xb4] sm:$0xf]  ;;  %v1685_v22 = vrot.slane %v1683_v16, 1  ;;  %v999_v41 = vrot.slane %v997_v34, 1  ;;  %v1004_v42 = vrot.slane %v1002_v63, 1  ;;  %v7810_v13 = vld [vmem:[#allocation2 + $0x3c] sm:$0xff]  }
  0x80   : > { %v792_v23 = vsel %vm7512_vm8, %v615_v10, %v791_v20  ;;  %794 = vst.msk [vmem:[#allocation2 + $0xb8] sm:$0xf] %vm258_vm5, %v624_v19  ;;  %v795_v25 = vld [vmem:[#allocation2 + $0xbc] sm:$0x1]  ;;  %v1681_v24 = vor.u32 %v1680_v18, %v1676_v11  ;;  %v1793_v6 = vsel %vm1206_vm9, %v1791_v28, %v1792_v30  ;;  %v985_v47 = vshll.u32 %v7791_v26, 16 }
  0x81   : > { %793 = vst [vmem:[#allocation2 + $0xb4] sm:$0xf] %v792_v23  ;;  %v796_v31 = vsel %vm7456_vm2, %v625_v17, %v795_v25  ;;  %v7155_v43 = vld [vmem:[#allocation2 + $0x8] ss:$0 sps:$4 sm:$0x11]   ;;  %v1000_v58 = vor.u32 %v999_v41, %v995_v40  ;;  %v1021_v59 = vshll.u32 %v7795_v38, 16 }
  0x82   : > { %797 = vst [vmem:[#allocation2 + $0xbc] sm:$0x1] %v796_v31  ;;  %v1686_v32 = vsel %vm981_vm10, %v1681_v24, %v1685_v22  ;;  %v7800_v55 = vld [vmem:[#allocation2 + $0x2c] ss:$0 sps:$4 sm:$0x11]   ;;  %v983_v61 = vshrl.u32 %v7791_v26, 16 }
  0x83   : > { %1747 = vrot.lane.b32.xlu0 %v1686_v32, %s7415_s25  ;;  %v987_v62 = vrot.slane %v985_v47, 1  ;;  %v990_v2 = vshll.u32 %v7155_v43, 16  ;;  %v1019_v10 = vshrl.u32 %v7795_v38, 16  ;;  %v1023_v11 = vrot.slane %v1021_v59, 1  ;;  %v7819_v24 = vld [vmem:[#allocation2 + $0x30] sm:$0xff]  }
  0x84   : > { %v7148_v35 = vld [vmem:[#allocation2 + $0xc0] sm:$0xff]   ;;  %v7149_v29 = vld [vmem:[#allocation2 + $0xc8] ss:$0 sps:$4 sm:$0x11]   ;;  %v1026_v12 = vshll.u32 %v7800_v55, 16  ;;  %v1210_v16 = vrot.slane %v7781_v21, 1  ;;  %v1005_v19 = vsel %vm981_vm10, %v1000_v58, %v1004_v42 }
  0x85   : > { %v1712_v36 = vshrl.u32 %v7148_v35, 16  ;;  %v1714_v37 = vshll.u32 %v7148_v35, 16  ;;  %v1719_v39 = vshll.u32 %v7149_v29, 16  ;;  %v1800_v46 = vrot.slane %v7148_v35, 1 }
  0x86   : > { %v1801_v53 = vrot.slane %v7149_v29, 1  ;;  %v992_v14 = vrot.slane %v990_v2, 1  ;;  %v1211_v17 = vrot.slane %v7776_v15, 1  ;;  %v988_v20 = vor.u32 %v987_v62, %v983_v61  ;;  %v7159_v22 = vld [vmem:[#allocation2 + $0x20] ss:$0 sps:$4 sm:$0x11]  }
  0x87   : > { %1827 = vrot.lane.b32.xlu0 %v1793_v6, %s7414_s24  ;;  %v1716_v44 = vrot.slane %v1714_v37, 1  ;;  %v1721_v48 = vrot.slane %v1719_v39, 1  ;;  %v1009_v23 = vshll.u32 %v7158_v9, 16  ;;  %v1207_v25 = vrot.slane %v7791_v26, 1  ;;  %v7856_v61 = vld [vmem:[#allocation2 + $0x6c] sm:$0xff]  }
  0x88   : > { %v7150_v45 = vld [vmem:[#allocation2 + $0xb4] sm:$0xff]   ;;  %v1802_v5 = vsel %vm1206_vm9, %v1800_v46, %v1801_v53  ;;  %v1208_v28 = vrot.slane %v7155_v43, 1  ;;  %v1024_v30 = vor.u32 %v1023_v11, %v1019_v10  ;;  %v1028_v31 = vrot.slane %v1026_v12, 1  ;;  %v7821_v32 = vld [vmem:[#allocation2 + $0x44] ss:$0 sps:$4 sm:$0x11]  }
  0x89   : > { %v7151_v49 = vld [vmem:[#allocation2 + $0xbc] ss:$0 sps:$4 sm:$0x11]   ;;  %v1717_v50 = vor.u32 %v1716_v44, %v1712_v36  ;;  %v1700_v51 = vshrl.u32 %v7150_v45, 16  ;;  %v1702_v52 = vshll.u32 %v7150_v45, 16  ;;  %v1797_v7 = vrot.slane %v7150_v45, 1 }
  0x8a   : > { %v1707_v54 = vshll.u32 %v7151_v49, 16  ;;  %v1798_v8 = vrot.slane %v7151_v49, 1  ;;  %v1045_v21 = vshll.u32 %v7810_v13, 16  ;;  %v1212_v15 = vsel %vm1206_vm9, %v1210_v16, %v1211_v17  ;;  %v7830_v36 = vld [vmem:[#allocation2 + $0x38] ss:$0 sps:$4 sm:$0x11]  }
  0x8b   : > { %v1722_v56 = vsel %vm981_vm10, %v1717_v50, %v1721_v48  ;;  %v1704_v57 = vrot.slane %v1702_v52, 1  ;;  %v993_v34 = vsel %vm981_vm10, %v988_v20, %v992_v14  ;;  %v1007_v63 = vshrl.u32 %v7158_v9, 16  ;;  %v7839_v46 = vld [vmem:[#allocation2 + $0x54] sm:$0xff]   ;;  %v7852_v58 = vld [vmem:[#allocation2 + $0x50] ss:$0 sps:$4 sm:$0x11]  }
  0x8c   : > { %1753 = vrot.lane.b32.xlu1 %v1722_v56, %s7415_s25  ;;  %v1709_v60 = vrot.slane %v1707_v54, 1  ;;  %v1799_v18 = vsel %vm1206_vm9, %v1797_v7, %v1798_v8  ;;  %v1011_v35 = vrot.slane %v1009_v23, 1  ;;  %v1014_v26 = vshll.u32 %v7159_v22, 16  ;;  %v7845_v54 = vld [vmem:[#allocation2 + $0x48] sm:$0xff]   ;;  %v7866_v12 = vld [vmem:[#allocation2 + $0x60] sm:$0xff]  }
  0x8d   : > { %v1705_v3 = vor.u32 %v1704_v57, %v1700_v51  ;;  %v1209_v6 = vsel %vm1206_vm9, %v1207_v25, %v1208_v28  ;;  %v1029_v29 = vsel %vm981_vm10, %v1024_v30, %v1028_v31  ;;  %v1043_v37 = vshrl.u32 %v7810_v13, 16  ;;  %v7849_v56 = vld [vmem:[#allocation2 + $0x5c] ss:$0 sps:$4 sm:$0x11]  }
  0x8e   : > { %v1047_v39 = vrot.slane %v1045_v21, 1  ;;  %v1050_v40 = vshll.u32 %v7821_v32, 16  ;;  %v1033_v41 = vshll.u32 %v7819_v24, 16  ;;  %v1012_v42 = vor.u32 %v1011_v35, %v1007_v63  ;;  %v7885_v35 = vld [vmem:[#allocation2 + $0x68] ss:$0 sps:$4 sm:$0x11]  }
  0x8f   : > { %v1710_v1 = vsel %vm981_vm10, %v1705_v3, %v1709_v60  ;;  %v1016_v43 = vrot.slane %v1014_v26, 1  ;;  %v1216_v44 = vrot.slane %v7795_v38, 1  ;;  %v1217_v45 = vrot.slane %v7800_v55, 1 }
  0x90   : > { %1751 = vrot.lane.b32.xlu0 %v1710_v1, %s7415_s25  ;;  %1833 = vrot.lane.b32.xlu1 %v1802_v5, %s7414_s24  ;;  %v1213_v47 = vrot.slane %v7158_v9, 1  ;;  %v1214_v48 = vrot.slane %v7159_v22, 1  ;;  %v1031_v49 = vshrl.u32 %v7819_v24, 16  ;;  %v1048_v50 = vor.u32 %v1047_v39, %v1043_v37  ;;  %v7876_v22 = vld [vmem:[#allocation2 + $0x74] ss:$0 sps:$4 sm:$0x11]  }
  0x91   : > { %v1052_v51 = vrot.slane %v1050_v40, 1  ;;  %v1035_v52 = vrot.slane %v1033_v41, 1  ;;  %v1038_v53 = vshll.u32 %v7830_v36, 16  ;;  %v1017_v38 = vsel %vm981_vm10, %v1012_v42, %v1016_v43  ;;  %v7894_v43 = vld [vmem:[#allocation2 + $0x8c] ss:$0 sps:$4 sm:$0x11]  }
  0x92   : > { %v1218_v55 = vsel %vm1206_vm9, %v1216_v44, %v1217_v45  ;;  %v1069_v57 = vshll.u32 %v7839_v46, 16  ;;  %v1215_v59 = vsel %vm1206_vm9, %v1213_v47, %v1214_v48  ;;  %v1222_v60 = vrot.slane %v7810_v13, 1  ;;  %v7180_v44 = vld [vmem:[%s9514_s1 + $0x8] sm:$0x3f]  }
  0x93   : > { %v1053_v62 = vsel %vm981_vm10, %v1048_v50, %v1052_v51  ;;  %v1040_v2 = vrot.slane %v1038_v53, 1  ;;  %v1223_v3 = vrot.slane %v7821_v32, 1  ;;  %v1067_v5 = vshrl.u32 %v7839_v46, 16  ;;  %v7319_v53 = vld [vmem:[#allocation2 + $0x18] sm:$0xff]  }
  0x94   : > { %1831 = vrot.lane.b32.xlu0 %v1799_v18, %s7414_s24  ;;  %1176 = vrot.lane.b32.xlu1 %v1005_v19, %s7415_s25  ;;  %v1036_v7 = vor.u32 %v1035_v52, %v1031_v49  ;;  %v1071_v8 = vrot.slane %v1069_v57, 1  ;;  %v1074_v9 = vshll.u32 %v7849_v56, 16  ;;  %v1057_v1 = vshll.u32 %v7845_v54, 16  ;;  %v7907_v52 = vld [vmem:[#allocation2 + $0x78] sm:$0xff]   ;;  %v7183_v57 = vld [vmem:[%s9514_s1] sm:$0x3f]  }
  0x95   : > { %v1219_v11 = vrot.slane %v7819_v24, 1  ;;  %v1220_v14 = vrot.slane %v7830_v36, 1  ;;  %v1055_v16 = vshrl.u32 %v7845_v54, 16  ;;  %v1062_v17 = vshll.u32 %v7852_v58, 16  ;;  %v7318_v36 = vld [vmem:[#allocation2 + $0xc] sm:$0xff]  }
  0x96   : > { %v1093_v18 = vshll.u32 %v7856_v61, 16  ;;  %v1224_v19 = vsel %vm1206_vm9, %v1222_v60, %v1223_v3  ;;  %v1228_v20 = vrot.slane %v7839_v46, 1  ;;  %v1041_v23 = vsel %vm981_vm10, %v1036_v7, %v1040_v2 }
  0x97   : > { %v1072_v25 = vor.u32 %v1071_v8, %v1067_v5  ;;  %v1076_v24 = vrot.slane %v1074_v9, 1  ;;  %v1059_v28 = vrot.slane %v1057_v1, 1  ;;  %v1229_v30 = vrot.slane %v7849_v56, 1  ;;  %v7926_v1 = vld [vmem:[#allocation2 + $0x80] ss:$0 sps:$4 sm:$0x11]  }
  0x98   : > { %1174 = vrot.lane.b32.xlu0 %v993_v34, %s7415_s25  ;;  %1257 = vrot.lane.b32.xlu1 %v1212_v15, %s7414_s24  ;;  %v1225_v31 = vrot.slane %v7845_v54, 1  ;;  %v1226_v32 = vrot.slane %v7852_v58, 1  ;;  %v1091_v21 = vshrl.u32 %v7856_v61, 16  ;;  %v7883_v15 = vld [vmem:[#allocation2 + $0x84] sm:$0xff]   ;;  %v1064_v34 = vrot.slane %v1062_v17, 1 }
  0x99   : > { %v1804_v10 = vpop.permute.xlu1 %1803  ;;  %v1095_v63 = vrot.slane %v1093_v18, 1  ;;  %v1221_v40 = vsel %vm1206_vm9, %v1219_v11, %v1220_v14  ;;  %v1077_v41 = vsel %vm981_vm10, %v1072_v25, %v1076_v24  ;;  %v1060_v42 = vor.u32 %v1059_v28, %v1055_v16  ;;  %v7320_v18 = vld [vmem:[#allocation2 + $0x24] sm:$0xff]  }
  0x9a   : > { %vm1940_vm12 = vcmask 1045504   ;;  %v1079_v45 = vshrl.u32 %v7866_v12, 16  ;;  %vm1320_vm13 = vcmask 64512   ;;  %v1086_v46 = vshll.u32 %v7885_v35, 16 }
  0x9b   : > { %7103 = vmatprep.subr.msk.bf16.mxu0 %vm1940_vm12, %v7180_v44  ;;  %v1942_v47 = vsel %vm1940_vm12, %v7180_v44, 0  ;;  %vm1907_vm14 = vcmask 97280   ;;  %v1117_v51 = vshll.u32 %v7883_v15, 16  ;;  %v1096_v56 = vor.u32 %v1095_v63, %v1091_v21  ;;  %v7937_v25 = vld [vmem:[#allocation2 + $0xa4] ss:$0 sps:$4 sm:$0x11]  }
  0x9c   : > { %1255 = vrot.lane.b32.xlu0 %v1209_v6, %s7414_s24  ;;  %1180 = vrot.lane.b32.xlu1 %v1029_v29, %s7415_s25  ;;  %v1098_v6 = vshll.u32 %v7876_v22, 16  ;;  %v1081_v29 = vshll.u32 %v7866_v12, 16  ;;  %v1088_v2 = vrot.slane %v1086_v46, 1  ;;  %v1234_v3 = vrot.slane %v7856_v61, 1  ;;  %v7946_v63 = vld [vmem:[#allocation2 + $0x90] sm:$0xff]  }
  0x9d   : > { %v1724_v13 = vpop.permute.xlu0 %1723  ;;  %v1806_v26 = vpop.permute.xlu1 %1805  ;;  %6772 = vmatpush3.bf16.msra.mxu0 %v1942_v47  ;;  %v1235_v5 = vrot.slane %v7876_v22, 1  ;;  %v1122_v7 = vshll.u32 %v7894_v43, 16  ;;  %v1227_v8 = vsel %vm1206_vm9, %v1225_v31, %v1226_v32  ;;  %v1115_v61 = vshrl.u32 %v7883_v15, 16 }
  0x9e   : > { %v1836_v37 = vsel %vm1287_vm11, %v7318_v36, %v1724_v13  ;;  %v1100_v49 = vrot.slane %v1098_v6, 1  ;;  %v1083_v50 = vrot.slane %v1081_v29, 1  ;;  %7104 = vmatprep.subr.msk.bf16.mxu0 %vm1940_vm12, %v7183_v57  ;;  %v1119_v13 = vrot.slane %v1117_v51, 1  ;;  %v7969_v51 = vld [vmem:[#allocation2 + $0xa8] sm:$0xff]  }
  0x9f   : > { %v1868_v48 = vsel %vm1320_vm13, %v1836_v37, %v1804_v10  ;;  %v2143_v10 = vsel %vm1940_vm12, %v7183_v57, 0  ;;  %v1105_v14 = vshll.u32 %v7907_v52, 16  ;;  %v1231_v16 = vrot.slane %v7866_v12, 1  ;;  %v7953_v37 = vld [vmem:[#allocation2 + $0xb4] sm:$0xff]  }
  0xa0   : > { %1178 = vrot.lane.b32.xlu0 %v1017_v38, %s7415_s25  ;;  %1261 = vrot.lane.b32.xlu1 %v1218_v55, %s7414_s24  ;;  %v1065_v38 = vsel %vm981_vm10, %v1060_v42, %v1064_v34  ;;  %v1230_v55 = vsel %vm1206_vm9, %v1228_v20, %v1229_v30  ;;  %v1084_v9 = vor.u32 %v1083_v50, %v1079_v45  ;;  %v1232_v17 = vrot.slane %v7885_v35, 1  ;;  %v7321_v35 = vld [vmem:[#allocation2 + $0x30] sm:$0xff]  }
  0xa1   : > { %v1726_v39 = vpop.permute.xlu0 %1725  ;;  %6773 = vmatprep.mubr.msk.bf16.mxu0 %vm1907_vm14, %v1868_v48  ;;  %v1101_v11 = vsel %vm981_vm10, %v1096_v56, %v1100_v49  ;;  %v1124_v22 = vrot.slane %v1122_v7, 1  ;;  %v1236_v31 = vsel %vm1206_vm9, %v1234_v3, %v1235_v5  ;;  %v1120_v32 = vor.u32 %v1119_v13, %v1115_v61  ;;  %v7966_v49 = vld [vmem:[#allocation2 + $0xbc] ss:$0 sps:$4 sm:$0x11]  }
  0xa2   : > { %v1838_v54 = vsel %vm1287_vm11, %v7319_v53, %v1726_v39  ;;  %v1089_v12 = vsel %vm981_vm10, %v1084_v9, %v1088_v2  ;;  %v1107_v21 = vrot.slane %v1105_v14, 1  ;;  %v1110_v34 = vshll.u32 %v7926_v1, 16  ;;  %v7979_v2 = vld [vmem:[#allocation2 + $0x24] sm:$0xff]  }
  0xa3   : > { %v1730_v58 = vpop.permute.xlu1 %1729  ;;  %v1870_v60 = vsel %vm1320_vm13, %v1838_v54, %v1806_v26  ;;  %v1240_v6 = vrot.slane %v7883_v15, 1  ;;  %v1241_v29 = vrot.slane %v7894_v43, 1  ;;  %v1233_v39 = vsel %vm1206_vm9, %v1231_v16, %v1232_v17  ;;  %v7961_v43 = vld [vmem:[#allocation2 + $0x98] ss:$0 sps:$4 sm:$0x11]   ;;  %v7322_v14 = vld [vmem:[#allocation2 + $0x48] sm:$0xff]  }
  0xa4   : > { %1259 = vrot.lane.b32.xlu0 %v1215_v59, %s7414_s24  ;;  %1184 = vrot.lane.b32.xlu1 %v1053_v62, %s7415_s25  ;;  %v7916_v59 = vld [vmem:[#allocation2 + $0x9c] sm:$0xff]   ;;  %v1842_v26 = vsel %vm1287_vm11, %v7321_v35, %v1730_v58  ;;  %v1125_v44 = vsel %vm981_vm10, %v1120_v32, %v1124_v22  ;;  %v1112_v45 = vrot.slane %v1110_v34, 1  ;;  %v1129_v46 = vshll.u32 %v7946_v63, 16  ;;  %v8003_v32 = vld [vmem:[#allocation2 + $0x2c] ss:$0 sps:$4 sm:$0x11]  }
  0xa5   : > { %6774 = vmatmul.mubr.msk.bf16.vlgmr.msra.gmra.mrb[0].mxu0 %vm1907_vm14, %v1870_v60  ;;  %v1141_v24 = vshll.u32 %v7916_v59, 16  ;;  %v1139_v36 = vshrl.u32 %v7916_v59, 16  ;;  %v1237_v48 = vrot.slane %v7907_v52, 1  ;;  %v1165_v50 = vshll.u32 %v7953_v37, 16  ;;  %v7323_v17 = vld [vmem:[#allocation2 + $0x3c] sm:$0xff]  }
  0xa6   : > { %6806 = vmatpush3.bf16.msra.mxu0 %v2143_v10  ;;  %v1242_v53 = vsel %vm1206_vm9, %v1240_v6, %v1241_v29  ;;  %v1238_v54 = vrot.slane %v7926_v1, 1  ;;  %v1131_v57 = vrot.slane %v1129_v46, 1  ;;  %v1134_v58 = vshll.u32 %v7961_v43, 16 }
  0xa7   : > { %v1810_v28 = vpop.permute.xlu1 %1809  ;;  %v1247_v3 = vrot.slane %v7937_v25, 1  ;;  %v1163_v5 = vshrl.u32 %v7953_v37, 16  ;;  %v1167_v7 = vrot.slane %v1165_v50, 1  ;;  %v1252_v29 = vrot.slane %v7953_v37, 1  ;;  %v8024_v50 = vld [vmem:[#allocation2 + $0x30] sm:$0xff]  }
  0xa8   : > { %1182 = vrot.lane.b32.xlu0 %v1041_v23, %s7415_s25  ;;  %1265 = vrot.lane.b32.xlu1 %v1224_v19, %s7414_s24  ;;  %v1103_v23 = vshrl.u32 %v7907_v52, 16  ;;  %v1874_v42 = vsel %vm1320_vm13, %v1842_v26, %v1810_v28  ;;  %v1127_v52 = vshrl.u32 %v7946_v63, 16  ;;  %v1239_v1 = vsel %vm1206_vm9, %v1237_v48, %v1238_v54 }
  0xa9   : > { %v1136_v13 = vrot.slane %v1134_v58, 1  ;;  %v1151_v28 = vshrl.u32 %v7969_v51, 16  ;;  %v2503_v48 = vshll.u32 %v8003_v32, 16 }
  0xaa   : > { %v1108_v15 = vor.u32 %v1107_v21, %v1103_v23  ;;  %v1132_v61 = vor.u32 %v1131_v57, %v1127_v52  ;;  %v1244_v23 = vrot.slane %v7961_v43, 1  ;;  %v2498_v21 = vshll.u32 %v7979_v2, 16 }
  0xab   : > { %v1728_v62 = vpop.permute.xlu0 %1727 }
  0xac   : > { %1263 = vrot.lane.b32.xlu0 %v1221_v40, %s7414_s24  ;;  %1188 = vrot.lane.b32.xlu1 %v1077_v41, %s7415_s25  ;;  %v1840_v19 = vsel %vm1287_vm11, %v7320_v18, %v1728_v62  ;;  %v1143_v40 = vrot.slane %v1141_v24, 1  ;;  %v1146_v41 = vshll.u32 %v7937_v25, 16  ;;  %v1113_v56 = vsel %vm981_vm10, %v1108_v15, %v1112_v45  ;;  %v8020_v15 = vld [vmem:[#allocation2 + $0x3c] sm:$0xff]  }
  0xad   : > { %v1246_v62 = vrot.slane %v7916_v59, 1  ;;  %v1153_v59 = vshll.u32 %v7969_v51, 16  ;;  %v1168_v25 = vor.u32 %v1167_v7, %v1163_v5  ;;  %v1137_v35 = vsel %vm981_vm10, %v1132_v61, %v1136_v13 }
  0xae   : > { %v2710_v61 = vrot.slane %v7979_v2, 1  ;;  %v2711_v13 = vrot.slane %v8003_v32, 1 }
  0xaf   : > { %v1808_v20 = vpop.permute.xlu0 %1807  ;;  %v1248_v26 = vsel %vm1206_vm9, %v1246_v62, %v1247_v3  ;;  %v2522_v62 = vshll.u32 %v8020_v15, 16  ;;  %v7325_v3 = vld [vmem:[#allocation2 + $0x54] sm:$0xff]  }
  0xb0   : > { %1186 = vrot.lane.b32.xlu0 %v1065_v38, %s7415_s25  ;;  %1269 = vrot.lane.b32.xlu1 %v1230_v55, %s7414_s24  ;;  %v1872_v30 = vsel %vm1320_vm13, %v1840_v19, %v1808_v20  ;;  %v1144_v38 = vor.u32 %v1143_v40, %v1139_v36  ;;  %v1148_v55 = vrot.slane %v1146_v41, 1  ;;  %v1243_v20 = vrot.slane %v7946_v63, 1 }
  0xb1   : > { %6777 = vmatprep.mubr.msk.bf16.mxu0 %vm1907_vm14, %v1872_v30  ;;  %v7997_v30 = vld [vmem:[#allocation2 + $0x18] sm:$0xff]   ;;  %v1253_v36 = vrot.slane %v7966_v49, 1 }
  0xb2   : > { %6778 = vmatmul.mubr.msk.bf16.gmra.mrb[4].mxu0 %vm1907_vm14, %v1874_v42  ;;  %v1149_v10 = vsel %vm981_vm10, %v1144_v38, %v1148_v55  ;;  %v1245_v40 = vsel %vm1206_vm9, %v1243_v20, %v1244_v23  ;;  %v2496_v42 = vshrl.u32 %v7979_v2, 16  ;;  %v7324_v55 = vld [vmem:[#allocation2 + $0x60] sm:$0xff]   ;;  %v2484_v57 = vshrl.u32 %v7997_v30, 16 }
  0xb4   : > { %1267 = vrot.lane.b32.xlu0 %v1227_v8, %s7414_s24  ;;  %1192 = vrot.lane.b32.xlu1 %v1101_v11, %s7415_s25  ;;  %v1170_v8 = vshll.u32 %v7966_v49, 16  ;;  %v7988_v11 = vld [vmem:[#allocation2 + $0xb0] ss:$0 sps:$4 sm:$0x11]   ;;  %v1249_v49 = vrot.slane %v7969_v51, 1 }
  0xb5   : > { %v1734_v47 = vpop.permute.xlu1 %1733  ;;  %v1250_v54 = vrot.slane %v7988_v11, 1 }
  0xb6   : > { %v1846_v16 = vsel %vm1287_vm11, %v7322_v14, %v1734_v47  ;;  %v1172_v24 = vrot.slane %v1170_v8, 1  ;;  %v2500_v47 = vrot.slane %v2498_v21, 1  ;;  %v2520_v14 = vshrl.u32 %v8020_v15, 16 }
  0xb7   : > { %v1251_v20 = vsel %vm1206_vm9, %v1249_v49, %v1250_v54  ;;  %v8076_v54 = vld [vmem:[#allocation2 + $0x6c] sm:$0xff]  }
  0xb8   : > { %1190 = vrot.lane.b32.xlu0 %v1089_v12, %s7415_s25  ;;  %1273 = vrot.lane.b32.xlu1 %v1236_v31, %s7414_s24  ;;  %v1155_v12 = vrot.slane %v1153_v59, 1  ;;  %v1158_v31 = vshll.u32 %v7988_v11, 16  ;;  %v1173_v41 = vsel %vm981_vm10, %v1168_v25, %v1172_v24  ;;  %v7193_v25 = vld [vmem:[#allocation2 + $0x38] ss:$0 sps:$4 sm:$0x11]  }
  0xb9   : > { %v1814_v9 = vpop.permute.xlu1 %1813  ;;  %v8053_v24 = vld [vmem:[#allocation2 + $0x5c] ss:$0 sps:$4 sm:$0x11]  }
  0xba   : > { %v1878_v34 = vsel %vm1320_vm13, %v1846_v16, %v1814_v9  ;;  %v1156_v43 = vor.u32 %v1155_v12, %v1151_v28  ;;  %v1160_v46 = vrot.slane %v1158_v31, 1  ;;  %v2501_v9 = vor.u32 %v2500_v47, %v2496_v42  ;;  %v8044_v16 = vld [vmem:[#allocation2 + $0x54] sm:$0xff]   ;;  %v8057_v31 = vld [vmem:[#allocation2 + $0x48] sm:$0xff]  }
  0xbb   : > { %v1732_v60 = vpop.permute.xlu0 %1731  ;;  %v2712_v28 = vsel %vm1206_vm9, %v2710_v61, %v2711_v13  ;;  %v2707_v12 = vrot.slane %v7997_v30, 1  ;;  %v2534_v42 = vshll.u32 %v8057_v31, 16 }
  0xbc   : > { %1271 = vrot.lane.b32.xlu0 %v1233_v39, %s7414_s24  ;;  %1196 = vrot.lane.b32.xlu1 %v1125_v44, %s7415_s25  ;;  %v1844_v18 = vsel %vm1287_vm11, %v7323_v17, %v1732_v60  ;;  %v8012_v39 = vld [vmem:[#allocation2 + $0x20] ss:$0 sps:$4 sm:$0x11]   ;;  %v2486_v44 = vshll.u32 %v7997_v30, 16  ;;  %v1161_v8 = vsel %vm981_vm10, %v1156_v43, %v1160_v46 }
  0xbd   : > { %v2491_v38 = vshll.u32 %v8012_v39, 16  ;;  %v8033_v60 = vld [vmem:[#allocation2 + $0x44] ss:$0 sps:$4 sm:$0x11]   ;;  %v2708_v21 = vrot.slane %v8012_v39, 1 }
  0xbe   : > { %v2488_v58 = vrot.slane %v2486_v44, 1  ;;  %v2527_v23 = vshll.u32 %v8033_v60, 16  ;;  %v2716_v44 = vrot.slane %v8020_v15, 1 }
  0xbf   : > { %v1812_v19 = vpop.permute.xlu0 %1811  ;;  %v2493_v59 = vrot.slane %v2491_v38, 1  ;;  %v2709_v39 = vsel %vm1206_vm9, %v2707_v12, %v2708_v21  ;;  %v2713_v38 = vrot.slane %v8024_v50, 1  ;;  %v2568_v21 = vshrl.u32 %v8076_v54, 16 }
  0xc0   : > { %1194 = vrot.lane.b32.xlu0 %v1113_v56, %s7415_s25  ;;  %1277 = vrot.lane.b32.xlu1 %v1242_v53, %s7414_s24  ;;  %v1876_v22 = vsel %vm1320_vm13, %v1844_v18, %v1812_v19  ;;  %v1254_v53 = vsel %vm1206_vm9, %v1252_v29, %v1253_v36  ;;  %v2489_v17 = vor.u32 %v2488_v58, %v2484_v57  ;;  %v2524_v18 = vrot.slane %v2522_v62, 1 }
  0xc1   : > { %6781 = vmatprep.mubr.msk.bf16.mxu0 %vm1907_vm14, %v1876_v22  ;;  %v2510_v19 = vshll.u32 %v8024_v50, 16  ;;  %v2515_v36 = vshll.u32 %v7193_v25, 16  ;;  %v2536_v58 = vrot.slane %v2534_v42, 1 }
  0xc2   : > { %6782 = vmatmul.mubr.msk.bf16.gmra.mrb[8].mxu0 %vm1907_vm14, %v1878_v34  ;;  %v2494_v32 = vsel %vm981_vm10, %v2489_v17, %v2493_v59  ;;  %v2508_v34 = vshrl.u32 %v8024_v50, 16  ;;  %v7326_v59 = vld [vmem:[#allocation2 + $0x78] sm:$0xff]  }
  0xc3   : > { %v1738_v6 = vpop.permute.xlu1 %1737  ;;  %v2512_v29 = vrot.slane %v2510_v19, 1  ;;  %v2517_v49 = vrot.slane %v2515_v36, 1 }
  0xc4   : > { %1275 = vrot.lane.b32.xlu0 %v1239_v1, %s7414_s24  ;;  %1200 = vrot.lane.b32.xlu1 %v1149_v10, %s7415_s25  ;;  %v1850_v56 = vsel %vm1287_vm11, %v7324_v55, %v1738_v6  ;;  %v2505_v1 = vrot.slane %v2503_v48, 1  ;;  %v2529_v6 = vrot.slane %v2527_v23, 1  ;;  %v2714_v55 = vrot.slane %v7193_v25, 1 }
  0xc5   : > { %v2513_v48 = vor.u32 %v2512_v29, %v2508_v34  ;;  %v8114_v29 = vld [vmem:[#allocation2 + $0x84] sm:$0xff]  }
  0xc6   : > { %v2506_v22 = vsel %vm981_vm10, %v2501_v9, %v2505_v1 }
  0xc7   : > { %v1736_v45 = vpop.permute.xlu0 %1735  ;;  %v1818_v52 = vpop.permute.xlu1 %1817  ;;  %v2518_v9 = vsel %vm981_vm10, %v2513_v48, %v2517_v49  ;;  %v2728_v49 = vrot.slane %v8076_v54, 1 }
  0xc8   : > { %1198 = vrot.lane.b32.xlu0 %v1137_v35, %s7415_s25  ;;  %1281 = vrot.lane.b32.xlu1 %v1248_v26, %s7414_s24  ;;  %v1848_v5 = vsel %vm1287_vm11, %v7325_v3, %v1736_v45  ;;  %v1882_v11 = vsel %vm1320_vm13, %v1850_v56, %v1818_v52  ;;  %v2546_v35 = vshll.u32 %v8044_v16, 16  ;;  %v2525_v26 = vor.u32 %v2524_v18, %v2520_v14  ;;  %v8080_v52 = vld [vmem:[#allocation2 + $0x60] sm:$0xff]   ;;  %v8094_v14 = vld [vmem:[#allocation2 + $0x68] ss:$0 sps:$4 sm:$0x11]  }
  0xc9   : > { %v2544_v45 = vshrl.u32 %v8044_v16, 16  ;;  %v2532_v56 = vshrl.u32 %v8057_v31, 16  ;;  %v2558_v17 = vshll.u32 %v8080_v52, 16  ;;  %v2715_v18 = vsel %vm1206_vm9, %v2713_v38, %v2714_v55 }
  0xca   : > { %v2548_v43 = vrot.slane %v2546_v35, 1  ;;  %v2530_v47 = vsel %vm981_vm10, %v2525_v26, %v2529_v6  ;;  %v2556_v6 = vshrl.u32 %v8080_v52, 16 }
  0xcb   : > { %v1816_v7 = vpop.permute.xlu0 %1815  ;;  %v2537_v12 = vor.u32 %v2536_v58, %v2532_v56  ;;  %v2560_v36 = vrot.slane %v2558_v17, 1  ;;  %v8135_v58 = vld [vmem:[#allocation2 + $0x9c] sm:$0xff]  }
  0xcc   : > { %1279 = vrot.lane.b32.xlu0 %v1245_v40, %s7414_s24  ;;  %1204 = vrot.lane.b32.xlu1 %v1173_v41, %s7415_s25  ;;  %v1880_v10 = vsel %vm1320_vm13, %v1848_v5, %v1816_v7  ;;  %v2551_v40 = vshll.u32 %v8053_v24, 16  ;;  %v8066_v41 = vld [vmem:[#allocation2 + $0x50] ss:$0 sps:$4 sm:$0x11]   ;;  %v2722_v5 = vrot.slane %v8044_v16, 1  ;;  %v2723_v7 = vrot.slane %v8053_v24, 1 }
  0xcd   : > { %6785 = vmatprep.mubr.msk.bf16.mxu0 %vm1907_vm14, %v1880_v10  ;;  %v2539_v62 = vshll.u32 %v8066_v41, 16  ;;  %v8090_v10 = vld [vmem:[#allocation2 + $0x74] ss:$0 sps:$4 sm:$0x11]   ;;  %v2720_v23 = vrot.slane %v8066_v41, 1  ;;  %v2561_v55 = vor.u32 %v2560_v36, %v2556_v6  ;;  %v2616_v6 = vshrl.u32 %v8135_v58, 16 }
  0xce   : > { %6786 = vmatmul.mubr.msk.bf16.gmra.mrb[12].mxu0 %vm1907_vm14, %v1882_v11  ;;  %v2553_v57 = vrot.slane %v2551_v40, 1  ;;  %v2570_v11 = vshll.u32 %v8076_v54, 16  ;;  %v8103_v24 = vld [vmem:[%s9514_s1 + $0x10] sm:$0x3f]   ;;  %v2575_v26 = vshll.u32 %v8090_v10, 16  ;;  %v2563_v40 = vshll.u32 %v8094_v14, 16 }
  0xcf   : > { %v2541_v19 = vrot.slane %v2539_v62, 1  ;;  %7105 = vmatprep.subr.msk.bf16.mxu0 %vm1940_vm12, %v8103_v24  ;;  %v8120_v41 = vld [vmem:[#allocation2 + $0x8c] ss:$0 sps:$4 sm:$0x11]   ;;  %v2724_v42 = vsel %vm1206_vm9, %v2722_v5, %v2723_v7 }
  0xd0   : > { %1202 = vrot.lane.b32.xlu0 %v1161_v8, %s7415_s25  ;;  %1285 = vrot.lane.b32.xlu1 %v1254_v53, %s7414_s24  ;;  %v2717_v53 = vrot.slane %v8033_v60, 1  ;;  %v2549_v60 = vor.u32 %v2548_v43, %v2544_v45  ;;  %v2719_v8 = vrot.slane %v8057_v31, 1  ;;  %v2572_v35 = vrot.slane %v2570_v11, 1  ;;  %v7329_v11 = vld [vmem:[#allocation2 + $0x84] sm:$0xff]  }
  0xd1   : > { %v2577_v43 = vrot.slane %v2575_v26, 1  ;;  %v2565_v56 = vrot.slane %v2563_v40, 1  ;;  %v8160_v26 = vld [vmem:[#allocation2 + $0x98] ss:$0 sps:$4 sm:$0x11]  }
  0xd2   : > { %v2718_v1 = vsel %vm1206_vm9, %v2716_v44, %v2717_v53  ;;  %v2542_v44 = vsel %vm981_vm10, %v2537_v12, %v2541_v19  ;;  %v2573_v45 = vor.u32 %v2572_v35, %v2568_v21  ;;  %v2729_v53 = vrot.slane %v8090_v10, 1 }
  0xd3   : > { %v1742_v46 = vpop.permute.xlu1 %1741  ;;  %v2721_v38 = vsel %vm1206_vm9, %v2719_v8, %v2720_v23  ;;  %v2725_v8 = vrot.slane %v8080_v52, 1  ;;  %v2566_v19 = vsel %vm981_vm10, %v2561_v55, %v2565_v56  ;;  %v8150_v23 = vld [vmem:[#allocation2 + $0xa4] ss:$0 sps:$4 sm:$0x11]   ;;  %v2734_v35 = vrot.slane %v8114_v29, 1 }
  0xd4   : > { %1283 = vrot.lane.b32.xlu0 %v1251_v20, %s7414_s24  ;;  %2677 = vrot.lane.b32.xlu1 %v2506_v22, %s7415_s25  ;;  %v1854_v61 = vsel %vm1287_vm11, %v7326_v59, %v1742_v46  ;;  %v7327_v20 = vld [vmem:[#allocation2 + $0x6c] sm:$0xff]   ;;  %v2594_v46 = vshll.u32 %v8114_v29, 16  ;;  %v2578_v62 = vsel %vm981_vm10, %v2573_v45, %v2577_v43  ;;  %v2623_v40 = vshll.u32 %v8150_v23, 16 }
  0xd5   : > { %v2735_v43 = vrot.slane %v8120_v41, 1 }
  0xd6   : > { %v2596_v5 = vrot.slane %v2594_v46, 1  ;;  %v8169_v46 = vld [vmem:[#allocation2 + $0xb4] sm:$0xff]   ;;  %v2625_v56 = vrot.slane %v2623_v40, 1 }
  0xd7   : > { %v1822_v13 = vpop.permute.xlu1 %1821 }
  0xd8   : > { %2675 = vrot.lane.b32.xlu0 %v2494_v32, %s7415_s25  ;;  %2757 = vrot.lane.b32.xlu1 %v2712_v28, %s7414_s24  ;;  %v2554_v28 = vsel %vm981_vm10, %v2549_v60, %v2553_v57  ;;  %v1886_v34 = vsel %vm1320_vm13, %v1854_v61, %v1822_v13  ;;  %v2599_v57 = vshll.u32 %v8120_v41, 16  ;;  %v7205_v60 = vld [vmem:[#allocation2 + $0x80] ss:$0 sps:$4 sm:$0x11]   ;;  %v2730_v61 = vsel %vm1206_vm9, %v2728_v49, %v2729_v53 }
  0xd9   : > { %v2726_v13 = vrot.slane %v8094_v14, 1  ;;  %v2587_v21 = vshll.u32 %v7205_v60, 16  ;;  %v2732_v53 = vrot.slane %v7205_v60, 1  ;;  %v2642_v60 = vshll.u32 %v8169_v46, 16 }
  0xdb   : > { %v1740_v3 = vpop.permute.xlu0 %1739  ;;  %v2589_v45 = vrot.slane %v2587_v21, 1 }
  0xdc   : > { %2755 = vrot.lane.b32.xlu0 %v2709_v39, %s7414_s24  ;;  %2681 = vrot.lane.b32.xlu1 %v2530_v47, %s7415_s25  ;;  %v1852_v22 = vsel %vm1287_vm11, %v7327_v20, %v1740_v3  ;;  %v8127_v47 = vld [vmem:[#allocation2 + $0x78] sm:$0xff]   ;;  %v2592_v3 = vshrl.u32 %v8114_v29, 16 }
  0xdd   : > { %v2582_v7 = vshll.u32 %v8127_v47, 16  ;;  %v2731_v49 = vrot.slane %v8127_v47, 1 }
  0xde   : > { %v2597_v12 = vor.u32 %v2596_v5, %v2592_v3  ;;  %v8176_v3 = vld [vmem:[#allocation2 + $0xa8] sm:$0xff]  }
  0xdf   : > { %v1820_v25 = vpop.permute.xlu0 %1819  ;;  %v2628_v40 = vshrl.u32 %v8176_v3, 16 }
  0xe0   : > { %2679 = vrot.lane.b32.xlu0 %v2518_v9, %s7415_s25  ;;  %2761 = vrot.lane.b32.xlu1 %v2718_v1, %s7414_s24  ;;  %v1884_v32 = vsel %vm1320_vm13, %v1852_v22, %v1820_v25  ;;  %v1746_v39 = vpop.permute.xlu1 %1745  ;;  %v7328_v9 = vld [vmem:[#allocation2 + $0x90] sm:$0xff]   ;;  %v2601_v22 = vrot.slane %v2599_v57, 1  ;;  %v2618_v25 = vshll.u32 %v8135_v58, 16 }
  0xe1   : > { %6789 = vmatprep.mubr.msk.bf16.mxu0 %vm1907_vm14, %v1884_v32  ;;  %v1858_v1 = vsel %vm1287_vm11, %v7328_v9, %v1746_v39  ;;  %v2584_v32 = vrot.slane %v2582_v7, 1  ;;  %v2736_v7 = vsel %vm1206_vm9, %v2734_v35, %v2735_v43  ;;  %v8180_v9 = vld [vmem:[#allocation2 + $0xbc] ss:$0 sps:$4 sm:$0x11]  }
  0xe2   : > { %6790 = vmatmul.mubr.msk.bf16.gmra.mrb[16].mxu0 %vm1907_vm14, %v1886_v34  ;;  %v2727_v34 = vsel %vm1206_vm9, %v2725_v8, %v2726_v13  ;;  %v2620_v36 = vrot.slane %v2618_v25, 1  ;;  %v2602_v39 = vsel %vm981_vm10, %v2597_v12, %v2601_v22  ;;  %v2740_v8 = vrot.slane %v8135_v58, 1  ;;  %v7331_v25 = vld [vmem:[#allocation2 + $0x9c] sm:$0xff]  }
  0xe3   : > { %v2644_v12 = vrot.slane %v2642_v60, 1 }
  0xe4   : > { %2759 = vrot.lane.b32.xlu0 %v2715_v18, %s7414_s24  ;;  %2685 = vrot.lane.b32.xlu1 %v2554_v28, %s7415_s25  ;;  %v1826_v10 = vpop.permute.xlu1 %1825  ;;  %v2580_v18 = vshrl.u32 %v8127_v47, 16  ;;  %v8153_v28 = vld [vmem:[#allocation2 + $0x90] sm:$0xff]   ;;  %v2621_v55 = vor.u32 %v2620_v36, %v2616_v6  ;;  %v2738_v6 = vrot.slane %v8160_v26, 1 }
  0xe5   : > { %v1890_v14 = vsel %vm1320_vm13, %v1858_v1, %v1826_v10  ;;  %v2604_v57 = vshrl.u32 %v8153_v28, 16  ;;  %v2733_v1 = vsel %vm1206_vm9, %v2731_v49, %v2732_v53  ;;  %v2737_v35 = vrot.slane %v8153_v28, 1  ;;  %v7215_v53 = vld [vmem:[#allocation2 + $0xd4] ss:$0 sps:$4 sm:$0x11]  }
  0xe8   : > { %v1744_v48 = vpop.permute.xlu0 %1743  ;;  %2683 = vrot.lane.b32.xlu0 %v2542_v44, %s7415_s25  ;;  %2765 = vrot.lane.b32.xlu1 %v2724_v42, %s7414_s24  ;;  %v2606_v42 = vshll.u32 %v8153_v28, 16  ;;  %v2585_v44 = vor.u32 %v2584_v32, %v2580_v18  ;;  %v8190_v18 = vld [vmem:[#allocation2 + $0xb0] ss:$0 sps:$4 sm:$0x11]   ;;  %v2647_v32 = vshll.u32 %v8180_v9, 16 }
  0xe9   : > { %v1856_v59 = vsel %vm1287_vm11, %v7329_v11, %v1744_v48  ;;  %v2741_v11 = vrot.slane %v8150_v23, 1 }
  0xea   : > { %v2590_v41 = vsel %vm981_vm10, %v2585_v44, %v2589_v45 }
  0xeb   : > { %v2742_v45 = vsel %vm1206_vm9, %v2740_v8, %v2741_v11 }
  0xec   : > { %v1824_v17 = vpop.permute.xlu0 %1823  ;;  %2763 = vrot.lane.b32.xlu0 %v2721_v38, %s7414_s24  ;;  %2689 = vrot.lane.b32.xlu1 %v2578_v62, %s7415_s25  ;;  %v2611_v38 = vshll.u32 %v8160_v26, 16  ;;  %v2608_v62 = vrot.slane %v2606_v42, 1  ;;  %v8210_v26 = vld [vmem:[#allocation2 + $0xc0] sm:$0xff]  }
  0xed   : > { %v1888_v20 = vsel %vm1320_vm13, %v1856_v59, %v1824_v17  ;;  %v1750_v48 = vpop.permute.xlu1 %1749  ;;  %v2640_v17 = vshrl.u32 %v8169_v46, 16 }
  0xee   : > { %6793 = vmatprep.mubr.msk.bf16.mxu0 %vm1907_vm14, %v1888_v20  ;;  %v2613_v10 = vrot.slane %v2611_v38, 1  ;;  %v2609_v13 = vor.u32 %v2608_v62, %v2604_v57  ;;  %v7330_v20 = vld [vmem:[#allocation2 + $0xa8] sm:$0xff]   ;;  %v2739_v57 = vsel %vm1206_vm9, %v2737_v35, %v2738_v6 }
  0xef   : > { %6794 = vmatmul.mubr.msk.bf16.gmra.mrb[20].mxu0 %vm1907_vm14, %v1890_v14  ;;  %v1862_v22 = vsel %vm1287_vm11, %v7330_v20, %v1750_v48  ;;  %v2645_v43 = vor.u32 %v2644_v12, %v2640_v17  ;;  %v2649_v48 = vrot.slane %v2647_v32, 1  ;;  %v2744_v17 = vrot.slane %v8190_v18, 1 }
  0xf0   : > { %2687 = vrot.lane.b32.xlu0 %v2566_v19, %s7415_s25  ;;  %2769 = vrot.lane.b32.xlu1 %v2730_v61, %s7414_s24  ;;  %v2626_v61 = vsel %vm981_vm10, %v2621_v55, %v2625_v56  ;;  %v2630_v19 = vshll.u32 %v8176_v3, 16  ;;  %v2614_v44 = vsel %vm981_vm10, %v2609_v13, %v2613_v10  ;;  %v2747_v10 = vrot.slane %v8180_v9, 1 }
  0xf1   : > { %v1830_v59 = vpop.permute.xlu1 %1829  ;;  %v2650_v62 = vsel %vm981_vm10, %v2645_v43, %v2649_v48  ;;  %v2743_v13 = vrot.slane %v8176_v3, 1 }
  0xf2   : > { %v1894_v36 = vsel %vm1320_vm13, %v1862_v22, %v1830_v59  ;;  %v2632_v42 = vrot.slane %v2630_v19, 1  ;;  %v2671_v59 = vshll.u32 %v7215_v53, 16  ;;  %v7332_v19 = vld [vmem:[#allocation2 + $0xc0] sm:$0xff]   ;;  %v2652_v22 = vshrl.u32 %v8210_v26, 16 }
  0xf4   : > { %2767 = vrot.lane.b32.xlu0 %v2727_v34, %s7414_s24  ;;  %2693 = vrot.lane.b32.xlu1 %v2602_v39, %s7415_s25  ;;  %v8197_v34 = vld [vmem:[#allocation2 + $0xcc] sm:$0xff]   ;;  %v2635_v39 = vshll.u32 %v8190_v18, 16  ;;  %v2633_v55 = vor.u32 %v2632_v42, %v2628_v40  ;;  %v2673_v6 = vrot.slane %v2671_v59, 1  ;;  %v2745_v40 = vsel %vm1206_vm9, %v2743_v13, %v2744_v17  ;;  %v7336_v13 = vld [vmem:[#allocation2 + $0x24] sm:$0xff]   ;;  %v7337_v17 = vld [vmem:[#allocation2 + $0x18] sm:$0xff]  }
  0xf5   : > { %v1748_v5 = vpop.permute.xlu0 %1747  ;;  %v2666_v38 = vshll.u32 %v8197_v34, 16  ;;  %v2664_v8 = vshrl.u32 %v8197_v34, 16  ;;  %v2752_v48 = vrot.slane %v8197_v34, 1 }
  0xf6   : > { %v1860_v23 = vsel %vm1287_vm11, %v7331_v25, %v1748_v5  ;;  %v2637_v56 = vrot.slane %v2635_v39, 1  ;;  %v7217_v5 = vld [vmem:[#allocation2 + $0xc8] ss:$0 sps:$4 sm:$0x11]  }
  0xf7   : > { %v2668_v11 = vrot.slane %v2666_v38, 1  ;;  %v2659_v25 = vshll.u32 %v7217_v5, 16  ;;  %v7334_v38 = vld [vmem:[#allocation2 + $0xc] sm:$0xff]  }
  0xf8   : > { %2691 = vrot.lane.b32.xlu0 %v2590_v41, %s7415_s25  ;;  %2773 = vrot.lane.b32.xlu1 %v2736_v7, %s7414_s24  ;;  %v2746_v41 = vrot.slane %v8169_v46, 1  ;;  %v2654_v7 = vshll.u32 %v8210_v26, 16 }
  0xf9   : > { %v1828_v14 = vpop.permute.xlu0 %1827  ;;  %v2669_v35 = vor.u32 %v2668_v11, %v2664_v8  ;;  %v2661_v39 = vrot.slane %v2659_v25, 1  ;;  %v2892_v8 = vsel %vm1940_vm12, %v8103_v24, 0 }
  0xfa   : > { %v1892_v21 = vsel %vm1320_vm13, %v1860_v23, %v1828_v14  ;;  %v2656_v9 = vrot.slane %v2654_v7, 1  ;;  %v7333_v23 = vld [vmem:[#allocation2 + $0xb4] sm:$0xff]  }
  0xfb   : > { %6797 = vmatprep.mubr.msk.bf16.mxu0 %vm1907_vm14, %v1892_v21  ;;  %v2748_v21 = vsel %vm1206_vm9, %v2746_v41, %v2747_v10  ;;  %v2674_v43 = vsel %vm981_vm10, %v2669_v35, %v2673_v6  ;;  %v7335_v41 = vld [vmem:[#allocation2] sm:$0xff]  }
  0xfc   : > { %2771 = vrot.lane.b32.xlu0 %v2733_v1, %s7414_s24  ;;  %2697 = vrot.lane.b32.xlu1 %v2626_v61, %s7415_s25  ;;  %v2638_v61 = vsel %vm981_vm10, %v2633_v55, %v2637_v56  ;;  %v2657_v42 = vor.u32 %v2656_v9, %v2652_v22 }
  0xfd   : > { %6798 = vmatmul.mubr.msk.bf16.gmra.mrb[24].mxu0 %vm1907_vm14, %v1894_v36 }
  0xfe   : > { %v1754_v49 = vpop.permute.xlu1 %1753  ;;  %v2662_v56 = vsel %vm981_vm10, %v2657_v42, %v2661_v39 }
  0xff   : > { %v1866_v20 = vsel %vm1287_vm11, %v7332_v19, %v1754_v49  ;;  %v2753_v49 = vrot.slane %v7215_v53, 1 }
 0x100   : > { %2695 = vrot.lane.b32.xlu0 %v2614_v44, %s7415_s25  ;;  %2777 = vrot.lane.b32.xlu1 %v2742_v45, %s7414_s24 }
 0x101   : > { %v2754_v10 = vsel %vm1206_vm9, %v2752_v48, %v2753_v49 }
 0x102   : > { %v1752_v60 = vpop.permute.xlu0 %1751  ;;  %v1834_v1 = vpop.permute.xlu1 %1833 }
 0x103   : > { %v1864_v14 = vsel %vm1287_vm11, %v7333_v23, %v1752_v60  ;;  %v1898_v18 = vsel %vm1320_vm13, %v1866_v20, %v1834_v1 }
 0x104   : > { %2775 = vrot.lane.b32.xlu0 %v2739_v57, %s7414_s24  ;;  %2701 = vrot.lane.b32.xlu1 %v2650_v62, %s7415_s25  ;;  %v2749_v57 = vrot.slane %v8210_v26, 1  ;;  %v2750_v62 = vrot.slane %v7217_v5, 1 }
 0x106   : > { %v1832_v12 = vpop.permute.xlu0 %1831  ;;  %v1177_v32 = vpop.permute.xlu1 %1176  ;;  %v2751_v5 = vsel %vm1206_vm9, %v2749_v57, %v2750_v62 }
 0x107   : > { %v1896_v36 = vsel %vm1320_vm13, %v1864_v14, %v1832_v12  ;;  %v1291_v55 = vsel %vm1287_vm11, %v7334_v38, %v1177_v32  ;;  %v7338_v12 = vld [vmem:[#allocation2 + $0x3c] sm:$0xff]  }
 0x108   : > { %2699 = vrot.lane.b32.xlu0 %v2638_v61, %s7415_s25  ;;  %6801 = vmatprep.mubr.msk.bf16.mxu0 %vm1907_vm14, %v1896_v36 }
 0x109   : > { %6802 = vmatmul.mubr.msk.bf16.gmra.mrb[28].mxu0 %vm1907_vm14, %v1898_v18  ;;  %2781 = vrot.lane.b32.xlu1 %v2748_v21, %s7414_s24  ;;  %v7339_v21 = vld [vmem:[#allocation2 + $0x30] sm:$0xff]  }
 0x10a   : > { %v1175_v44 = vpop.permute.xlu0 %1174  ;;  %v1258_v45 = vpop.permute.xlu1 %1257 }
 0x10b   : > { %v1289_v7 = vsel %vm1287_vm11, %v7335_v41, %v1175_v44  ;;  %v1324_v11 = vsel %vm1320_vm13, %v1291_v55, %v1258_v45  ;;  %v7340_v44 = vld [vmem:[#allocation2 + $0x54] sm:$0xff]   ;;  %v7342_v41 = vld [vmem:[#allocation2 + $0x6c] sm:$0xff]  }
 0x10c   : > { %2779 = vrot.lane.b32.xlu0 %v2745_v40, %s7414_s24 }
 0x10d   : > { %2705 = vrot.lane.b32.xlu1 %v2674_v43, %s7415_s25  ;;  %v7341_v43 = vld [vmem:[#allocation2 + $0x48] sm:$0xff]  }
 0x10e   : > { %v1256_v60 = vpop.permute.xlu0 %1255  ;;  %v1181_v1 = vpop.permute.xlu1 %1180 }
 0x10f   : > { %v1322_v53 = vsel %vm1320_vm13, %v1289_v7, %v1256_v60  ;;  %v1295_v24 = vsel %vm1287_vm11, %v7336_v13, %v1181_v1  ;;  %v7343_v60 = vld [vmem:[#allocation2 + $0x60] sm:$0xff]  }
 0x110   : > { %2703 = vrot.lane.b32.xlu0 %v2662_v56, %s7415_s25  ;;  %6807 = vmatprep.mubr.msk.bf16.mxu0 %vm1907_vm14, %v1322_v53 }
 0x111   : > { %6808 = vmatmul.mubr.msk.bf16.vlgmr.msra.gmra.mrb[0].mxu0 %vm1907_vm14, %v1324_v11  ;;  %2785 = vrot.lane.b32.xlu1 %v2754_v10, %s7414_s24 }
 0x112   : > { %6840 = vmatpush3.bf16.msra.mxu0 %v2892_v8  ;;  %v1179_v59 = vpop.permute.xlu0 %1178  ;;  %v1262_v61 = vpop.permute.xlu1 %1261 }
 0x113   : > { %v1293_v19 = vsel %vm1287_vm11, %v7337_v17, %v1179_v59  ;;  %v1328_v25 = vsel %vm1320_vm13, %v1295_v24, %v1262_v61  ;;  %v7344_v61 = vld [vmem:[#allocation2 + $0x84] sm:$0xff]   ;;  %v7345_v24 = vld [vmem:[#allocation2 + $0x78] sm:$0xff]  }
 0x114   : > { %2783 = vrot.lane.b32.xlu0 %v2751_v5, %s7414_s24 }
 0x116   : > { %v1260_v20 = vpop.permute.xlu0 %1259  ;;  %v1185_v22 = vpop.permute.xlu1 %1184 }
 0x117   : > { %v1326_v9 = vsel %vm1320_vm13, %v1293_v19, %v1260_v20  ;;  %v1299_v32 = vsel %vm1287_vm11, %v7338_v12, %v1185_v22 }
 0x118   : > { %6811 = vmatprep.mubr.msk.bf16.mxu0 %vm1907_vm14, %v1326_v9 }
 0x119   : > { %6812 = vmatmul.mubr.msk.bf16.gmra.mrb[4].mxu0 %vm1907_vm14, %v1328_v25 }
 0x11a   : > { %v1183_v23 = vpop.permute.xlu0 %1182  ;;  %v1266_v14 = vpop.permute.xlu1 %1265 }
 0x11b   : > { %v1297_v35 = vsel %vm1287_vm11, %v7339_v21, %v1183_v23  ;;  %v1332_v40 = vsel %vm1320_vm13, %v1299_v32, %v1266_v14  ;;  %v7346_v14 = vld [vmem:[#allocation2 + $0x9c] sm:$0xff]  }
 0x11e   : > { %v1264_v6 = vpop.permute.xlu0 %1263  ;;  %v1189_v36 = vpop.permute.xlu1 %1188 }
 0x11f   : > { %v1330_v18 = vsel %vm1320_vm13, %v1297_v35, %v1264_v6  ;;  %v1303_v45 = vsel %vm1287_vm11, %v7340_v44, %v1189_v36 }
 0x120   : > { %6815 = vmatprep.mubr.msk.bf16.mxu0 %vm1907_vm14, %v1330_v18 }
 0x121   : > { %6816 = vmatmul.mubr.msk.bf16.gmra.mrb[8].mxu0 %vm1907_vm14, %v1332_v40 }
 0x122   : > { %v1187_v42 = vpop.permute.xlu0 %1186  ;;  %v1270_v39 = vpop.permute.xlu1 %1269 }
 0x123   : > { %v1301_v48 = vsel %vm1287_vm11, %v7341_v43, %v1187_v42  ;;  %v1336_v56 = vsel %vm1320_vm13, %v1303_v45, %v1270_v39 }
 0x126   : > { %v1268_v49 = vpop.permute.xlu0 %1267  ;;  %v1193_v38 = vpop.permute.xlu1 %1192 }
 0x127   : > { %v1334_v55 = vsel %vm1320_vm13, %v1301_v48, %v1268_v49  ;;  %v1307_v7 = vsel %vm1287_vm11, %v7342_v41, %v1193_v38 }
 0x128   : > { %6819 = vmatprep.mubr.msk.bf16.mxu0 %vm1907_vm14, %v1334_v55 }
 0x129   : > { %6820 = vmatmul.mubr.msk.bf16.gmra.mrb[12].mxu0 %vm1907_vm14, %v1336_v56 }
 0x12a   : > { %v1191_v57 = vpop.permute.xlu0 %1190  ;;  %v1274_v62 = vpop.permute.xlu1 %1273 }
 0x12b   : > { %v1305_v1 = vsel %vm1287_vm11, %v7343_v60, %v1191_v57  ;;  %v1340_v11 = vsel %vm1320_vm13, %v1307_v7, %v1274_v62 }
 0x12e   : > { %v1272_v10 = vpop.permute.xlu0 %1271  ;;  %v1197_v53 = vpop.permute.xlu1 %1196 }
 0x12f   : > { %v1338_v8 = vsel %vm1320_vm13, %v1305_v1, %v1272_v10  ;;  %v1311_v13 = vsel %vm1287_vm11, %v7344_v61, %v1197_v53 }
 0x130   : > { %6823 = vmatprep.mubr.msk.bf16.mxu0 %vm1907_vm14, %v1338_v8 }
 0x131   : > { %6824 = vmatmul.mubr.msk.bf16.gmra.mrb[16].mxu0 %vm1907_vm14, %v1340_v11 }
 0x132   : > { %v1195_v5 = vpop.permute.xlu0 %1194  ;;  %v1278_v59 = vpop.permute.xlu1 %1277 }
 0x133   : > { %v1309_v17 = vsel %vm1287_vm11, %v7345_v24, %v1195_v5  ;;  %v1344_v9 = vsel %vm1320_vm13, %v1311_v13, %v1278_v59 }
 0x136   : > { %v1276_v19 = vpop.permute.xlu0 %1275  ;;  %v1201_v20 = vpop.permute.xlu1 %1200 }
 0x137   : > { %v1342_v22 = vsel %vm1320_vm13, %v1309_v17, %v1276_v19  ;;  %v1315_v12 = vsel %vm1287_vm11, %v7346_v14, %v1201_v20 }
 0x138   : > { %6827 = vmatprep.mubr.msk.bf16.mxu0 %vm1907_vm14, %v1342_v22 }
 0x139   : > { %6828 = vmatmul.mubr.msk.bf16.gmra.mrb[20].mxu0 %vm1907_vm14, %v1344_v9 }
 0x13a   : > { %v1199_v25 = vpop.permute.xlu0 %1198  ;;  %v1282_v23 = vpop.permute.xlu1 %1281 }
 0x13b   : > { %v1313_v32 = vsel %vm1287_vm11, %v7946_v63, %v1199_v25  ;;  %v1348_v36 = vsel %vm1320_vm13, %v1315_v12, %v1282_v23 }
 0x13e   : > { %v1280_v21 = vpop.permute.xlu0 %1279  ;;  %v1205_v35 = vpop.permute.xlu1 %1204 }
 0x13f   : > { %v1346_v6 = vsel %vm1320_vm13, %v1313_v32, %v1280_v21  ;;  %v1319_v42 = vsel %vm1287_vm11, %v7953_v37, %v1205_v35 }
 0x140   : > { %6831 = vmatprep.mubr.msk.bf16.mxu0 %vm1907_vm14, %v1346_v6 }
 0x141   : > { %6832 = vmatmul.mubr.msk.bf16.gmra.mrb[24].mxu0 %vm1907_vm14, %v1348_v36 }
 0x142   : > { %v1203_v18 = vpop.permute.xlu0 %1202  ;;  %v1286_v40 = vpop.permute.xlu1 %1285 }
 0x143   : > { %v1317_v39 = vsel %vm1287_vm11, %v7969_v51, %v1203_v18  ;;  %v1352_v43 = vsel %vm1320_vm13, %v1319_v42, %v1286_v40 }
 0x146   : > { %v1284_v44 = vpop.permute.xlu0 %1283  ;;  %v2678_v63 = vpop.permute.xlu1 %2677 }
 0x147   : > { %v1350_v45 = vsel %vm1320_vm13, %v1317_v39, %v1284_v44  ;;  %v2790_v38 = vsel %vm1287_vm11, %v7979_v2, %v2678_v63 }
 0x148   : > { %6835 = vmatprep.mubr.msk.bf16.mxu0 %vm1907_vm14, %v1350_v45 }
 0x149   : > { %6836 = vmatmul.mubr.msk.bf16.gmra.mrb[28].mxu0 %vm1907_vm14, %v1352_v43 }
 0x14a   : > { %v2676_v48 = vpop.permute.xlu0 %2675  ;;  %v2758_v49 = vpop.permute.xlu1 %2757 }
 0x14b   : > { %v2788_v37 = vsel %vm1287_vm11, %v7997_v30, %v2676_v48  ;;  %v2822_v57 = vsel %vm1320_vm13, %v2790_v38, %v2758_v49 }
 0x14e   : > { %v2756_v55 = vpop.permute.xlu0 %2755  ;;  %v2682_v51 = vpop.permute.xlu1 %2681 }
 0x14f   : > { %v2820_v56 = vsel %vm1320_vm13, %v2788_v37, %v2756_v55  ;;  %v2794_v7 = vsel %vm1287_vm11, %v8020_v15, %v2682_v51  ;;  %v3185_v51 = vld [vmem:[#allocation3 + $0x18] sm:$0x1] }
 0x150   : > { %6841 = vmatprep.mubr.msk.bf16.mxu0 %vm1907_vm14, %v2820_v56  ;;  %v3186_v56 = vsel %vm7456_vm2, 0, %v3185_v51  ;;  %v3275_v51 = vld [vmem:[#allocation3 + $0xc8] sm:$0x1] }
 0x151   : > { %6842 = vmatmul.mubr.msk.bf16.vlgmr.msra.gmra.mrb[0].mxu0 %vm1907_vm14, %v2822_v57  ;;  %v3182_v57 = vld [vmem:[#allocation3 + $0xc] sm:$0x1]  ;;  %3187 = vst [vmem:[#allocation3 + $0x18] sm:$0x1] %v3186_v56  ;;  %v3276_v56 = vsel %vm7466_vm4, 0, %v3275_v51 }
 0x152   : > { %v2680_v62 = vpop.permute.xlu0 %2679  ;;  %v2762_v41 = vpop.permute.xlu1 %2761  ;;  %3277 = vst [vmem:[#allocation3 + $0xc8] sm:$0x1] %v3276_v56 }
 0x153   : > { %v2792_v2 = vsel %vm1287_vm11, %v8024_v50, %v2680_v62  ;;  %v2826_v10 = vsel %vm1320_vm13, %v2794_v7, %v2762_v41  ;;  %v3233_v62 = vld [vmem:[#allocation3 + $0x20] sm:$0x1]  ;;  %v3230_v41 = vld [vmem:[#allocation3 + $0x14] sm:$0x1] }
 0x154   : > { %v3231_v7 = vsel %vm7466_vm4, 0, %v3230_v41 }
 0x155   : > { %3232 = vst [vmem:[#allocation3 + $0x14] sm:$0x1] %v3231_v7 }
 0x156   : > { %v2760_v60 = vpop.permute.xlu0 %2759  ;;  %v2686_v30 = vpop.permute.xlu1 %2685 }
 0x157   : > { %v2824_v1 = vsel %vm1320_vm13, %v2792_v2, %v2760_v60  ;;  %v2798_v11 = vsel %vm1287_vm11, %v8044_v16, %v2686_v30  ;;  %v3191_v2 = vld [vmem:[#allocation3 + $0x30] sm:$0x1]  ;;  %v3188_v30 = vld [vmem:[#allocation3 + $0x24] sm:$0x1] }
 0x158   : > { %6845 = vmatprep.mubr.msk.bf16.mxu0 %vm1907_vm14, %v2824_v1  ;;  %v3192_v60 = vsel %vm7456_vm2, 0, %v3191_v2  ;;  %v3189_v1 = vsel %vm7456_vm2, 0, %v3188_v30 }
 0x159   : > { %6846 = vmatmul.mubr.msk.bf16.gmra.mrb[4].mxu0 %vm1907_vm14, %v2826_v10  ;;  %3193 = vst [vmem:[#allocation3 + $0x30] sm:$0x1] %v3192_v60  ;;  %3190 = vst [vmem:[#allocation3 + $0x24] sm:$0x1] %v3189_v1  ;;  %v3239_v10 = vld [vmem:[#allocation3 + $0x38] sm:$0x1] }
 0x15a   : > { %v2684_v53 = vpop.permute.xlu0 %2683  ;;  %v2766_v8 = vpop.permute.xlu1 %2765 }
 0x15b   : > { %v2796_v15 = vsel %vm1287_vm11, %v8057_v31, %v2684_v53  ;;  %v2830_v61 = vsel %vm1320_vm13, %v2798_v11, %v2766_v8  ;;  %v3240_v53 = vsel %vm7466_vm4, 0, %v3239_v10  ;;  %v3236_v8 = vld [vmem:[#allocation3 + $0x2c] sm:$0x1] }
 0x15c   : > { %3241 = vst [vmem:[#allocation3 + $0x38] sm:$0x1] %v3240_v53  ;;  %v3237_v11 = vsel %vm7466_vm4, 0, %v3236_v8 }
 0x15d   : > { %3238 = vst [vmem:[#allocation3 + $0x2c] sm:$0x1] %v3237_v11 }
 0x15e   : > { %v2764_v5 = vpop.permute.xlu0 %2763  ;;  %v2690_v50 = vpop.permute.xlu1 %2689 }
 0x15f   : > { %v2828_v59 = vsel %vm1320_vm13, %v2796_v15, %v2764_v5  ;;  %v2802_v17 = vsel %vm1287_vm11, %v8076_v54, %v2690_v50  ;;  %v3197_v15 = vld [vmem:[#allocation3 + $0x48] sm:$0x1]  ;;  %v3194_v50 = vld [vmem:[#allocation3 + $0x3c] sm:$0x1] }
 0x160   : > { %6849 = vmatprep.mubr.msk.bf16.mxu0 %vm1907_vm14, %v2828_v59  ;;  %v3198_v5 = vsel %vm7456_vm2, 0, %v3197_v15  ;;  %v3195_v59 = vsel %vm7456_vm2, 0, %v3194_v50 }
 0x161   : > { %6850 = vmatmul.mubr.msk.bf16.gmra.mrb[8].mxu0 %vm1907_vm14, %v2830_v61  ;;  %3199 = vst [vmem:[#allocation3 + $0x48] sm:$0x1] %v3198_v5  ;;  %v3245_v61 = vld [vmem:[#allocation3 + $0x50] sm:$0x1]  ;;  %3196 = vst [vmem:[#allocation3 + $0x3c] sm:$0x1] %v3195_v59 }
 0x162   : > { %v2688_v13 = vpop.permute.xlu0 %2687  ;;  %v2770_v24 = vpop.permute.xlu1 %2769 }
 0x163   : > { %v2800_v16 = vsel %vm1287_vm11, %v8080_v52, %v2688_v13  ;;  %v2834_v22 = vsel %vm1320_vm13, %v2802_v17, %v2770_v24  ;;  %v3246_v13 = vsel %vm7466_vm4, 0, %v3245_v61  ;;  %v3242_v24 = vld [vmem:[#allocation3 + $0x44] sm:$0x1] }
 0x164   : > { %3247 = vst [vmem:[#allocation3 + $0x50] sm:$0x1] %v3246_v13  ;;  %v3243_v17 = vsel %vm7466_vm4, 0, %v3242_v24 }
 0x165   : > { %3244 = vst [vmem:[#allocation3 + $0x44] sm:$0x1] %v3243_v17 }
 0x166   : > { %v2768_v19 = vpop.permute.xlu0 %2767  ;;  %v2694_v31 = vpop.permute.xlu1 %2693 }
 0x167   : > { %v2832_v20 = vsel %vm1320_vm13, %v2800_v16, %v2768_v19  ;;  %v2806_v23 = vsel %vm1287_vm11, %v8114_v29, %v2694_v31  ;;  %v3203_v16 = vld [vmem:[#allocation3 + $0x60] sm:$0x1]  ;;  %v3200_v31 = vld [vmem:[#allocation3 + $0x54] sm:$0x1] }
 0x168   : > { %6853 = vmatprep.mubr.msk.bf16.mxu0 %vm1907_vm14, %v2832_v20  ;;  %v3204_v19 = vsel %vm7456_vm2, 0, %v3203_v16  ;;  %v3201_v20 = vsel %vm7456_vm2, 0, %v3200_v31 }
 0x169   : > { %6854 = vmatmul.mubr.msk.bf16.gmra.mrb[12].mxu0 %vm1907_vm14, %v2834_v22  ;;  %3205 = vst [vmem:[#allocation3 + $0x60] sm:$0x1] %v3204_v19  ;;  %v3251_v22 = vld [vmem:[#allocation3 + $0x68] sm:$0x1]  ;;  %3202 = vst [vmem:[#allocation3 + $0x54] sm:$0x1] %v3201_v20 }
 0x16a   : > { %v2692_v9 = vpop.permute.xlu0 %2691  ;;  %v2774_v25 = vpop.permute.xlu1 %2773 }
 0x16b   : > { %v2804_v54 = vsel %vm1287_vm11, %v8127_v47, %v2692_v9  ;;  %v2838_v32 = vsel %vm1320_vm13, %v2806_v23, %v2774_v25  ;;  %v3252_v9 = vsel %vm7466_vm4, 0, %v3251_v22  ;;  %v3248_v25 = vld [vmem:[#allocation3 + $0x5c] sm:$0x1] }
 0x16c   : > { %3253 = vst [vmem:[#allocation3 + $0x68] sm:$0x1] %v3252_v9  ;;  %v3249_v23 = vsel %vm7466_vm4, 0, %v3248_v25  ;;  %v3685_v25 = vld [vmem:[#allocation3 + $0x18] sm:$0xf] }
 0x16d   : > { %3250 = vst [vmem:[#allocation3 + $0x5c] sm:$0x1] %v3249_v23 }
 0x16e   : > { %v2772_v14 = vpop.permute.xlu0 %2771  ;;  %v2698_v52 = vpop.permute.xlu1 %2697 }
 0x16f   : > { %v2836_v12 = vsel %vm1320_vm13, %v2804_v54, %v2772_v14  ;;  %v2810_v6 = vsel %vm1287_vm11, %v8135_v58, %v2698_v52  ;;  %v3209_v54 = vld [vmem:[#allocation3 + $0x78] sm:$0x1]  ;;  %v3206_v52 = vld [vmem:[#allocation3 + $0x6c] sm:$0x1] }
 0x170   : > { %6857 = vmatprep.mubr.msk.bf16.mxu0 %vm1907_vm14, %v2836_v12  ;;  %v3210_v14 = vsel %vm7456_vm2, 0, %v3209_v54  ;;  %v3207_v12 = vsel %vm7456_vm2, 0, %v3206_v52 }
 0x171   : > { %6858 = vmatmul.mubr.msk.bf16.gmra.mrb[16].mxu0 %vm1907_vm14, %v2838_v32  ;;  %3211 = vst [vmem:[#allocation3 + $0x78] sm:$0x1] %v3210_v14  ;;  %3208 = vst [vmem:[#allocation3 + $0x6c] sm:$0x1] %v3207_v12  ;;  %v3257_v32 = vld [vmem:[#allocation3 + $0x80] sm:$0x1] }
 0x172   : > { %v2696_v21 = vpop.permute.xlu0 %2695  ;;  %v2778_v35 = vpop.permute.xlu1 %2777 }
 0x173   : > { %v2808_v29 = vsel %vm1287_vm11, %v8153_v28, %v2696_v21  ;;  %v2842_v40 = vsel %vm1320_vm13, %v2810_v6, %v2778_v35  ;;  %v3258_v21 = vsel %vm7466_vm4, 0, %v3257_v32  ;;  %v3254_v35 = vld [vmem:[#allocation3 + $0x74] sm:$0x1] }
 0x174   : > { %3259 = vst [vmem:[#allocation3 + $0x80] sm:$0x1] %v3258_v21  ;;  %v3255_v6 = vsel %vm7466_vm4, 0, %v3254_v35 }
 0x175   : > { %3256 = vst [vmem:[#allocation3 + $0x74] sm:$0x1] %v3255_v6 }
 0x176   : > { %v2776_v36 = vpop.permute.xlu0 %2775  ;;  %v2702_v47 = vpop.permute.xlu1 %2701 }
 0x177   : > { %v2840_v18 = vsel %vm1320_vm13, %v2808_v29, %v2776_v36  ;;  %v2814_v44 = vsel %vm1287_vm11, %v8169_v46, %v2702_v47  ;;  %v3215_v29 = vld [vmem:[#allocation3 + $0x90] sm:$0x1]  ;;  %v3212_v47 = vld [vmem:[#allocation3 + $0x84] sm:$0x1] }
 0x178   : > { %6861 = vmatprep.mubr.msk.bf16.mxu0 %vm1907_vm14, %v2840_v18  ;;  %v3216_v36 = vsel %vm7456_vm2, 0, %v3215_v29  ;;  %v3213_v18 = vsel %vm7456_vm2, 0, %v3212_v47 }
 0x179   : > { %6862 = vmatmul.mubr.msk.bf16.gmra.mrb[20].mxu0 %vm1907_vm14, %v2842_v40  ;;  %3217 = vst [vmem:[#allocation3 + $0x90] sm:$0x1] %v3216_v36  ;;  %3214 = vst [vmem:[#allocation3 + $0x84] sm:$0x1] %v3213_v18  ;;  %v3263_v40 = vld [vmem:[#allocation3 + $0x98] sm:$0x1] }
 0x17a   : > { %v2700_v42 = vpop.permute.xlu0 %2699 }
 0x17b   : > { %v2782_v39 = vpop.permute.xlu1 %2781  ;;  %v2812_v58 = vsel %vm1287_vm11, %v8176_v3, %v2700_v42  ;;  %v3264_v42 = vsel %vm7466_vm4, 0, %v3263_v40 }
 0x17c   : > { %v2846_v43 = vsel %vm1320_vm13, %v2814_v44, %v2782_v39  ;;  %3265 = vst [vmem:[#allocation3 + $0x98] sm:$0x1] %v3264_v42  ;;  %v3260_v39 = vld [vmem:[#allocation3 + $0x8c] sm:$0x1] }
 0x17d   : > { %v3261_v44 = vsel %vm7466_vm4, 0, %v3260_v39 }
 0x17e   : > { %v2780_v63 = vpop.permute.xlu0 %2779  ;;  %3262 = vst [vmem:[#allocation3 + $0x8c] sm:$0x1] %v3261_v44 }
 0x17f   : > { %v2844_v28 = vsel %vm1320_vm13, %v2812_v58, %v2780_v63  ;;  %v2706_v45 = vpop.permute.xlu1 %2705  ;;  %v3221_v58 = vld [vmem:[#allocation3 + $0xa8] sm:$0x1] }
 0x180   : > { %6865 = vmatprep.mubr.msk.bf16.mxu0 %vm1907_vm14, %v2844_v28  ;;  %v2818_v49 = vsel %vm1287_vm11, %v8197_v34, %v2706_v45  ;;  %v3183_v34 = vsel %vm7456_vm2, 0, %v3182_v57  ;;  %v3222_v63 = vsel %vm7456_vm2, 0, %v3221_v58  ;;  %v3218_v28 = vld [vmem:[#allocation3 + $0x9c] sm:$0x1] }
 0x181   : > { %6866 = vmatmul.mubr.msk.bf16.gmra.mrb[24].mxu0 %vm1907_vm14, %v2846_v43  ;;  %3184 = vst [vmem:[#allocation3 + $0xc] sm:$0x1] %v3183_v34  ;;  %3223 = vst [vmem:[#allocation3 + $0xa8] sm:$0x1] %v3222_v63  ;;  %v3219_v45 = vsel %vm7456_vm2, 0, %v3218_v28 }
 0x182   : > { %v2704_v48 = vpop.permute.xlu0 %2703  ;;  %3220 = vst [vmem:[#allocation3 + $0x9c] sm:$0x1] %v3219_v45  ;;  %v3269_v43 = vld [vmem:[#allocation3 + $0xb0] sm:$0x1]  ;;  %v3272_v57 = vld [vmem:[#allocation3 + $0xbc] sm:$0x1] }
 0x183   : > { %v2786_v38 = vpop.permute.xlu1 %2785  ;;  %v2816_v46 = vsel %vm1287_vm11, %v8210_v26, %v2704_v48  ;;  %v3234_v26 = vsel %vm7466_vm4, 0, %v3233_v62  ;;  %v3270_v48 = vsel %vm7466_vm4, 0, %v3269_v43  ;;  %v3273_v34 = vsel %vm7466_vm4, 0, %v3272_v57  ;;  %v8432_v62 = vld [vmem:[%s9515_s2] ss:$0 sm:$0xff] }
 0x184   : > { %v2850_v55 = vsel %vm1320_vm13, %v2818_v49, %v2786_v38  ;;  %3235 = vst [vmem:[#allocation3 + $0x20] sm:$0x1] %v3234_v26  ;;  %3271 = vst [vmem:[#allocation3 + $0xb0] sm:$0x1] %v3270_v48  ;;  %v3266_v49 = vld [vmem:[#allocation3 + $0xa4] sm:$0x1] }
 0x185   : > { %v3267_v38 = vsel %vm7466_vm4, 0, %v3266_v49  ;;  %3274 = vst [vmem:[#allocation3 + $0xbc] sm:$0x1] %v3273_v34  ;;  %v3682_v28 = vld [vmem:[#allocation3 + $0x14] sm:$0x1] }
 0x186   : > { %v2784_v37 = vpop.permute.xlu0 %2783  ;;  %3268 = vst [vmem:[#allocation3 + $0xa4] sm:$0x1] %v3267_v38 }
 0x187   : > { %v2848_v3 = vsel %vm1320_vm13, %v2816_v46, %v2784_v37  ;;  %v3227_v46 = vld [vmem:[#allocation3 + $0xc0] sm:$0x1] }
 0x188   : > { %6869 = vmatprep.mubr.msk.bf16.mxu0 %vm1907_vm14, %v2848_v3  ;;  %v3228_v37 = vsel %vm7456_vm2, 0, %v3227_v46  ;;  %v3224_v3 = vld [vmem:[#allocation3 + $0xb4] sm:$0x1]  ;;  %v3678_v35 = vld [vmem:[#allocation3 + $0xc] sm:$0xf] }
 0x189   : > { %6870 = vmatmul.mubr.msk.bf16.gmra.mrb[28].mxu0 %vm1907_vm14, %v2850_v55  ;;  %3229 = vst [vmem:[#allocation3 + $0xc0] sm:$0x1] %v3228_v37  ;;  %v3225_v55 = vsel %vm7456_vm2, 0, %v3224_v3 }
 0x18a   : > { %3226 = vst [vmem:[#allocation3 + $0xb4] sm:$0x1] %v3225_v55 }
 0x18b   : > { %v3689_v40 = vld [vmem:[#allocation3 + $0x20] sm:$0x1] }
 0x224   : > { %v6843_v26 = vpop.f32.mrb[0].mxu0 }
 0x225   : > { %v3096_v41 = vadd.f32 %v6843_v26, %v8432_v62  ;;  %v2928_v7 = vpop.f32.mrb[1].mxu0 }
 0x226   : > { %v3094_v2 = vadd.f32 %v8432_v62, %v2928_v7  ;;  %v6844_v60 = vpop.f32.mrb[2].mxu0 }
 0x227   : > { %v3128_v30 = vmax.f32 %v3096_v41, 0.0  ;;  %v3097_v1 = vadd.f32 %v6844_v60, %v8432_v62  ;;  %v2931_v10 = vpop.f32.mrb[3].mxu0 }
 0x228   : > { %v3126_v53 = vmax.f32 %v3094_v2, 0.0  ;;  %v3095_v4 = vadd.f32 %v8432_v62, %v2931_v10 }
 0x229   : > { %v6639_v8 = vpack.c.bf16 %v3128_v30, %v3128_v30  ;;  %v3129_v11 = vmax.f32 %v3097_v1, 0.0  ;;  %v3699_v30 = vld [vmem:[#allocation3 + $0x30] sm:$0xf] }
 0x22a   : > { %v6637_v15 = vpack.c.bf16 %v3126_v53, %v3126_v53  ;;  %v3127_v5 = vmax.f32 %v3095_v4, 0.0 }
 0x22b   : > { %v3376_v50 = vshrl.u32 %v6639_v8, 16  ;;  %v6640_v59 = vpack.c.bf16 %v3129_v11, %v3129_v11  ;;  %v3379_v61 = vshll.u32 %v6639_v8, 16 }
 0x22c   : > { %v3359_v13 = vshrl.u32 %v6637_v15, 16  ;;  %v3362_v24 = vshll.u32 %v6637_v15, 16  ;;  %v6638_v17 = vpack.c.bf16 %v3127_v5, %v3127_v5  ;;  %v6847_v16 = vpop.f32.mrb[4].mxu0  ;;  %v3692_v15 = vld [vmem:[#allocation3 + $0x24] sm:$0xf] }
 0x22d   : > { %v3378_v19 = vrot.slane %v3376_v50, 7  ;;  %v3384_v31 = vshrl.u32 %v6640_v59, 16  ;;  %v3387_v20 = vshll.u32 %v6640_v59, 16  ;;  %v3100_v22 = vadd.f32 %v6847_v16, %v8432_v62  ;;  %v2944_v9 = vpop.f32.mrb[5].mxu0 }
 0x22e   : > { %v3361_v23 = vrot.slane %v3359_v13, 7  ;;  %v3367_v54 = vshrl.u32 %v6638_v17, 16  ;;  %v3370_v14 = vshll.u32 %v6638_v17, 16  ;;  %v3098_v52 = vadd.f32 %v8432_v62, %v2944_v9  ;;  %v6848_v12 = vpop.f32.mrb[6].mxu0 }
 0x22f   : > { %v3381_v32 = vor.u32 %v3379_v61, %v3378_v19  ;;  %v3382_v21 = vrot.slane %v3378_v19, 4  ;;  %v3386_v6 = vrot.slane %v3384_v31, 7  ;;  %v3132_v29 = vmax.f32 %v3100_v22, 0.0  ;;  %v2947_v36 = vpop.f32.mrb[7].mxu0 }
 0x230   : > { %v3364_v47 = vor.u32 %v3362_v24, %v3361_v23  ;;  %v3365_v18 = vrot.slane %v3361_v23, 4  ;;  %v3369_v42 = vrot.slane %v3367_v54, 7  ;;  %v3130_v39 = vmax.f32 %v3098_v52, 0.0 }
 0x231   : > { %v3686_v44 = vsel %vm7512_vm8, %v3381_v32, %v3685_v25  ;;  %v3389_v58 = vor.u32 %v3387_v20, %v3386_v6  ;;  %v3391_v63 = vrot.slane %v3386_v6, 4  ;;  %v6643_v45 = vpack.c.bf16 %v3132_v29, %v3132_v29  ;;  %v3703_v32 = vld [vmem:[#allocation3 + $0x38] sm:$0x1] }
 0x232   : > { %3687 = vst [vmem:[#allocation3 + $0x18] sm:$0xf] %v3686_v44  ;;  %v3679_v43 = vsel %vm7512_vm8, %v3364_v47, %v3678_v35  ;;  %v3372_v48 = vor.u32 %v3370_v14, %v3369_v42  ;;  %v3374_v49 = vrot.slane %v3369_v42, 4  ;;  %v6641_v38 = vpack.c.bf16 %v3130_v39, %v3130_v39  ;;  %v3713_v42 = vld [vmem:[#allocation3 + $0x48] sm:$0xf] }
 0x233   : > { %3680 = vst [vmem:[#allocation3 + $0xc] sm:$0xf] %v3679_v43  ;;  %v3390_v46 = vsel %vm7503_vm7, %v3382_v21, %v3389_v58  ;;  %v3690_v37 = vsel %vm7456_vm2, %v3391_v63, %v3689_v40  ;;  %v3410_v3 = vshrl.u32 %v6643_v45, 16  ;;  %v3413_v56 = vshll.u32 %v6643_v45, 16  ;;  %v3696_v21 = vld [vmem:[#allocation3 + $0x2c] sm:$0x1] }
 0x234   : > { %3688 = vst.msk [vmem:[#allocation3 + $0x1c] sm:$0xf] %vm258_vm5, %v3390_v46  ;;  %3691 = vst [vmem:[#allocation3 + $0x20] sm:$0x1] %v3690_v37  ;;  %v3373_v55 = vsel %vm7503_vm7, %v3365_v18, %v3372_v48  ;;  %v3683_v51 = vsel %vm7456_vm2, %v3374_v49, %v3682_v28  ;;  %v3393_v57 = vshrl.u32 %v6641_v38, 16  ;;  %v6851_v34 = vpop.f32.mrb[8].mxu0  ;;  %v3101_v41 = vadd.f32 %v6848_v12, %v8432_v62 }
 0x235   : > { %3681 = vst.msk [vmem:[#allocation3 + $0x10] sm:$0xf] %vm258_vm5, %v3373_v55  ;;  %3684 = vst [vmem:[#allocation3 + $0x14] sm:$0x1] %v3683_v51  ;;  %v8454_v26 = vrot.slane %v3410_v3, 7  ;;  %v3099_v7 = vadd.f32 %v8432_v62, %v2947_v36  ;;  %v3104_v2 = vadd.f32 %v6851_v34, %v8432_v62  ;;  %v2960_v60 = vpop.f32.mrb[9].mxu0 }
 0x236   : > { %v3395_v1 = vrot.slane %v3393_v57, 7  ;;  %v3396_v10 = vshll.u32 %v6641_v38, 16  ;;  %v3102_v53 = vadd.f32 %v8432_v62, %v2960_v60  ;;  %v6852_v4 = vpop.f32.mrb[10].mxu0  ;;  %v3133_v5 = vmax.f32 %v3101_v41, 0.0  ;;  %v3706_v3 = vld [vmem:[#allocation3 + $0x3c] sm:$0xf] }
 0x237   : > { %v3415_v8 = vor.u32 %v3413_v56, %v8454_v26  ;;  %v3416_v11 = vrot.slane %v8454_v26, 4  ;;  %v3131_v50 = vmax.f32 %v3099_v7, 0.0  ;;  %v2963_v59 = vpop.f32.mrb[11].mxu0  ;;  %v3136_v24 = vmax.f32 %v3104_v2, 0.0 }
 0x238   : > { %v3398_v61 = vor.u32 %v3396_v10, %v3395_v1  ;;  %v3399_v13 = vrot.slane %v3395_v1, 4  ;;  %v3134_v17 = vmax.f32 %v3102_v53, 0.0  ;;  %v6644_v19 = vpack.c.bf16 %v3133_v5, %v3133_v5 }
 0x239   : > { %v3700_v16 = vsel %vm7512_vm8, %v3415_v8, %v3699_v30  ;;  %v6642_v31 = vpack.c.bf16 %v3131_v50, %v3131_v50  ;;  %v3105_v20 = vadd.f32 %v6852_v4, %v8432_v62  ;;  %v6647_v9 = vpack.c.bf16 %v3136_v24, %v3136_v24  ;;  %v3717_v24 = vld [vmem:[#allocation3 + $0x50] sm:$0x1] }
 0x23a   : > { %3701 = vst [vmem:[#allocation3 + $0x30] sm:$0xf] %v3700_v16  ;;  %v3693_v22 = vsel %vm7512_vm8, %v3398_v61, %v3692_v15  ;;  %v6645_v25 = vpack.c.bf16 %v3134_v17, %v3134_v17  ;;  %v3103_v23 = vadd.f32 %v8432_v62, %v2963_v59  ;;  %v3418_v54 = vshrl.u32 %v6644_v19, 16  ;;  %v3710_v17 = vld [vmem:[#allocation3 + $0x44] sm:$0x1] }
 0x23b   : > { %3694 = vst [vmem:[#allocation3 + $0x24] sm:$0xf] %v3693_v22  ;;  %v3421_v14 = vshll.u32 %v6644_v19, 16  ;;  %v3401_v52 = vshrl.u32 %v6642_v31, 16  ;;  %v3404_v12 = vshll.u32 %v6642_v31, 16  ;;  %v3444_v35 = vshrl.u32 %v6647_v9, 16 }
 0x23c   : > { %v3447_v6 = vshll.u32 %v6647_v9, 16  ;;  %v3427_v29 = vshrl.u32 %v6645_v25, 16  ;;  %v3430_v36 = vshll.u32 %v6645_v25, 16  ;;  %v6855_v47 = vpop.f32.mrb[12].mxu0  ;;  %v3420_v18 = vrot.slane %v3418_v54, 7  ;;  %v8486_v60 = vld [vmem:[#allocation3 + $0x18] sm:$0xff]  }
 0x23d   : > { %v3403_v40 = vrot.slane %v3401_v52, 7  ;;  %v3137_v39 = vmax.f32 %v3105_v20, 0.0  ;;  %v3135_v44 = vmax.f32 %v3103_v23, 0.0  ;;  %v2976_v58 = vpop.f32.mrb[13].mxu0  ;;  %v8468_v63 = vrot.slane %v3444_v35, 7 }
 0x23e   : > { %v8470_v28 = vrot.slane %v3427_v29, 7  ;;  %v3108_v45 = vadd.f32 %v6855_v47, %v8432_v62  ;;  %v3106_v43 = vadd.f32 %v8432_v62, %v2976_v58  ;;  %v6856_v48 = vpop.f32.mrb[14].mxu0  ;;  %v3423_v49 = vor.u32 %v3421_v14, %v3420_v18 }
 0x23f   : > { %v3425_v38 = vrot.slane %v3420_v18, 4  ;;  %v3406_v46 = vor.u32 %v3404_v12, %v3403_v40  ;;  %v3408_v37 = vrot.slane %v3403_v40, 4  ;;  %v2979_v55 = vpop.f32.mrb[15].mxu0  ;;  %v3449_v51 = vor.u32 %v3447_v6, %v8468_v63  ;;  %v3727_v18 = vld [vmem:[#allocation3 + $0x60] sm:$0xf] }
 0x240   : > { %v3450_v56 = vrot.slane %v8468_v63, 4  ;;  %v3432_v57 = vor.u32 %v3430_v36, %v8470_v28  ;;  %v3433_v34 = vrot.slane %v8470_v28, 4  ;;  %v3424_v26 = vsel %vm7503_vm7, %v3416_v11, %v3423_v49  ;;  %v3720_v40 = vld [vmem:[#allocation3 + $0x54] sm:$0xf] }
 0x241   : > { %v3704_v41 = vsel %vm7456_vm2, %v3425_v38, %v3703_v32  ;;  %v3407_v7 = vsel %vm7503_vm7, %v3399_v13, %v3406_v46  ;;  %v3697_v2 = vsel %vm7456_vm2, %v3408_v37, %v3696_v21  ;;  %3702 = vst.msk [vmem:[#allocation3 + $0x34] sm:$0xf] %vm258_vm5, %v3424_v26  ;;  %v3714_v30 = vsel %vm7512_vm8, %v3449_v51, %v3713_v42 }
 0x242   : > { %3705 = vst [vmem:[#allocation3 + $0x38] sm:$0x1] %v3704_v41  ;;  %3695 = vst.msk [vmem:[#allocation3 + $0x28] sm:$0xf] %vm258_vm5, %v3407_v7  ;;  %v3707_v1 = vsel %vm7512_vm8, %v3432_v57, %v3706_v3  ;;  %v6648_v10 = vpack.c.bf16 %v3137_v39, %v3137_v39  ;;  %v6646_v53 = vpack.c.bf16 %v3135_v44, %v3135_v44  ;;  %v3140_v4 = vmax.f32 %v3108_v45, 0.0  ;;  %v8514_v3 = vld [vmem:[#allocation3 + $0xc] sm:$0xff]  }
 0x243   : > { %3698 = vst [vmem:[#allocation3 + $0x2c] sm:$0x1] %v3697_v2  ;;  %3715 = vst [vmem:[#allocation3 + $0x48] sm:$0xf] %v3714_v30  ;;  %v3138_v8 = vmax.f32 %v3106_v43, 0.0  ;;  %v3109_v11 = vadd.f32 %v6856_v48, %v8432_v62  ;;  %v3107_v15 = vadd.f32 %v8432_v62, %v2979_v55  ;;  %v4525_v54 = vshrl.u32 %v8486_v60, 16 }
 0x244   : > { %3708 = vst [vmem:[#allocation3 + $0x3c] sm:$0xf] %v3707_v1  ;;  %v3452_v5 = vshrl.u32 %v6648_v10, 16  ;;  %v3455_v50 = vshll.u32 %v6648_v10, 16  ;;  %v3435_v59 = vshrl.u32 %v6646_v53, 16  ;;  %v3438_v61 = vshll.u32 %v6646_v53, 16 }
 0x245   : > { %v6859_v13 = vpop.f32.mrb[16].mxu0  ;;  %v6651_v16 = vpack.c.bf16 %v3140_v4, %v3140_v4  ;;  %v6649_v19 = vpack.c.bf16 %v3138_v8, %v3138_v8  ;;  %v3141_v31 = vmax.f32 %v3109_v11, 0.0  ;;  %v3139_v20 = vmax.f32 %v3107_v15, 0.0  ;;  %v8510_v48 = vld [vmem:[#allocation3 + $0x20] ss:$0 sps:$4 sm:$0x11]  }
 0x246   : > { %v2992_v22 = vpop.f32.mrb[17].mxu0  ;;  %v3454_v9 = vrot.slane %v3452_v5, 7  ;;  %v3437_v25 = vrot.slane %v3435_v59, 7  ;;  %v3112_v23 = vadd.f32 %v6859_v13, %v8432_v62  ;;  %v3731_v7 = vld [vmem:[#allocation3 + $0x68] sm:$0x1]  ;;  %v4527_v1 = vshll.u32 %v8486_v60, 16 }
 0x247   : > { %v8498_v14 = vpop.f32.mrb[18].mxu0  ;;  %v3478_v52 = vshrl.u32 %v6651_v16, 16  ;;  %v3481_v12 = vshll.u32 %v6651_v16, 16  ;;  %v3461_v32 = vshrl.u32 %v6649_v19, 16  ;;  %v3464_v21 = vshll.u32 %v6649_v19, 16 }
 0x248   : > { %v8500_v35 = vpop.f32.mrb[19].mxu0  ;;  %v3457_v6 = vor.u32 %v3455_v50, %v3454_v9  ;;  %v3459_v29 = vrot.slane %v3454_v9, 4  ;;  %v3440_v36 = vor.u32 %v3438_v61, %v3437_v25  ;;  %v3442_v47 = vrot.slane %v3437_v25, 4  ;;  %v3724_v2 = vld [vmem:[#allocation3 + $0x5c] sm:$0x1] }
 0x249   : > { %v3480_v42 = vrot.slane %v3478_v52, 7  ;;  %v3463_v39 = vrot.slane %v3461_v32, 7  ;;  %v6652_v44 = vpack.c.bf16 %v3141_v31, %v3141_v31  ;;  %v6650_v58 = vpack.c.bf16 %v3139_v20, %v3139_v20  ;;  %v8527_v15 = vld [vmem:[#allocation3 + $0x14] ss:$0 sps:$4 sm:$0x11]  }
 0x24a   : > { %v3458_v63 = vsel %vm7503_vm7, %v3450_v56, %v3457_v6  ;;  %v3718_v28 = vsel %vm7456_vm2, %v3459_v29, %v3717_v24  ;;  %v3441_v45 = vsel %vm7503_vm7, %v3433_v34, %v3440_v36  ;;  %v3711_v43 = vsel %vm7456_vm2, %v3442_v47, %v3710_v17 }
 0x24b   : > { %3716 = vst.msk [vmem:[#allocation3 + $0x4c] sm:$0xf] %vm258_vm5, %v3458_v63  ;;  %3719 = vst [vmem:[#allocation3 + $0x50] sm:$0x1] %v3718_v28  ;;  %v3483_v49 = vor.u32 %v3481_v12, %v3480_v42  ;;  %v3484_v38 = vrot.slane %v3480_v42, 4  ;;  %v3466_v46 = vor.u32 %v3464_v21, %v3463_v39  ;;  %v3467_v37 = vrot.slane %v3463_v39, 4 }
 0x24c   : > { %3709 = vst.msk [vmem:[#allocation3 + $0x40] sm:$0xf] %vm258_vm5, %v3441_v45  ;;  %3712 = vst [vmem:[#allocation3 + $0x44] sm:$0x1] %v3711_v43  ;;  %v3486_v55 = vshrl.u32 %v6652_v44, 16  ;;  %v3489_v51 = vshll.u32 %v6652_v44, 16  ;;  %v3110_v11 = vadd.f32 %v8432_v62, %v2992_v22 }
 0x24d   : > { %v3469_v56 = vshrl.u32 %v6650_v58, 16  ;;  %v3472_v57 = vshll.u32 %v6650_v58, 16  ;;  %v8516_v34 = vpop.f32.mrb[20].mxu0  ;;  %v3728_v26 = vsel %vm7512_vm8, %v3483_v49, %v3727_v18  ;;  %v3721_v41 = vsel %vm7512_vm8, %v3466_v46, %v3720_v40  ;;  %v3741_v21 = vld [vmem:[#allocation3 + $0x78] sm:$0xf]  ;;  %v8555_v39 = vld [vmem:[#allocation3 + $0x30] sm:$0xff]  }
 0x24e   : > { %v3144_v30 = vmax.f32 %v3112_v23, 0.0  ;;  %v8523_v10 = vpop.f32.mrb[21].mxu0  ;;  %3729 = vst [vmem:[#allocation3 + $0x60] sm:$0xf] %v3728_v26  ;;  %3722 = vst [vmem:[#allocation3 + $0x54] sm:$0xf] %v3721_v41  ;;  %v3113_v18 = vadd.f32 %v8498_v14, %v8432_v62  ;;  %v3111_v40 = vadd.f32 %v8432_v62, %v8500_v35 }
 0x24f   : > { %v3488_v53 = vrot.slane %v3486_v55, 7  ;;  %v3471_v4 = vrot.slane %v3469_v56, 7  ;;  %v4532_v8 = vshll.u32 %v8510_v48, 16  ;;  %v8529_v5 = vpop.f32.mrb[22].mxu0  ;;  %v4529_v59 = vrot.slane %v4527_v1, 1 }
 0x250   : > { %v6655_v50 = vpack.c.bf16 %v3144_v30, %v3144_v30  ;;  %v4513_v61 = vshrl.u32 %v8514_v3, 16  ;;  %v4515_v13 = vshll.u32 %v8514_v3, 16  ;;  %v8533_v24 = vpop.f32.mrb[23].mxu0  ;;  %v3142_v29 = vmax.f32 %v3110_v11, 0.0  ;;  %v3734_v56 = vld [vmem:[#allocation3 + $0x6c] sm:$0xf] }
 0x251   : > { %v3491_v17 = vor.u32 %v3489_v51, %v3488_v53  ;;  %v3493_v16 = vrot.slane %v3488_v53, 4  ;;  %v3474_v19 = vor.u32 %v3472_v57, %v3471_v4  ;;  %v3476_v31 = vrot.slane %v3471_v4, 4  ;;  %v8581_v4 = vld [vmem:[#allocation3 + $0x24] sm:$0xff]  }
 0x252   : > { %v3512_v20 = vshrl.u32 %v6655_v50, 16  ;;  %v3515_v9 = vshll.u32 %v6655_v50, 16  ;;  %v4530_v25 = vor.u32 %v4529_v59, %v4525_v54  ;;  %v4534_v22 = vrot.slane %v4532_v8, 1 }
 0x253   : > { %v3492_v23 = vsel %vm7503_vm7, %v3484_v38, %v3491_v17  ;;  %v3732_v52 = vsel %vm7456_vm2, %v3493_v16, %v3731_v7  ;;  %v3475_v12 = vsel %vm7503_vm7, %v3467_v37, %v3474_v19  ;;  %v3725_v32 = vsel %vm7456_vm2, %v3476_v31, %v3724_v2  ;;  %v8571_v2 = vld [vmem:[#allocation3 + $0x38] ss:$0 sps:$4 sm:$0x11]   ;;  %v3745_v17 = vld [vmem:[#allocation3 + $0x80] sm:$0x1] }
 0x254   : > { %3730 = vst.msk [vmem:[#allocation3 + $0x64] sm:$0xf] %vm258_vm5, %v3492_v23  ;;  %3733 = vst [vmem:[#allocation3 + $0x68] sm:$0x1] %v3732_v52  ;;  %v8545_v54 = vrot.slane %v3512_v20, 7  ;;  %v4535_v6 = vsel %vm981_vm10, %v4530_v25, %v4534_v22  ;;  %v4517_v36 = vrot.slane %v4515_v13, 1  ;;  %v6653_v28 = vpack.c.bf16 %v3142_v29, %v3142_v29 }
 0x255   : > { %3723 = vst.msk [vmem:[#allocation3 + $0x58] sm:$0xf] %vm258_vm5, %v3475_v12  ;;  %3726 = vst [vmem:[#allocation3 + $0x5c] sm:$0x1] %v3725_v32  ;;  %4706 = vrot.lane.b32.xlu1 %v4535_v6, %s7415_s25  ;;  %v4520_v47 = vshll.u32 %v8527_v15, 16  ;;  %v4739_v42 = vrot.slane %v8486_v60, 1  ;;  %v3114_v52 = vadd.f32 %v8432_v62, %v8523_v10 }
 0x256   : > { %v8557_v44 = vpop.f32.mrb[24].mxu0  ;;  %v3517_v58 = vor.u32 %v3515_v9, %v8545_v54  ;;  %v3518_v63 = vrot.slane %v8545_v54, 4  ;;  %v4518_v45 = vor.u32 %v4517_v36, %v4513_v61  ;;  %v3145_v38 = vmax.f32 %v3113_v18, 0.0  ;;  %v3738_v16 = vld [vmem:[#allocation3 + $0x74] sm:$0x1] }
 0x257   : > { %v8561_v43 = vpop.f32.mrb[25].mxu0  ;;  %v4522_v49 = vrot.slane %v4520_v47, 1  ;;  %v3143_v14 = vmax.f32 %v3111_v40, 0.0  ;;  %v4740_v46 = vrot.slane %v8510_v48, 1  ;;  %v3495_v37 = vshrl.u32 %v6653_v28, 16 }
 0x258   : > { %v8564_v35 = vpop.f32.mrb[26].mxu0  ;;  %v3742_v60 = vsel %vm7512_vm8, %v3517_v58, %v3741_v21  ;;  %v3498_v55 = vshll.u32 %v6653_v28, 16  ;;  %v4736_v51 = vrot.slane %v8514_v3, 1  ;;  %v6656_v26 = vpack.c.bf16 %v3145_v38, %v3145_v38  ;;  %v8593_v12 = vld [vmem:[#allocation3 + $0x2c] ss:$0 sps:$4 sm:$0x11]  }
 0x259   : > { %3743 = vst [vmem:[#allocation3 + $0x78] sm:$0xf] %v3742_v60  ;;  %v4523_v57 = vsel %vm981_vm10, %v4518_v45, %v4522_v49  ;;  %v6654_v41 = vpack.c.bf16 %v3143_v14, %v3143_v14  ;;  %v4741_v7 = vsel %vm1206_vm9, %v4739_v42, %v4740_v46  ;;  %v8573_v48 = vpop.f32.mrb[27].mxu0  ;;  %v3497_v30 = vrot.slane %v3495_v37, 7  ;;  %v3755_v38 = vld [vmem:[#allocation3 + $0x90] sm:$0xf] }
 0x25a   : > { %4704 = vrot.lane.b32.xlu0 %v4523_v57, %s7415_s25  ;;  %4786 = vrot.lane.b32.xlu1 %v4741_v7, %s7414_s24  ;;  %v4737_v1 = vrot.slane %v8527_v15, 1  ;;  %v3116_v3 = vadd.f32 %v8516_v34, %v8432_v62  ;;  %v4549_v53 = vshrl.u32 %v8555_v39, 16  ;;  %v3520_v8 = vshrl.u32 %v6656_v26, 16 }
 0x25b   : > { %v3523_v11 = vshll.u32 %v6656_v26, 16  ;;  %v3503_v50 = vshrl.u32 %v6654_v41, 16  ;;  %v3506_v59 = vshll.u32 %v6654_v41, 16  ;;  %v3500_v61 = vor.u32 %v3498_v55, %v3497_v30 }
 0x25c   : > { %v3501_v13 = vrot.slane %v3497_v30, 4  ;;  %v4738_v19 = vsel %vm1206_vm9, %v4736_v51, %v4737_v1  ;;  %v3148_v31 = vmax.f32 %v3116_v3, 0.0  ;;  %v3522_v20 = vrot.slane %v3520_v8, 7  ;;  %v8586_v25 = vpop.f32.mrb[28].mxu0 }
 0x25d   : > { %v3505_v15 = vrot.slane %v3503_v50, 7  ;;  %v4551_v9 = vshll.u32 %v8555_v39, 16  ;;  %v4556_v34 = vshll.u32 %v8571_v2, 16  ;;  %v3735_v22 = vsel %vm7512_vm8, %v3500_v61, %v3734_v56  ;;  %v8596_v54 = vpop.f32.mrb[29].mxu0  ;;  %v8628_v50 = vld [vmem:[#allocation3 + $0x48] sm:$0xff]  }
 0x25e   : > { %4784 = vrot.lane.b32.xlu0 %v4738_v19, %s7414_s24  ;;  %v6659_v23 = vpack.c.bf16 %v3148_v31, %v3148_v31  ;;  %v4537_v32 = vshrl.u32 %v8581_v4, 16  ;;  %3736 = vst [vmem:[#allocation3 + $0x6c] sm:$0xf] %v3735_v22  ;;  %v3525_v21 = vor.u32 %v3523_v11, %v3522_v20  ;;  %v3527_v6 = vrot.slane %v3522_v20, 4  ;;  %v8598_v58 = vpop.f32.mrb[30].mxu0 }
 0x25f   : > { %v3508_v29 = vor.u32 %v3506_v59, %v3505_v15  ;;  %v3510_v36 = vrot.slane %v3505_v15, 4  ;;  %v4553_v40 = vrot.slane %v4551_v9, 1  ;;  %v4558_v42 = vrot.slane %v4556_v34, 1  ;;  %v8608_v14 = vpop.f32.mrb[31].mxu0  ;;  %v3748_v59 = vld [vmem:[#allocation3 + $0x84] sm:$0xf] }
 0x260   : > { %v3546_v47 = vshrl.u32 %v6659_v23, 16  ;;  %v3549_v18 = vshll.u32 %v6659_v23, 16  ;;  %v3526_v10 = vsel %vm7503_vm7, %v3518_v63, %v3525_v21  ;;  %v3746_v28 = vsel %vm7456_vm2, %v3527_v6, %v3745_v17  ;;  %v8631_v19 = vld [vmem:[#allocation3 + $0x50] ss:$0 sps:$4 sm:$0x11]  }
 0x261   : > { %v3509_v45 = vsel %vm7503_vm7, %v3501_v13, %v3508_v29  ;;  %v3739_v49 = vsel %vm7456_vm2, %v3510_v36, %v3738_v16  ;;  %3744 = vst.msk [vmem:[#allocation3 + $0x7c] sm:$0xf] %vm258_vm5, %v3526_v10  ;;  %3747 = vst [vmem:[#allocation3 + $0x80] sm:$0x1] %v3746_v28  ;;  %v4554_v63 = vor.u32 %v4553_v40, %v4549_v53  ;;  %v3146_v60 = vmax.f32 %v3114_v52, 0.0 }
 0x262   : > { %3737 = vst.msk [vmem:[#allocation3 + $0x70] sm:$0xf] %vm258_vm5, %v3509_v45  ;;  %3740 = vst [vmem:[#allocation3 + $0x74] sm:$0x1] %v3739_v49  ;;  %v8612_v46 = vrot.slane %v3546_v47, 7  ;;  %v4539_v37 = vshll.u32 %v8581_v4, 16  ;;  %v3117_v51 = vadd.f32 %v8529_v5, %v8432_v62  ;;  %v3115_v56 = vadd.f32 %v8432_v62, %v8533_v24 }
 0x263   : > { %v4544_v55 = vshll.u32 %v8593_v12, 16  ;;  %v4745_v57 = vrot.slane %v8555_v39, 1  ;;  %v4559_v7 = vsel %vm981_vm10, %v4554_v63, %v4558_v42  ;;  %v6657_v30 = vpack.c.bf16 %v3146_v60, %v3146_v60  ;;  %v3759_v36 = vld [vmem:[#allocation3 + $0x98] sm:$0x1]  ;;  %v3752_v47 = vld [vmem:[#allocation3 + $0x8c] sm:$0x1] }
 0x264   : > { %v3551_v26 = vor.u32 %v3549_v18, %v8612_v46  ;;  %v3552_v41 = vrot.slane %v8612_v46, 4  ;;  %4710 = vrot.lane.b32.xlu1 %v4559_v7, %s7415_s25  ;;  %v4541_v1 = vrot.slane %v4539_v37, 1  ;;  %v3149_v53 = vmax.f32 %v3117_v51, 0.0  ;;  %v8649_v46 = vld [vmem:[#allocation3 + $0x44] ss:$0 sps:$4 sm:$0x11]  }
 0x265   : > { %v4546_v3 = vrot.slane %v4544_v55, 1  ;;  %v3147_v8 = vmax.f32 %v3115_v56, 0.0  ;;  %v3529_v11 = vshrl.u32 %v6657_v30, 16  ;;  %v3532_v24 = vshll.u32 %v6657_v30, 16 }
 0x266   : > { %v3756_v5 = vsel %vm7512_vm8, %v3551_v26, %v3755_v38  ;;  %v4746_v39 = vrot.slane %v8571_v2, 1  ;;  %v4542_v61 = vor.u32 %v4541_v1, %v4537_v32  ;;  %v6660_v13 = vpack.c.bf16 %v3149_v53, %v3149_v53  ;;  %v8647_v38 = vld [vmem:[#allocation3 + $0x3c] sm:$0xff]  }
 0x267   : > { %3757 = vst [vmem:[#allocation3 + $0x90] sm:$0xf] %v3756_v5  ;;  %v6658_v17 = vpack.c.bf16 %v3147_v8, %v3147_v8  ;;  %v4742_v16 = vrot.slane %v8581_v4, 1  ;;  %v3531_v31 = vrot.slane %v3529_v11, 7  ;;  %v4743_v15 = vrot.slane %v8593_v12, 1 }
 0x268   : > { %v4747_v20 = vsel %vm1206_vm9, %v4745_v57, %v4746_v39  ;;  %v3120_v9 = vadd.f32 %v8557_v44, %v8432_v62  ;;  %v4547_v2 = vsel %vm981_vm10, %v4542_v61, %v4546_v3  ;;  %v3554_v34 = vshrl.u32 %v6660_v13, 16  ;;  %v3769_v3 = vld [vmem:[#allocation3 + $0xa8] sm:$0xf] }
 0x269   : > { %v3557_v22 = vshll.u32 %v6660_v13, 16  ;;  %v3537_v23 = vshrl.u32 %v6658_v17, 16  ;;  %4790 = vrot.lane.b32.xlu1 %v4747_v20, %s7414_s24  ;;  %v3534_v52 = vor.u32 %v3532_v24, %v3531_v31  ;;  %v3535_v32 = vrot.slane %v3531_v31, 4  ;;  %4708 = vrot.lane.b32.xlu0 %v4547_v2, %s7415_s25  ;;  %v3762_v13 = vld [vmem:[#allocation3 + $0x9c] sm:$0xf] }
 0x26a   : > { %v3540_v4 = vshll.u32 %v6658_v17, 16  ;;  %v3556_v21 = vrot.slane %v3554_v34, 7  ;;  %v4744_v29 = vsel %vm1206_vm9, %v4742_v16, %v4743_v15  ;;  %v3152_v12 = vmax.f32 %v3120_v9, 0.0 }
 0x26b   : > { %v3539_v6 = vrot.slane %v3537_v23, 7  ;;  %v3749_v44 = vsel %vm7512_vm8, %v3534_v52, %v3748_v59  ;;  %v4575_v18 = vshll.u32 %v8628_v50, 16  ;;  %v4580_v40 = vshll.u32 %v8631_v19, 16  ;;  %v8674_v52 = vld [vmem:[#allocation3 + $0x60] sm:$0xff]  }
 0x26c   : > { %v3118_v42 = vadd.f32 %v8432_v62, %v8561_v43  ;;  %3750 = vst [vmem:[#allocation3 + $0x84] sm:$0xf] %v3749_v44  ;;  %v3559_v10 = vor.u32 %v3557_v22, %v3556_v21  ;;  %v3561_v28 = vrot.slane %v3556_v21, 4  ;;  %v6663_v63 = vpack.c.bf16 %v3152_v12, %v3152_v12 }
 0x26d   : > { %v3542_v45 = vor.u32 %v3540_v4, %v3539_v6  ;;  %v3544_v49 = vrot.slane %v3539_v6, 4  ;;  %4788 = vrot.lane.b32.xlu0 %v4744_v29, %s7414_s24  ;;  %v4573_v60 = vshrl.u32 %v8628_v50, 16  ;;  %v4577_v37 = vrot.slane %v4575_v18, 1 }
 0x26e   : > { %v3150_v55 = vmax.f32 %v3118_v42, 0.0  ;;  %v3560_v51 = vsel %vm7503_vm7, %v3552_v41, %v3559_v10  ;;  %v3760_v43 = vsel %vm7456_vm2, %v3561_v28, %v3759_v36  ;;  %v3580_v26 = vshrl.u32 %v6663_v63, 16  ;;  %v3773_v36 = vld [vmem:[#allocation3 + $0xb0] sm:$0x1] }
 0x26f   : > { %v3543_v56 = vsel %vm7503_vm7, %v3535_v32, %v3542_v45  ;;  %v3753_v57 = vsel %vm7456_vm2, %v3544_v49, %v3752_v47  ;;  %3758 = vst.msk [vmem:[#allocation3 + $0x94] sm:$0xf] %vm258_vm5, %v3560_v51  ;;  %3761 = vst [vmem:[#allocation3 + $0x98] sm:$0x1] %v3760_v43  ;;  %v4578_v7 = vor.u32 %v4577_v37, %v4573_v60  ;;  %v4582_v30 = vrot.slane %v4580_v40, 1  ;;  %v8695_v43 = vld [vmem:[#allocation3 + $0x54] sm:$0xff]  }
 0x270   : > { %3751 = vst.msk [vmem:[#allocation3 + $0x88] sm:$0xf] %vm258_vm5, %v3543_v56  ;;  %3754 = vst [vmem:[#allocation3 + $0x8c] sm:$0x1] %v3753_v57  ;;  %v6661_v1 = vpack.c.bf16 %v3150_v55, %v3150_v55  ;;  %v3583_v41 = vshll.u32 %v6663_v63, 16  ;;  %v4563_v53 = vshll.u32 %v8647_v38, 16  ;;  %v3121_v5 = vadd.f32 %v8564_v35, %v8432_v62 }
 0x271   : > { %v4568_v8 = vshll.u32 %v8649_v46, 16  ;;  %v3582_v11 = vrot.slane %v3580_v26, 7  ;;  %v4583_v24 = vsel %vm981_vm10, %v4578_v7, %v4582_v30  ;;  %v4561_v59 = vshrl.u32 %v8647_v38, 16  ;;  %v8676_v32 = vld [vmem:[#allocation3 + $0x68] ss:$0 sps:$4 sm:$0x11]  }
 0x272   : > { %v3563_v39 = vshrl.u32 %v6661_v1, 16  ;;  %4714 = vrot.lane.b32.xlu1 %v4583_v24, %s7415_s25  ;;  %v3566_v61 = vshll.u32 %v6661_v1, 16  ;;  %v4565_v17 = vrot.slane %v4563_v53, 1  ;;  %v3153_v16 = vmax.f32 %v3121_v5, 0.0  ;;  %v3766_v49 = vld [vmem:[#allocation3 + $0xa4] sm:$0x1] }
 0x273   : > { %v3119_v31 = vadd.f32 %v8432_v62, %v8573_v48  ;;  %v3585_v20 = vor.u32 %v3583_v41, %v3582_v11  ;;  %v4570_v9 = vrot.slane %v4568_v8, 1  ;;  %v4751_v35 = vrot.slane %v8628_v50, 1  ;;  %v8697_v56 = vld [vmem:[#allocation3 + $0x5c] ss:$0 sps:$4 sm:$0x11]  }
 0x274   : > { %v3565_v15 = vrot.slane %v3563_v39, 7  ;;  %v4566_v2 = vor.u32 %v4565_v17, %v4561_v59  ;;  %v6664_v34 = vpack.c.bf16 %v3153_v16, %v3153_v16  ;;  %v4752_v23 = vrot.slane %v8631_v19, 1 }
 0x275   : > { %v3151_v22 = vmax.f32 %v3119_v31, 0.0  ;;  %v3586_v4 = vrot.slane %v3582_v11, 4  ;;  %v3770_v21 = vsel %vm7512_vm8, %v3585_v20, %v3769_v3  ;;  %v4748_v48 = vrot.slane %v8647_v38, 1  ;;  %v7347_v31 = vld [vmem:[%s9515_s2] ss:$0 sm:$0xff] }
 0x276   : > { %v3568_v6 = vor.u32 %v3566_v61, %v3565_v15  ;;  %3771 = vst [vmem:[#allocation3 + $0xa8] sm:$0xf] %v3770_v21  ;;  %v3569_v29 = vrot.slane %v3565_v15, 4  ;;  %v4571_v50 = vsel %vm981_vm10, %v4566_v2, %v4570_v9  ;;  %v3588_v12 = vshrl.u32 %v6664_v34, 16  ;;  %v3776_v21 = vld [vmem:[#allocation3 + $0xb4] sm:$0xf] }
 0x277   : > { %v6662_v44 = vpack.c.bf16 %v3151_v22, %v3151_v22  ;;  %4712 = vrot.lane.b32.xlu0 %v4571_v50, %s7415_s25  ;;  %v4753_v47 = vsel %vm1206_vm9, %v4751_v35, %v4752_v23  ;;  %v4749_v18 = vrot.slane %v8649_v46, 1  ;;  %v3124_v40 = vadd.f32 %v8586_v25, %v8432_v62  ;;  %v8726_v50 = vld [vmem:[#allocation3 + $0x78] sm:$0xff]  }
 0x278   : > { %v3763_v19 = vsel %vm7512_vm8, %v3568_v6, %v3762_v13  ;;  %v3590_v42 = vrot.slane %v3588_v12, 7  ;;  %v3591_v10 = vshll.u32 %v6664_v34, 16  ;;  %4794 = vrot.lane.b32.xlu1 %v4753_v47, %s7414_s24  ;;  %v4599_v60 = vshll.u32 %v8674_v52, 16  ;;  %v3783_v13 = vld [vmem:[#allocation3 + $0xc0] sm:$0xf] }
 0x279   : > { %3764 = vst [vmem:[#allocation3 + $0x9c] sm:$0xf] %v3763_v19  ;;  %v3571_v28 = vshrl.u32 %v6662_v44, 16  ;;  %v3574_v45 = vshll.u32 %v6662_v44, 16  ;;  %v4750_v38 = vsel %vm1206_vm9, %v4748_v48, %v4749_v18  ;;  %v3156_v63 = vmax.f32 %v3124_v40, 0.0 }
 0x27a   : > { %v4604_v37 = vshll.u32 %v8676_v32, 16  ;;  %v3593_v55 = vor.u32 %v3591_v10, %v3590_v42  ;;  %v3595_v46 = vrot.slane %v3590_v42, 4  ;;  %v3122_v25 = vadd.f32 %v8432_v62, %v8596_v54  ;;  %v8732_v19 = vld [vmem:[#allocation3 + $0x80] ss:$0 sps:$4 sm:$0x11]  }
 0x27b   : > { %v3573_v51 = vrot.slane %v3571_v28, 7  ;;  %4792 = vrot.lane.b32.xlu0 %v4750_v38, %s7414_s24  ;;  %v6667_v57 = vpack.c.bf16 %v3156_v63, %v3156_v63  ;;  %v4597_v26 = vshrl.u32 %v8674_v52, 16  ;;  %v4601_v7 = vrot.slane %v4599_v60, 1 }
 0x27c   : > { %v4606_v30 = vrot.slane %v4604_v37, 1  ;;  %v3594_v1 = vsel %vm7503_vm7, %v3586_v4, %v3593_v55  ;;  %v3774_v41 = vsel %vm7456_vm2, %v3595_v46, %v3773_v36  ;;  %v3154_v5 = vmax.f32 %v3122_v25, 0.0  ;;  %v3787_v46 = vld [vmem:[#allocation3 + $0xc8] sm:$0x1] }
 0x27d   : > { %v3576_v3 = vor.u32 %v3574_v45, %v3573_v51  ;;  %v3578_v53 = vrot.slane %v3573_v51, 4  ;;  %3772 = vst.msk [vmem:[#allocation3 + $0xac] sm:$0xf] %vm258_vm5, %v3594_v1  ;;  %3775 = vst [vmem:[#allocation3 + $0xb0] sm:$0x1] %v3774_v41  ;;  %v3614_v62 = vshrl.u32 %v6667_v57, 16  ;;  %v4602_v8 = vor.u32 %v4601_v7, %v4597_v26 }
 0x27e   : > { %v3617_v54 = vshll.u32 %v6667_v57, 16  ;;  %v4587_v39 = vshll.u32 %v8695_v43, 16  ;;  %v4592_v59 = vshll.u32 %v8697_v56, 16  ;;  %v6665_v16 = vpack.c.bf16 %v3154_v5, %v3154_v5  ;;  %v8741_v45 = vld [vmem:[#allocation3 + $0x74] ss:$0 sps:$4 sm:$0x11]  }
 0x27f   : > { %v3577_v11 = vsel %vm7503_vm7, %v3569_v29, %v3576_v3  ;;  %v3767_v24 = vsel %vm7456_vm2, %v3578_v53, %v3766_v49  ;;  %v8713_v61 = vrot.slane %v3614_v62, 7  ;;  %v4607_v17 = vsel %vm981_vm10, %v4602_v8, %v4606_v30  ;;  %v3780_v51 = vld [vmem:[#allocation3 + $0xbc] sm:$0x1]  ;;  %v8750_v30 = vld [vmem:[#allocation3 + $0x90] sm:$0xff]  }
 0x280   : > { %3765 = vst.msk [vmem:[#allocation3 + $0xa0] sm:$0xf] %vm258_vm5, %v3577_v11  ;;  %3768 = vst [vmem:[#allocation3 + $0xa4] sm:$0x1] %v3767_v24  ;;  %v3125_v20 = vadd.f32 %v7347_v31, %v8598_v58  ;;  %4718 = vrot.lane.b32.xlu1 %v4607_v17, %s7415_s25  ;;  %v4585_v15 = vshrl.u32 %v8695_v43, 16  ;;  %v4589_v9 = vrot.slane %v4587_v39, 1  ;;  %v3123_v35 = vadd.f32 %v7347_v31, %v8608_v14 }
 0x281   : > { %v4757_v2 = vrot.slane %v8674_v52, 1  ;;  %v3619_v34 = vor.u32 %v3617_v54, %v8713_v61  ;;  %v3597_v22 = vshrl.u32 %v6665_v16, 16  ;;  %v3600_v23 = vshll.u32 %v6665_v16, 16  ;;  %v8752_v1 = vld [vmem:[#allocation3 + $0x98] ss:$0 sps:$4 sm:$0x11]  }
 0x282   : > { %v4594_v4 = vrot.slane %v4592_v59, 1  ;;  %v4590_v6 = vor.u32 %v4589_v9, %v4585_v15  ;;  %v3157_v48 = vmax.f32 %v3125_v20, 0.0  ;;  %v3155_v29 = vmax.f32 %v3123_v35, 0.0  ;;  %v8757_v11 = vld [vmem:[#allocation3 + $0x84] sm:$0xff]  }
 0x283   : > { %v4758_v58 = vrot.slane %v8676_v32, 1  ;;  %v3784_v12 = vsel %vm7512_vm8, %v3619_v34, %v3783_v13  ;;  %v3599_v44 = vrot.slane %v3597_v22, 7  ;;  %v4754_v14 = vrot.slane %v8695_v43, 1  ;;  %v8736_v32 = vld [vmem:[#allocation3 + $0x6c] sm:$0xff]  }
 0x284   : > { %v4755_v52 = vrot.slane %v8697_v56, 1  ;;  %3785 = vst [vmem:[#allocation3 + $0xc0] sm:$0xf] %v3784_v12  ;;  %v4595_v36 = vsel %vm981_vm10, %v4590_v6, %v4594_v4  ;;  %v6668_v47 = vpack.c.bf16 %v3157_v48, %v3157_v48  ;;  %v6666_v18 = vpack.c.bf16 %v3155_v29, %v3155_v29  ;;  %v8759_v24 = vld [vmem:[#allocation3 + $0x8c] ss:$0 sps:$4 sm:$0x11]  }
 0x285   : > { %v4759_v40 = vsel %vm1206_vm9, %v4757_v2, %v4758_v58  ;;  %v3620_v42 = vrot.slane %v8713_v61, 4  ;;  %v3602_v10 = vor.u32 %v3600_v23, %v3599_v44  ;;  %v3603_v28 = vrot.slane %v3599_v44, 4  ;;  %4716 = vrot.lane.b32.xlu0 %v4595_v36, %s7415_s25  ;;  %v8770_v20 = vld [vmem:[#allocation3 + $0xa8] sm:$0xff]   ;;  %v8784_v23 = vld [vmem:[%s9516_s3 + $0x8] sm:$0x3f]  }
 0x286   : > { %4798 = vrot.lane.b32.xlu1 %v4759_v40, %s7414_s24  ;;  %v3622_v49 = vshrl.u32 %v6668_v47, 16  ;;  %v3605_v38 = vshrl.u32 %v6666_v18, 16  ;;  %v4756_v63 = vsel %vm1206_vm9, %v4754_v14, %v4755_v52  ;;  %v4621_v60 = vshrl.u32 %v8726_v50, 16  ;;  %v8791_v58 = vld [vmem:[#allocation3 + $0xb0] ss:$0 sps:$4 sm:$0x11]   ;;  %7106 = vmatprep.subr.msk.bf16.mxu1 %vm1940_vm12, %v8784_v23 }
 0x287   : > { %v3777_v37 = vsel %vm7512_vm8, %v3602_v10, %v3776_v21  ;;  %v3625_v55 = vshll.u32 %v6668_v47, 16  ;;  %v4623_v25 = vshll.u32 %v8726_v50, 16  ;;  %v4628_v43 = vshll.u32 %v8732_v19, 16  ;;  %v7246_v47 = vld [vmem:[#allocation3 + $0xa4] ss:$0 sps:$4 sm:$0x11]  }
 0x288   : > { %3778 = vst [vmem:[#allocation3 + $0xb4] sm:$0xf] %v3777_v37  ;;  %v3624_v56 = vrot.slane %v3622_v49, 7  ;;  %v3607_v57 = vrot.slane %v3605_v38, 7  ;;  %v3608_v26 = vshll.u32 %v6666_v18, 16  ;;  %v4611_v7 = vshll.u32 %v8736_v32, 16 }
 0x289   : > { %4796 = vrot.lane.b32.xlu0 %v4756_v63, %s7414_s24  ;;  %v4625_v33 = vrot.slane %v4623_v25, 1  ;;  %v4630_v41 = vrot.slane %v4628_v43, 1  ;;  %v4609_v3 = vshrl.u32 %v8736_v32, 16  ;;  %v4616_v53 = vshll.u32 %v8741_v45, 16 }
 0x28a   : > { %v3627_v62 = vor.u32 %v3625_v55, %v3624_v56  ;;  %v3629_v54 = vrot.slane %v3624_v56, 4  ;;  %v3610_v8 = vor.u32 %v3608_v26, %v3607_v57  ;;  %v3612_v5 = vrot.slane %v3607_v57, 4 }
 0x28b   : > { %v4626_v39 = vor.u32 %v4625_v33, %v4621_v60  ;;  %v4613_v59 = vrot.slane %v4611_v7, 1  ;;  %v4763_v61 = vrot.slane %v8726_v50, 1  ;;  %v4618_v35 = vrot.slane %v4616_v53, 1  ;;  %v8793_v50 = vld [vmem:[#allocation3 + $0x9c] sm:$0xff]  }
 0x28c   : > { %v3628_v13 = vsel %vm7503_vm7, %v3620_v42, %v3627_v62  ;;  %v3788_v17 = vsel %vm7456_vm2, %v3629_v54, %v3787_v46  ;;  %v3611_v16 = vsel %vm7503_vm7, %v3603_v28, %v3610_v8  ;;  %v3781_v31 = vsel %vm7456_vm2, %v3612_v5, %v3780_v51 }
 0x28d   : > { %3786 = vst.msk [vmem:[#allocation3 + $0xc4] sm:$0xf] %vm258_vm5, %v3628_v13  ;;  %3789 = vst [vmem:[#allocation3 + $0xc8] sm:$0x1] %v3788_v17  ;;  %v4631_v15 = vsel %vm981_vm10, %v4626_v39, %v4630_v41  ;;  %v4614_v9 = vor.u32 %v4613_v59, %v4609_v3  ;;  %v4764_v2 = vrot.slane %v8732_v19, 1  ;;  %v4760_v27 = vrot.slane %v8736_v32, 1 }
 0x28e   : > { %3779 = vst.msk [vmem:[#allocation3 + $0xb8] sm:$0xf] %vm258_vm5, %v3611_v16  ;;  %3782 = vst [vmem:[#allocation3 + $0xbc] sm:$0x1] %v3781_v31  ;;  %4722 = vrot.lane.b32.xlu1 %v4631_v15, %s7415_s25  ;;  %v4761_v0 = vrot.slane %v8741_v45, 1  ;;  %v4647_v34 = vshll.u32 %v8750_v30, 16 }
 0x28f   : > { %v4652_v22 = vshll.u32 %v8752_v1, 16  ;;  %v4619_v4 = vsel %vm981_vm10, %v4614_v9, %v4618_v35  ;;  %v4635_v21 = vshll.u32 %v8757_v11, 16  ;;  %v4640_v6 = vshll.u32 %v8759_v24, 16  ;;  %v8832_v17 = vld [vmem:[#allocation3 + $0xc] sm:$0xff]  }
 0x290   : > { %4720 = vrot.lane.b32.xlu0 %v4619_v4, %s7415_s25  ;;  %v4645_v48 = vshrl.u32 %v8750_v30, 16  ;;  %v4649_v29 = vrot.slane %v4647_v34, 1  ;;  %v4765_v12 = vsel %vm1206_vm9, %v4763_v61, %v4764_v2  ;;  %v4633_v44 = vshrl.u32 %v8757_v11, 16 }
 0x291   : > { %v4637_v14 = vrot.slane %v4635_v21, 1  ;;  %v4654_v19 = vrot.slane %v4652_v22, 1  ;;  %v4671_v36 = vshll.u32 %v8770_v20, 16  ;;  %v4762_v18 = vsel %vm1206_vm9, %v4760_v27, %v4761_v0  ;;  %v7254_v22 = vld [vmem:[#allocation3 + $0x8] ss:$0 sps:$4 sm:$0x11]  }
 0x292   : > { %4802 = vrot.lane.b32.xlu1 %v4765_v12, %s7414_s24  ;;  %v4650_v52 = vor.u32 %v4649_v29, %v4645_v48  ;;  %v4642_v32 = vrot.slane %v4640_v6, 1  ;;  %v4676_v28 = vshll.u32 %v8791_v58, 16  ;;  %v4659_v45 = vshll.u32 %v8793_v50, 16  ;;  %v7252_v48 = vld [vmem:[#allocation3 + $0x14] ss:$0 sps:$4 sm:$0x11]  }
 0x293   : > { %v4638_v40 = vor.u32 %v4637_v14, %v4633_v44  ;;  %v4673_v10 = vrot.slane %v4671_v36, 1  ;;  %v4769_v63 = vrot.slane %v8750_v30, 1  ;;  %v4770_v60 = vrot.slane %v8752_v1, 1  ;;  %v8851_v36 = vld [vmem:[#allocation3 + $0x18] sm:$0xff]  }
 0x294   : > { %4800 = vrot.lane.b32.xlu0 %v4762_v18, %s7414_s24  ;;  %v4655_v42 = vsel %vm981_vm10, %v4650_v52, %v4654_v19  ;;  %v8806_v49 = vld [vmem:[#allocation3 + $0xc0] sm:$0xff]   ;;  %v4669_v37 = vshrl.u32 %v8770_v20, 16  ;;  %v4766_v46 = vrot.slane %v8757_v11, 1  ;;  %v4767_v51 = vrot.slane %v8759_v24, 1 }
 0x295   : > { %v4643_v38 = vsel %vm981_vm10, %v4638_v40, %v4642_v32  ;;  %v8812_v55 = vld [vmem:[#allocation3 + $0xb4] sm:$0xff]   ;;  %v4661_v25 = vrot.slane %v4659_v45, 1  ;;  %v4657_v56 = vshrl.u32 %v8793_v50, 16  ;;  %v4664_v57 = vshll.u32 %v7246_v47, 16  ;;  %v8828_v24 = vld [vmem:[#allocation3] sm:$0xff]  }
 0x296   : > { %4726 = vrot.lane.b32.xlu1 %v4655_v42, %s7415_s25  ;;  %v4674_v43 = vor.u32 %v4673_v10, %v4669_v37  ;;  %v4695_v26 = vshll.u32 %v8806_v49, 16  ;;  %v4678_v7 = vrot.slane %v4676_v28, 1  ;;  %v4771_v30 = vsel %vm1206_vm9, %v4769_v63, %v4770_v60  ;;  %v7248_v33 = vld [vmem:[#allocation3 + $0xc8] ss:$0 sps:$4 sm:$0x11]  }
 0x297   : > { %v4662_v1 = vor.u32 %v4661_v25, %v4657_v56  ;;  %v4683_v41 = vshll.u32 %v8812_v55, 16  ;;  %v4768_v3 = vsel %vm1206_vm9, %v4766_v46, %v4767_v51  ;;  %v4666_v62 = vrot.slane %v4664_v57, 1  ;;  %v7250_v8 = vld [vmem:[#allocation3 + $0xbc] ss:$0 sps:$4 sm:$0x11]   ;;  %v8848_v19 = vld [vmem:[#allocation3 + $0x24] sm:$0xff]  }
 0x298   : > { %4724 = vrot.lane.b32.xlu0 %v4643_v38, %s7415_s25  ;;  %v4679_v53 = vsel %vm981_vm10, %v4674_v43, %v4678_v7  ;;  %v4697_v54 = vrot.slane %v4695_v26, 1  ;;  %v4775_v5 = vrot.slane %v8770_v20, 1  ;;  %v4776_v11 = vrot.slane %v8791_v58, 1  ;;  %v7256_v38 = vld [vmem:[#allocation3 + $0x2c] ss:$0 sps:$4 sm:$0x11]  }
 0x299   : > { %v4667_v39 = vsel %vm981_vm10, %v4662_v1, %v4666_v62  ;;  %v4693_v59 = vshrl.u32 %v8806_v49, 16  ;;  %v4700_v61 = vshll.u32 %v7248_v33, 16  ;;  %v4685_v13 = vrot.slane %v4683_v41, 1  ;;  %v8866_v7 = vld [vmem:[#allocation3 + $0x3c] sm:$0xff]   ;;  %v8870_v41 = vld [vmem:[#allocation3 + $0x30] sm:$0xff]  }
 0x29a   : > { %4806 = vrot.lane.b32.xlu1 %v4771_v30, %s7414_s24  ;;  %v4772_v16 = vrot.slane %v8793_v50, 1  ;;  %v4773_v31 = vrot.slane %v7246_v47, 1  ;;  %v4681_v20 = vshrl.u32 %v8812_v55, 16  ;;  %v4688_v9 = vshll.u32 %v7250_v8, 16 }
 0x29b   : > { %v4698_v15 = vor.u32 %v4697_v54, %v4693_v59  ;;  %v3969_v35 = vshll.u32 %v8828_v24, 16  ;;  %v4777_v2 = vsel %vm1206_vm9, %v4775_v5, %v4776_v11  ;;  %v4702_v27 = vrot.slane %v4700_v61, 1  ;;  %v7260_v11 = vld [vmem:[#allocation3 + $0x44] ss:$0 sps:$4 sm:$0x11]  }
 0x29c   : > { %4804 = vrot.lane.b32.xlu0 %v4768_v3, %s7414_s24  ;;  %v4686_v0 = vor.u32 %v4685_v13, %v4681_v20  ;;  %v3981_v34 = vshll.u32 %v8832_v17, 16  ;;  %v4774_v4 = vsel %vm1206_vm9, %v4772_v16, %v4773_v31  ;;  %v4690_v6 = vrot.slane %v4688_v9, 1  ;;  %v8882_v20 = vld [vmem:[#allocation3 + $0x54] sm:$0xff]  }
 0x29d   : > { %v4703_v21 = vsel %vm981_vm10, %v4698_v15, %v4702_v27  ;;  %v4781_v29 = vrot.slane %v8806_v49, 1  ;;  %v4782_v58 = vrot.slane %v7248_v33, 1  ;;  %v3967_v50 = vshrl.u32 %v8828_v24, 16  ;;  %v7262_v15 = vld [vmem:[#allocation3 + $0x38] ss:$0 sps:$4 sm:$0x11]  }
 0x29e   : > { %4730 = vrot.lane.b32.xlu1 %v4679_v53, %s7415_s25  ;;  %v4691_v12 = vsel %vm981_vm10, %v4686_v0, %v4690_v6  ;;  %v3983_v44 = vrot.slane %v3981_v34, 1  ;;  %v3971_v14 = vrot.slane %v3969_v35, 1  ;;  %v3974_v52 = vshll.u32 %v7254_v22, 16 }
 0x29f   : > { %v4778_v47 = vrot.slane %v8812_v55, 1  ;;  %v4779_v18 = vrot.slane %v7250_v8, 1  ;;  %v3979_v40 = vshrl.u32 %v8832_v17, 16  ;;  %v3986_v32 = vshll.u32 %v7252_v48, 16 }
 0x2a0   : > { %4728 = vrot.lane.b32.xlu0 %v4667_v39, %s7415_s25  ;;  %v4783_v42 = vsel %vm1206_vm9, %v4781_v29, %v4782_v58  ;;  %v3972_v28 = vor.u32 %v3971_v14, %v3967_v50  ;;  %v3976_v45 = vrot.slane %v3974_v52, 1  ;;  %v4005_v49 = vshll.u32 %v8848_v19, 16  ;;  %v7258_v55 = vld [vmem:[#allocation3 + $0x20] ss:$0 sps:$4 sm:$0x11]  }
 0x2a1   : > { %v3984_v10 = vor.u32 %v3983_v44, %v3979_v40  ;;  %v4780_v63 = vsel %vm1206_vm9, %v4778_v47, %v4779_v18  ;;  %v3988_v60 = vrot.slane %v3986_v32, 1  ;;  %v4193_v37 = vrot.slane %v8832_v17, 1  ;;  %v7264_v58 = vld [vmem:[#allocation3 + $0x5c] ss:$0 sps:$4 sm:$0x11]   ;;  %v8899_v47 = vld [vmem:[#allocation3 + $0x6c] sm:$0xff]  }
 0x2a2   : > { %4810 = vrot.lane.b32.xlu1 %v4777_v2, %s7414_s24  ;;  %v3993_v46 = vshll.u32 %v8851_v36, 16  ;;  %v4194_v51 = vrot.slane %v7252_v48, 1  ;;  %v4190_v25 = vrot.slane %v8828_v24, 1  ;;  %v3977_v56 = vsel %vm981_vm10, %v3972_v28, %v3976_v45  ;;  %v7266_v14 = vld [vmem:[#allocation3 + $0x50] ss:$0 sps:$4 sm:$0x11]  }
 0x2a3   : > { %v3989_v43 = vsel %vm981_vm10, %v3984_v10, %v3988_v60  ;;  %v4191_v57 = vrot.slane %v7254_v22, 1  ;;  %v4007_v26 = vrot.slane %v4005_v49, 1  ;;  %v4003_v30 = vshrl.u32 %v8848_v19, 16  ;;  %v8888_v22 = vld [vmem:[#allocation3 + $0x48] sm:$0xff]   ;;  %v8911_v60 = vld [vmem:[#allocation3 + $0x60] sm:$0xff]  }
 0x2a4   : > { %4808 = vrot.lane.b32.xlu0 %v4774_v4, %s7414_s24  ;;  %v4010_v1 = vshll.u32 %v7256_v38, 16  ;;  %v3995_v33 = vrot.slane %v3993_v46, 1  ;;  %v4195_v3 = vsel %vm1206_vm9, %v4193_v37, %v4194_v51  ;;  %v3991_v53 = vshrl.u32 %v8851_v36, 16 }
 0x2a5   : > { %v4192_v62 = vsel %vm1206_vm9, %v4190_v25, %v4191_v57  ;;  %v4008_v54 = vor.u32 %v4007_v26, %v4003_v30  ;;  %v3998_v8 = vshll.u32 %v7258_v55, 16  ;;  %v4029_v5 = vshll.u32 %v8866_v7, 16 }
 0x2a6   : > { %4734 = vrot.lane.b32.xlu1 %v4703_v21, %s7415_s25  ;;  %v4012_v24 = vrot.slane %v4010_v1, 1  ;;  %v3996_v39 = vor.u32 %v3995_v33, %v3991_v53  ;;  %v4017_v59 = vshll.u32 %v8870_v41, 16  ;;  %v4199_v61 = vrot.slane %v8848_v19, 1 }
 0x2a7   : > { %v4200_v13 = vrot.slane %v7256_v38, 1  ;;  %v4000_v16 = vrot.slane %v3998_v8, 1  ;;  %v4031_v31 = vrot.slane %v4029_v5, 1  ;;  %v4196_v9 = vrot.slane %v8851_v36, 1 }
 0x2a8   : > { %4732 = vrot.lane.b32.xlu0 %v4691_v12, %s7415_s25  ;;  %v4013_v17 = vsel %vm981_vm10, %v4008_v54, %v4012_v24  ;;  %v4197_v35 = vrot.slane %v7258_v55, 1  ;;  %v4027_v27 = vshrl.u32 %v8866_v7, 16  ;;  %v4034_v0 = vshll.u32 %v7260_v11, 16 }
 0x2a9   : > { %v4001_v2 = vsel %vm981_vm10, %v3996_v39, %v4000_v16  ;;  %v4019_v34 = vrot.slane %v4017_v59, 1  ;;  %v4201_v4 = vsel %vm1206_vm9, %v4199_v61, %v4200_v13  ;;  %v4015_v6 = vshrl.u32 %v8870_v41, 16 }
 0x2aa   : > { %4814 = vrot.lane.b32.xlu1 %v4783_v42, %s7414_s24  ;;  %v4032_v21 = vor.u32 %v4031_v31, %v4027_v27  ;;  %v4022_v48 = vshll.u32 %v7262_v15, 16  ;;  %v4053_v29 = vshll.u32 %v8882_v20, 16  ;;  %v4198_v50 = vsel %vm1206_vm9, %v4196_v9, %v4197_v35  ;;  %v8905_v42 = vld [vmem:[%s9516_s3] sm:$0x3f]  }
 0x2ab   : > { %v4036_v12 = vrot.slane %v4034_v0, 1  ;;  %v4020_v44 = vor.u32 %v4019_v34, %v4015_v6  ;;  %v4041_v52 = vshll.u32 %v8888_v22, 16  ;;  %v4205_v19 = vrot.slane %v8866_v7, 1  ;;  %v8923_v7 = vld [vmem:[#allocation3 + $0x68] ss:$0 sps:$4 sm:$0x11]  }
 0x2ac   : > { %4812 = vrot.lane.b32.xlu0 %v4780_v63, %s7414_s24  ;;  %v4206_v36 = vrot.slane %v7260_v11, 1  ;;  %v4024_v40 = vrot.slane %v4022_v48, 1  ;;  %v4055_v32 = vrot.slane %v4053_v29, 1  ;;  %v4202_v10 = vrot.slane %v8870_v41, 1  ;;  %v8934_v11 = vld [vmem:[#allocation3 + $0x78] sm:$0xff]  }
 0x2ad   : > { %v4037_v18 = vsel %vm981_vm10, %v4032_v21, %v4036_v12  ;;  %v4203_v28 = vrot.slane %v7262_v15, 1  ;;  %v4051_v45 = vshrl.u32 %v8882_v20, 16  ;;  %v4058_v38 = vshll.u32 %v7264_v58, 16  ;;  %v8941_v15 = vld [vmem:[#allocation3 + $0x8c] ss:$0 sps:$4 sm:$0x11]  }
 0x2ae   : > { %4160 = vrot.lane.b32.xlu1 %v3989_v43, %s7415_s25  ;;  %v4025_v49 = vsel %vm981_vm10, %v4020_v44, %v4024_v40  ;;  %v4043_v63 = vrot.slane %v4041_v52, 1  ;;  %v4921_v37 = vsel %vm1940_vm12, %v8784_v23, 0  ;;  %v4207_v55 = vsel %vm1206_vm9, %v4205_v19, %v4206_v36  ;;  %v7274_v48 = vld [vmem:[#allocation3 + $0x80] ss:$0 sps:$4 sm:$0x11]  }
 0x2af   : > { %6874 = vmatpush3.bf16.msra.mxu1 %v4921_v37  ;;  %v4056_v46 = vor.u32 %v4055_v32, %v4051_v45  ;;  %v4039_v51 = vshrl.u32 %v8888_v22, 16  ;;  %v4046_v25 = vshll.u32 %v7266_v14, 16  ;;  %v4077_v43 = vshll.u32 %v8899_v47, 16  ;;  %v8950_v29 = vld [vmem:[#allocation3 + $0x9c] sm:$0xff]  }
 0x2b0   : > { %4158 = vrot.lane.b32.xlu0 %v3977_v56, %s7415_s25  ;;  %7107 = vmatprep.subr.msk.bf16.mxu1 %vm1940_vm12, %v8905_v42  ;;  %v7268_v56 = vld [vmem:[#allocation3 + $0x74] ss:$0 sps:$4 sm:$0x11]   ;;  %v4204_v57 = vsel %vm1206_vm9, %v4202_v10, %v4203_v28  ;;  %v4060_v23 = vrot.slane %v4058_v38, 1  ;;  %v4065_v30 = vshll.u32 %v8911_v60, 16  ;;  %v4211_v1 = vrot.slane %v8882_v20, 1 }
 0x2b1   : > { %v4044_v26 = vor.u32 %v4043_v63, %v4039_v51  ;;  %v4212_v33 = vrot.slane %v7264_v58, 1  ;;  %v4079_v53 = vrot.slane %v4077_v43, 1  ;;  %v4208_v54 = vrot.slane %v8888_v22, 1  ;;  %v7349_v28 = vld [vmem:[#allocation3 + $0x18] sm:$0xff]  }
 0x2b2   : > { %4240 = vrot.lane.b32.xlu1 %v4195_v3, %s7414_s24  ;;  %v4061_v41 = vsel %vm981_vm10, %v4056_v46, %v4060_v23  ;;  %v4048_v3 = vrot.slane %v4046_v25, 1  ;;  %v4209_v8 = vrot.slane %v7266_v14, 1  ;;  %v4075_v5 = vshrl.u32 %v8899_v47, 16  ;;  %v8971_v63 = vld [vmem:[%s9516_s3 + $0x10] sm:$0x3f]  }
 0x2b3   : > { %v4082_v39 = vshll.u32 %v7268_v56, 16  ;;  %v4067_v59 = vrot.slane %v4065_v30, 1  ;;  %v4213_v61 = vsel %vm1206_vm9, %v4211_v1, %v4212_v33  ;;  %v4063_v16 = vshrl.u32 %v8911_v60, 16  ;;  %v7278_v33 = vld [vmem:[#allocation3 + $0x98] ss:$0 sps:$4 sm:$0x11]  }
 0x2b4   : > { %4238 = vrot.lane.b32.xlu0 %v4192_v62, %s7414_s24  ;;  %v8929_v62 = vld [vmem:[#allocation3 + $0x84] sm:$0xff]   ;;  %v4049_v24 = vsel %vm981_vm10, %v4044_v26, %v4048_v3  ;;  %v4070_v31 = vshll.u32 %v8923_v7, 16  ;;  %v4217_v9 = vrot.slane %v8899_v47, 1  ;;  %v4218_v35 = vrot.slane %v7268_v56, 1  ;;  %v8959_v47 = vld [vmem:[#allocation3 + $0x90] sm:$0xff]  }
 0x2b5   : > { %v4101_v20 = vshll.u32 %v8929_v62, 16  ;;  %v4084_v27 = vrot.slane %v4082_v39, 1  ;;  %v4068_v0 = vor.u32 %v4067_v59, %v4063_v16  ;;  %v4089_v34 = vshll.u32 %v8934_v11, 16  ;;  %v7276_v56 = vld [vmem:[#allocation3 + $0xa4] ss:$0 sps:$4 sm:$0x11]  }
 0x2b6   : > { %4164 = vrot.lane.b32.xlu1 %v4013_v17, %s7415_s25  ;;  %v4080_v17 = vor.u32 %v4079_v53, %v4075_v5  ;;  %v4072_v21 = vrot.slane %v4070_v31, 1  ;;  %v4219_v58 = vsel %vm1206_vm9, %v4217_v9, %v4218_v35  ;;  %v4215_v12 = vrot.slane %v8923_v7, 1  ;;  %v8992_v39 = vld [vmem:[#allocation3 + $0xa8] sm:$0xff]   ;;  %v7281_v35 = vld [vmem:[#allocation3 + $0xbc] ss:$0 sps:$4 sm:$0x11]  }
 0x2b7   : > { %v4103_v6 = vrot.slane %v4101_v20, 1  ;;  %v4099_v44 = vshrl.u32 %v8929_v62, 16  ;;  %v4106_v19 = vshll.u32 %v8941_v15, 16  ;;  %v4091_v36 = vrot.slane %v4089_v34, 1 }
 0x2b8   : > { %4162 = vrot.lane.b32.xlu0 %v4001_v2, %s7415_s25  ;;  %v4210_v2 = vsel %vm1206_vm9, %v4208_v54, %v4209_v8  ;;  %v4073_v52 = vsel %vm981_vm10, %v4068_v0, %v4072_v21  ;;  %v4087_v10 = vshrl.u32 %v8934_v11, 16  ;;  %v5122_v38 = vsel %vm1940_vm12, %v8905_v42, 0 }
 0x2b9   : > { %v4104_v37 = vor.u32 %v4103_v6, %v4099_v44  ;;  %v4125_v46 = vshll.u32 %v8950_v29, 16  ;;  %v4108_v42 = vrot.slane %v4106_v19, 1  ;;  %v4223_v23 = vrot.slane %v8929_v62, 1  ;;  %v7284_v6 = vld [vmem:[#allocation3 + $0xb0] ss:$0 sps:$4 sm:$0x11]  }
 0x2ba   : > { %4244 = vrot.lane.b32.xlu1 %v4201_v4, %s7414_s24  ;;  %v4085_v4 = vsel %vm981_vm10, %v4080_v17, %v4084_v27  ;;  %v4092_v43 = vor.u32 %v4091_v36, %v4087_v10  ;;  %v4224_v26 = vrot.slane %v8941_v15, 1  ;;  %v4220_v3 = vrot.slane %v8934_v11, 1  ;;  %v7350_v36 = vld [vmem:[#allocation3 + $0x24] sm:$0xff]  }
 0x2bb   : > { %v4109_v7 = vsel %vm981_vm10, %v4104_v37, %v4108_v42  ;;  %v4127_v1 = vrot.slane %v4125_v46, 1  ;;  %v4221_v53 = vrot.slane %v7274_v48, 1  ;;  %v4123_v8 = vshrl.u32 %v8950_v29, 16 }
 0x2bc   : > { %4242 = vrot.lane.b32.xlu0 %v4198_v50, %s7414_s24  ;;  %v4214_v50 = vrot.slane %v8911_v60, 1  ;;  %v4130_v5 = vshll.u32 %v7276_v56, 16  ;;  %v4225_v59 = vsel %vm1206_vm9, %v4223_v23, %v4224_v26  ;;  %v4111_v17 = vshrl.u32 %v8959_v47, 16  ;;  %v9027_v26 = vld [vmem:[#allocation3 + $0x20] ss:$0 sps:$4 sm:$0x11]  }
 0x2bd   : > { %v4118_v16 = vshll.u32 %v7278_v33, 16  ;;  %v4222_v15 = vsel %vm1206_vm9, %v4220_v3, %v4221_v53  ;;  %v4229_v0 = vrot.slane %v8950_v29, 1  ;;  %v4230_v34 = vrot.slane %v7276_v56, 1  ;;  %v7286_v56 = vld [vmem:[#allocation3 + $0x2c] ss:$0 sps:$4 sm:$0x11]  }
 0x2be   : > { %4168 = vrot.lane.b32.xlu1 %v4037_v18, %s7415_s25  ;;  %v7348_v18 = vld [vmem:[#allocation3 + $0xc] sm:$0xff]   ;;  %v4216_v25 = vsel %vm1206_vm9, %v4214_v50, %v4215_v12  ;;  %v4132_v20 = vrot.slane %v4130_v5, 1  ;;  %v4227_v50 = vrot.slane %v7278_v33, 1  ;;  %v9030_v3 = vld [vmem:[#allocation3 + $0x3c] sm:$0xff]   ;;  %v4232_v53 = vrot.slane %v8992_v39, 1 }
 0x2bf   : > { %v4231_v10 = vsel %vm1206_vm9, %v4229_v0, %v4230_v34  ;;  %v7290_v0 = vld [vmem:[#allocation3 + $0x44] ss:$0 sps:$4 sm:$0x11]  }
 0x2c0   : > { %4166 = vrot.lane.b32.xlu0 %v4025_v49, %s7415_s25 }
 0x2c2   : > { %4248 = vrot.lane.b32.xlu1 %v4207_v55, %s7414_s24  ;;  %v4094_v55 = vshll.u32 %v7274_v48, 16  ;;  %v9004_v48 = vld [vmem:[#allocation3 + $0x24] sm:$0xff]  }
 0x2c4   : > { %4246 = vrot.lane.b32.xlu0 %v4204_v57, %s7414_s24  ;;  %v4113_v57 = vshll.u32 %v8959_v47, 16  ;;  %v4096_v30 = vrot.slane %v4094_v55, 1  ;;  %v4142_v55 = vshll.u32 %v7284_v6, 16 }
 0x2c6   : > { %4172 = vrot.lane.b32.xlu1 %v4061_v41, %s7415_s25  ;;  %v8986_v41 = vld [vmem:[#allocation3 + $0xb4] sm:$0xff]   ;;  %v4097_v54 = vsel %vm981_vm10, %v4092_v43, %v4096_v30  ;;  %v4144_v30 = vrot.slane %v4142_v55, 1 }
 0x2c7   : > { %v4707_v13 = vpop.permute.xlu1 %4706  ;;  %v4149_v31 = vshll.u32 %v8986_v41, 16  ;;  %v4147_v12 = vshrl.u32 %v8986_v41, 16  ;;  %v4235_v23 = vrot.slane %v8986_v41, 1 }
 0x2c8   : > { %4170 = vrot.lane.b32.xlu0 %v4049_v24, %s7415_s25  ;;  %v4819_v45 = vsel %vm1287_vm11, %v7349_v28, %v4707_v13  ;;  %v4115_v24 = vrot.slane %v4113_v57, 1  ;;  %v4128_v13 = vor.u32 %v4127_v1, %v4123_v8  ;;  %v4135_v28 = vshrl.u32 %v8992_v39, 16 }
 0x2c9   : > { %v4151_v21 = vrot.slane %v4149_v31, 1  ;;  %v4236_v1 = vrot.slane %v7281_v35, 1 }
 0x2ca   : > { %4252 = vrot.lane.b32.xlu1 %v4213_v61, %s7414_s24  ;;  %v4116_v9 = vor.u32 %v4115_v24, %v4111_v17  ;;  %v5475_v24 = vshrl.u32 %v9004_v48, 16  ;;  %v5470_v17 = vshll.u32 %v9027_v26, 16 }
 0x2cb   : > { %v4152_v37 = vor.u32 %v4151_v21, %v4147_v12  ;;  %v5690_v21 = vrot.slane %v7286_v56, 1 }
 0x2cc   : > { %v4705_v22 = vpop.permute.xlu0 %4704  ;;  %4250 = vrot.lane.b32.xlu0 %v4210_v2, %s7414_s24  ;;  %v4787_v14 = vpop.permute.xlu1 %4786  ;;  %v4137_v2 = vshll.u32 %v8992_v39, 16 }
 0x2cd   : > { %v4817_v40 = vsel %vm1287_vm11, %v7348_v18, %v4705_v22  ;;  %v4851_v51 = vsel %vm1320_vm13, %v4819_v45, %v4787_v14  ;;  %v4133_v22 = vsel %vm981_vm10, %v4128_v13, %v4132_v20  ;;  %v7351_v45 = vld [vmem:[#allocation3 + $0x30] sm:$0xff]  }
 0x2ce   : > { %4176 = vrot.lane.b32.xlu1 %v4085_v4, %s7415_s25  ;;  %v4120_v4 = vrot.slane %v4118_v16, 1  ;;  %v4139_v19 = vrot.slane %v4137_v2, 1  ;;  %v9036_v13 = vld [vmem:[#allocation3 + $0x30] sm:$0xff]   ;;  %v4237_v16 = vsel %vm1206_vm9, %v4235_v23, %v4236_v1 }
 0x2cf   : > { %v5489_v34 = vshll.u32 %v9036_v13, 16 }
 0x2d0   : > { %v4785_v32 = vpop.permute.xlu0 %4784  ;;  %4174 = vrot.lane.b32.xlu0 %v4073_v52, %s7415_s25  ;;  %v4121_v14 = vsel %vm981_vm10, %v4116_v9, %v4120_v4  ;;  %v4154_v52 = vshll.u32 %v7281_v35, 16  ;;  %v4140_v43 = vor.u32 %v4139_v19, %v4135_v28  ;;  %v5501_v9 = vshll.u32 %v9030_v3, 16  ;;  %v7292_v19 = vld [vmem:[#allocation3 + $0x38] ss:$0 sps:$4 sm:$0x11]  }
 0x2d1   : > { %v4849_v49 = vsel %vm1320_vm13, %v4817_v40, %v4785_v32  ;;  %v9011_v32 = vld [vmem:[#allocation3 + $0x18] sm:$0xff]   ;;  %v5689_v4 = vrot.slane %v9004_v48, 1  ;;  %v5491_v55 = vrot.slane %v5489_v34, 1 }
 0x2d2   : > { %6875 = vmatprep.mubr.msk.bf16.mxu1 %vm1907_vm14, %v4849_v49  ;;  %4256 = vrot.lane.b32.xlu1 %v4219_v58, %s7414_s24  ;;  %v4226_v58 = vrot.slane %v8959_v47, 1  ;;  %v4156_v42 = vrot.slane %v4154_v52, 1  ;;  %v5465_v57 = vshll.u32 %v9011_v32, 16  ;;  %v4145_v5 = vsel %vm981_vm10, %v4140_v43, %v4144_v30 }
 0x2d3   : > { %6876 = vmatmul.mubr.msk.bf16.vlgmr.msra.gmra.mrb[0].mxu1 %vm1907_vm14, %v4851_v51  ;;  %v5477_v51 = vshll.u32 %v9004_v48, 16  ;;  %v5503_v52 = vrot.slane %v5501_v9, 1  ;;  %v5494_v43 = vshll.u32 %v7292_v19, 16 }
 0x2d4   : > { %6908 = vmatpush3.bf16.msra.mxu1 %v5122_v38  ;;  %4254 = vrot.lane.b32.xlu0 %v4216_v25, %s7414_s24  ;;  %v4228_v25 = vsel %vm1206_vm9, %v4226_v58, %v4227_v50  ;;  %v7352_v50 = vld [vmem:[#allocation3 + $0x3c] sm:$0xff]  }
 0x2d5   : > { %7108 = vmatprep.subr.msk.bf16.mxu1 %vm1940_vm12, %v8971_v63  ;;  %v5479_v33 = vrot.slane %v5477_v51, 1  ;;  %v5691_v51 = vsel %vm1206_vm9, %v5689_v4, %v5690_v21 }
 0x2d6   : > { %4180 = vrot.lane.b32.xlu1 %v4109_v7, %s7415_s25  ;;  %v4711_v61 = vpop.permute.xlu1 %4710  ;;  %v4157_v7 = vsel %vm981_vm10, %v4152_v37, %v4156_v42  ;;  %v5506_v37 = vshll.u32 %v7290_v0, 16  ;;  %v5487_v42 = vshrl.u32 %v9036_v13, 16 }
 0x2d7   : > { %v4823_v49 = vsel %vm1287_vm11, %v7351_v45, %v4711_v61  ;;  %v5467_v61 = vrot.slane %v5465_v57, 1  ;;  %v5480_v31 = vor.u32 %v5479_v33, %v5475_v24  ;;  %v5499_v45 = vshrl.u32 %v9030_v3, 16  ;;  %v7296_v24 = vld [vmem:[#allocation3 + $0x50] ss:$0 sps:$4 sm:$0x11]  }
 0x2d8   : > { %4178 = vrot.lane.b32.xlu0 %v4097_v54, %s7415_s25  ;;  %v4233_v54 = vrot.slane %v7284_v6, 1  ;;  %v5508_v23 = vrot.slane %v5506_v37, 1  ;;  %v5695_v33 = vrot.slane %v9030_v3, 1  ;;  %v5518_v34 = vshll.u32 %v7296_v24, 16 }
 0x2da   : > { %4260 = vrot.lane.b32.xlu1 %v4225_v59, %s7414_s24  ;;  %v5482_v59 = vshll.u32 %v7286_v56, 16  ;;  %v4234_v35 = vsel %vm1206_vm9, %v4232_v53, %v4233_v54  ;;  %v5696_v53 = vrot.slane %v7290_v0, 1 }
 0x2db   : > { %v4709_v27 = vpop.permute.xlu0 %4708  ;;  %v4791_v44 = vpop.permute.xlu1 %4790 }
 0x2dc   : > { %4258 = vrot.lane.b32.xlu0 %v4222_v15, %s7414_s24  ;;  %v4821_v18 = vsel %vm1287_vm11, %v7350_v36, %v4709_v27  ;;  %v4855_v46 = vsel %vm1320_vm13, %v4823_v49, %v4791_v44  ;;  %v5463_v15 = vshrl.u32 %v9011_v32, 16  ;;  %v5484_v2 = vrot.slane %v5482_v59, 1  ;;  %v9051_v36 = vld [vmem:[#allocation3 + $0x54] sm:$0xff]   ;;  %v9074_v59 = vld [vmem:[#allocation3 + $0x6c] sm:$0xff]  }
 0x2dd   : > { %v5686_v44 = vrot.slane %v9011_v32, 1  ;;  %v5525_v56 = vshll.u32 %v9051_v36, 16 }
 0x2de   : > { %4184 = vrot.lane.b32.xlu1 %v4133_v22, %s7415_s25  ;;  %v5468_v27 = vor.u32 %v5467_v61, %v5463_v15  ;;  %v5472_v22 = vrot.slane %v5470_v17, 1  ;;  %v5485_v58 = vsel %vm981_vm10, %v5480_v31, %v5484_v2  ;;  %v5692_v61 = vrot.slane %v9036_v13, 1 }
 0x2df   : > { %v4789_v40 = vpop.permute.xlu0 %4788  ;;  %v5693_v17 = vrot.slane %v7292_v19, 1  ;;  %v5523_v15 = vshrl.u32 %v9051_v36, 16  ;;  %v5697_v2 = vsel %vm1206_vm9, %v5695_v33, %v5696_v53  ;;  %v7355_v19 = vld [vmem:[#allocation3 + $0x60] sm:$0xff]  }
 0x2e0   : > { %4182 = vrot.lane.b32.xlu0 %v4121_v14, %s7415_s25  ;;  %v4853_v38 = vsel %vm1320_vm13, %v4821_v18, %v4789_v40  ;;  %v7353_v18 = vld [vmem:[#allocation3 + $0x48] sm:$0xff]   ;;  %v5473_v49 = vsel %vm981_vm10, %v5468_v27, %v5472_v22  ;;  %v5549_v22 = vshll.u32 %v9074_v59, 16 }
 0x2e1   : > { %6879 = vmatprep.mubr.msk.bf16.mxu1 %vm1907_vm14, %v4853_v38  ;;  %v5694_v4 = vsel %vm1206_vm9, %v5692_v61, %v5693_v17 }
 0x2e2   : > { %4264 = vrot.lane.b32.xlu1 %v4231_v10, %s7414_s24  ;;  %6880 = vmatmul.mubr.msk.bf16.gmra.mrb[4].mxu1 %vm1907_vm14, %v4855_v46  ;;  %v5687_v10 = vrot.slane %v9027_v26, 1  ;;  %v9061_v46 = vld [vmem:[#allocation3 + $0x48] sm:$0xff]   ;;  %v5492_v26 = vor.u32 %v5491_v55, %v5487_v42  ;;  %v5551_v37 = vrot.slane %v5549_v22, 1  ;;  %v5699_v42 = vrot.slane %v7296_v24, 1 }
 0x2e3   : > { %v5513_v30 = vshll.u32 %v9061_v46, 16  ;;  %v5511_v0 = vshrl.u32 %v9061_v46, 16  ;;  %v9099_v55 = vld [vmem:[#allocation3 + $0x68] ss:$0 sps:$4 sm:$0x11]  }
 0x2e4   : > { %4262 = vrot.lane.b32.xlu0 %v4228_v25, %s7414_s24  ;;  %v4715_v8 = vpop.permute.xlu1 %4714  ;;  %v5504_v25 = vor.u32 %v5503_v52, %v5499_v45  ;;  %v5688_v57 = vsel %vm1206_vm9, %v5686_v44, %v5687_v10  ;;  %v5701_v10 = vrot.slane %v9051_v36, 1  ;;  %v5542_v53 = vshll.u32 %v9099_v55, 16  ;;  %v9128_v22 = vld [vmem:[#allocation3 + $0x80] ss:$0 sps:$4 sm:$0x11]  }
 0x2e5   : > { %v4827_v40 = vsel %vm1287_vm11, %v7353_v18, %v4715_v8  ;;  %v5496_v8 = vrot.slane %v5494_v43, 1  ;;  %v5515_v9 = vrot.slane %v5513_v30, 1 }
 0x2e6   : > { %4188 = vrot.lane.b32.xlu1 %v4157_v7, %s7415_s25  ;;  %v7294_v7 = vld [vmem:[#allocation3 + $0x5c] ss:$0 sps:$4 sm:$0x11]   ;;  %v5509_v54 = vsel %vm981_vm10, %v5504_v25, %v5508_v23  ;;  %v5698_v25 = vrot.slane %v9061_v46, 1 }
 0x2e7   : > { %v5516_v44 = vor.u32 %v5515_v9, %v5511_v0  ;;  %v9124_v9 = vld [vmem:[#allocation3 + $0x9c] sm:$0xff]  }
 0x2e8   : > { %4186 = vrot.lane.b32.xlu0 %v4145_v5, %s7415_s25  ;;  %v5527_v5 = vrot.slane %v5525_v56, 1  ;;  %v5547_v56 = vshrl.u32 %v9074_v59, 16  ;;  %v5700_v24 = vsel %vm1206_vm9, %v5698_v25, %v5699_v42  ;;  %v9149_v42 = vld [vmem:[#allocation3 + $0xa4] ss:$0 sps:$4 sm:$0x11]  }
 0x2e9   : > { %v4713_v20 = vpop.permute.xlu0 %4712 }
 0x2ea   : > { %4268 = vrot.lane.b32.xlu1 %v4237_v16, %s7414_s24  ;;  %v4795_v6 = vpop.permute.xlu1 %4794  ;;  %v4825_v12 = vsel %vm1287_vm11, %v7352_v50, %v4713_v20  ;;  %v5497_v16 = vsel %vm981_vm10, %v5492_v26, %v5496_v8  ;;  %v5530_v20 = vshll.u32 %v7294_v7, 16  ;;  %v5528_v27 = vor.u32 %v5527_v5, %v5523_v15  ;;  %v9109_v26 = vld [vmem:[#allocation3 + $0x78] sm:$0xff]   ;;  %v9117_v5 = vld [vmem:[#allocation3 + $0x8c] ss:$0 sps:$4 sm:$0x11]  }
 0x2eb   : > { %v4859_v38 = vsel %vm1320_vm13, %v4827_v40, %v4795_v6  ;;  %v7354_v6 = vld [vmem:[#allocation3 + $0x54] sm:$0xff]   ;;  %v5707_v15 = vrot.slane %v9074_v59, 1 }
 0x2ec   : > { %4266 = vrot.lane.b32.xlu0 %v4234_v35, %s7414_s24  ;;  %v9080_v35 = vld [vmem:[#allocation3 + $0x60] sm:$0xff]  }
 0x2ed   : > { %v4793_v14 = vpop.permute.xlu0 %4792  ;;  %v5537_v52 = vshll.u32 %v9080_v35, 16  ;;  %v5535_v33 = vshrl.u32 %v9080_v35, 16  ;;  %v5704_v0 = vrot.slane %v9080_v35, 1 }
 0x2ee   : > { %5656 = vrot.lane.b32.xlu1 %v5485_v58, %s7415_s25  ;;  %v4857_v28 = vsel %vm1320_vm13, %v4825_v12, %v4793_v14  ;;  %v5532_v12 = vrot.slane %v5530_v20, 1  ;;  %v9089_v14 = vld [vmem:[#allocation3 + $0x74] ss:$0 sps:$4 sm:$0x11]  }
 0x2ef   : > { %6883 = vmatprep.mubr.msk.bf16.mxu1 %vm1907_vm14, %v4857_v28  ;;  %v5702_v28 = vrot.slane %v7294_v7, 1  ;;  %v5539_v23 = vrot.slane %v5537_v52, 1  ;;  %v5708_v20 = vrot.slane %v9089_v14, 1 }
 0x2f0   : > { %5654 = vrot.lane.b32.xlu0 %v5473_v49, %s7415_s25  ;;  %6884 = vmatmul.mubr.msk.bf16.gmra.mrb[8].mxu1 %vm1907_vm14, %v4859_v38  ;;  %v5533_v49 = vsel %vm981_vm10, %v5528_v27, %v5532_v12  ;;  %v5520_v38 = vrot.slane %v5518_v34, 1  ;;  %v5544_v27 = vrot.slane %v5542_v53, 1  ;;  %v5578_v12 = vshll.u32 %v9117_v5, 16 }
 0x2f1   : > { %v5703_v30 = vsel %vm1206_vm9, %v5701_v10, %v5702_v28  ;;  %v5540_v17 = vor.u32 %v5539_v23, %v5535_v33  ;;  %v9156_v33 = vld [vmem:[#allocation3 + $0xb4] sm:$0xff]  }
 0x2f2   : > { %5736 = vrot.lane.b32.xlu1 %v5691_v51, %s7414_s24  ;;  %v4719_v1 = vpop.permute.xlu1 %4718  ;;  %v9101_v51 = vld [vmem:[#allocation3 + $0x84] sm:$0xff]   ;;  %v5521_v43 = vsel %vm981_vm10, %v5516_v44, %v5520_v38  ;;  %v7357_v44 = vld [vmem:[#allocation3 + $0x78] sm:$0xff]   ;;  %v5559_v38 = vshrl.u32 %v9109_v26, 16 }
 0x2f3   : > { %v4831_v18 = vsel %vm1287_vm11, %v7355_v19, %v4719_v1  ;;  %v5552_v1 = vor.u32 %v5551_v37, %v5547_v56  ;;  %v5545_v19 = vsel %vm981_vm10, %v5540_v17, %v5544_v27  ;;  %v5566_v37 = vshll.u32 %v9128_v22, 16  ;;  %v7358_v17 = vld [vmem:[#allocation3 + $0x84] sm:$0xff]   ;;  %v7359_v27 = vld [vmem:[#allocation3 + $0x90] sm:$0xff]  }
 0x2f4   : > { %5734 = vrot.lane.b32.xlu0 %v5688_v57, %s7414_s24  ;;  %v5554_v57 = vshll.u32 %v9089_v14, 16  ;;  %v5580_v56 = vrot.slane %v5578_v12, 1 }
 0x2f6   : > { %5660 = vrot.lane.b32.xlu1 %v5509_v54, %s7415_s25  ;;  %v5573_v54 = vshll.u32 %v9101_v51, 16  ;;  %v5556_v61 = vrot.slane %v5554_v57, 1 }
 0x2f7   : > { %v4717_v31 = vpop.permute.xlu0 %4716 }
 0x2f8   : > { %5658 = vrot.lane.b32.xlu0 %v5497_v16, %s7415_s25  ;;  %v4799_v21 = vpop.permute.xlu1 %4798  ;;  %v4829_v58 = vsel %vm1287_vm11, %v7354_v6, %v4717_v31  ;;  %v5561_v16 = vshll.u32 %v9109_v26, 16  ;;  %v5575_v34 = vrot.slane %v5573_v54, 1  ;;  %v5568_v54 = vrot.slane %v5566_v37, 1 }
 0x2f9   : > { %v4863_v45 = vsel %vm1320_vm13, %v4831_v18, %v4799_v21  ;;  %v5719_v37 = vrot.slane %v9124_v9, 1 }
 0x2fa   : > { %5740 = vrot.lane.b32.xlu1 %v5697_v2, %s7414_s24  ;;  %v5557_v2 = vsel %vm981_vm10, %v5552_v1, %v5556_v61  ;;  %v5563_v18 = vrot.slane %v5561_v16, 1  ;;  %v5714_v1 = vrot.slane %v9117_v5, 1  ;;  %v9160_v61 = vld [vmem:[#allocation3 + $0x98] ss:$0 sps:$4 sm:$0x11]   ;;  %v5595_v5 = vshrl.u32 %v9124_v9, 16 }
 0x2fb   : > { %v4797_v50 = vpop.permute.xlu0 %4796 }
 0x2fc   : > { %5738 = vrot.lane.b32.xlu0 %v5694_v4, %s7414_s24  ;;  %v4861_v40 = vsel %vm1320_vm13, %v4829_v58, %v4797_v50  ;;  %v7356_v4 = vld [vmem:[#allocation3 + $0x6c] sm:$0xff]   ;;  %v5705_v58 = vrot.slane %v9099_v55, 1  ;;  %v5571_v50 = vshrl.u32 %v9101_v51, 16  ;;  %v5597_v55 = vshll.u32 %v9124_v9, 16 }
 0x2fd   : > { %6887 = vmatprep.mubr.msk.bf16.mxu1 %vm1907_vm14, %v4861_v40  ;;  %v9138_v40 = vld [vmem:[#allocation3 + $0x90] sm:$0xff]   ;;  %v5564_v57 = vor.u32 %v5563_v18, %v5559_v38 }
 0x2fe   : > { %5664 = vrot.lane.b32.xlu1 %v5533_v49, %s7415_s25  ;;  %6888 = vmatmul.mubr.msk.bf16.gmra.mrb[12].mxu1 %vm1907_vm14, %v4863_v45  ;;  %v5709_v45 = vsel %vm1206_vm9, %v5707_v15, %v5708_v20  ;;  %v5576_v49 = vor.u32 %v5575_v34, %v5571_v50  ;;  %v5585_v23 = vshll.u32 %v9138_v40, 16  ;;  %v5711_v15 = vrot.slane %v9128_v22, 1 }
 0x2ff   : > { %v5602_v20 = vshll.u32 %v9149_v42, 16  ;;  %v5583_v12 = vshrl.u32 %v9138_v40, 16 }
 0x300   : > { %5662 = vrot.lane.b32.xlu0 %v5521_v43, %s7415_s25  ;;  %v4723_v7 = vpop.permute.xlu1 %4722  ;;  %v5706_v43 = vsel %vm1206_vm9, %v5704_v0, %v5705_v58  ;;  %v5581_v53 = vsel %vm981_vm10, %v5576_v49, %v5580_v56  ;;  %v9185_v49 = vld [vmem:[#allocation3 + $0xcc] sm:$0xff]  }
 0x301   : > { %v4835_v14 = vsel %vm1287_vm11, %v7357_v44, %v4723_v7  ;;  %v5590_v44 = vshll.u32 %v9160_v61, 16 }
 0x302   : > { %v4721_v8 = vpop.permute.xlu0 %4720  ;;  %5744 = vrot.lane.b32.xlu1 %v5703_v30, %s7414_s24  ;;  %v5713_v30 = vrot.slane %v9101_v51, 1 }
 0x303   : > { %v4833_v21 = vsel %vm1287_vm11, %v7356_v4, %v4721_v8  ;;  %v5710_v8 = vrot.slane %v9109_v26, 1  ;;  %v5569_v4 = vsel %vm981_vm10, %v5564_v57, %v5568_v54  ;;  %v5592_v57 = vrot.slane %v5590_v44, 1 }
 0x304   : > { %5742 = vrot.lane.b32.xlu0 %v5700_v24, %s7414_s24  ;;  %v4803_v31 = vpop.permute.xlu1 %4802  ;;  %v5599_v24 = vrot.slane %v5597_v55, 1  ;;  %v5715_v58 = vsel %vm1206_vm9, %v5713_v30, %v5714_v1  ;;  %v5720_v55 = vrot.slane %v9149_v42, 1  ;;  %v7360_v30 = vld [vmem:[#allocation3 + $0x9c] sm:$0xff]   ;;  %v5619_v54 = vshrl.u32 %v9156_v33, 16 }
 0x305   : > { %v4867_v10 = vsel %vm1320_vm13, %v4835_v14, %v4803_v31  ;;  %v5621_v14 = vshll.u32 %v9156_v33, 16  ;;  %v5643_v44 = vshrl.u32 %v9185_v49, 16 }
 0x306   : > { %v4801_v6 = vpop.permute.xlu0 %4800  ;;  %5668 = vrot.lane.b32.xlu1 %v5557_v2, %s7415_s25  ;;  %v9167_v2 = vld [vmem:[#allocation3 + $0xa8] sm:$0xff]   ;;  %v5600_v50 = vor.u32 %v5599_v24, %v5595_v5  ;;  %v9199_v24 = vld [vmem:[#allocation3 + $0xd4] ss:$0 sps:$4 sm:$0x11]   ;;  %v9205_v5 = vld [vmem:[#allocation3 + $0xc0] sm:$0xff]  }
 0x307   : > { %v4865_v52 = vsel %vm1320_vm13, %v4833_v21, %v4801_v6  ;;  %v5587_v21 = vrot.slane %v5585_v23, 1  ;;  %v5609_v18 = vshll.u32 %v9167_v2, 16  ;;  %v5717_v23 = vrot.slane %v9160_v61, 1 }
 0x308   : > { %5666 = vrot.lane.b32.xlu0 %v5545_v19, %s7415_s25  ;;  %6891 = vmatprep.mubr.msk.bf16.mxu1 %vm1907_vm14, %v4865_v52  ;;  %v4727_v28 = vpop.permute.xlu1 %4726  ;;  %v9181_v19 = vld [vmem:[#allocation3 + $0xbc] ss:$0 sps:$4 sm:$0x11]  }
 0x309   : > { %6892 = vmatmul.mubr.msk.bf16.gmra.mrb[16].mxu1 %vm1907_vm14, %v4867_v10  ;;  %v4839_v0 = vsel %vm1287_vm11, %v7359_v27, %v4727_v28  ;;  %v5712_v10 = vsel %vm1206_vm9, %v5710_v8, %v5711_v15  ;;  %v5604_v28 = vrot.slane %v5602_v20, 1  ;;  %v5626_v42 = vshll.u32 %v9181_v19, 16 }
 0x30a   : > { %v4725_v25 = vpop.permute.xlu0 %4724  ;;  %5748 = vrot.lane.b32.xlu1 %v5709_v45, %s7414_s24  ;;  %v5588_v45 = vor.u32 %v5587_v21, %v5583_v12  ;;  %v5611_v8 = vrot.slane %v5609_v18, 1  ;;  %v5645_v15 = vshll.u32 %v9185_v49, 16 }
 0x30b   : > { %v4837_v16 = vsel %vm1287_vm11, %v7358_v17, %v4725_v25  ;;  %v5716_v25 = vrot.slane %v9138_v40, 1  ;;  %v5605_v56 = vsel %vm981_vm10, %v5600_v50, %v5604_v28  ;;  %v7361_v17 = vld [vmem:[#allocation3 + $0xa8] sm:$0xff]   ;;  %v5650_v50 = vshll.u32 %v9199_v24, 16 }
 0x30c   : > { %5746 = vrot.lane.b32.xlu0 %v5706_v43, %s7414_s24  ;;  %v4807_v7 = vpop.permute.xlu1 %4806  ;;  %v9191_v43 = vld [vmem:[#allocation3 + $0xb0] ss:$0 sps:$4 sm:$0x11]   ;;  %v5593_v61 = vsel %vm981_vm10, %v5588_v45, %v5592_v57  ;;  %v5628_v12 = vrot.slane %v5626_v42, 1  ;;  %v5725_v45 = vrot.slane %v9156_v33, 1 }
 0x30d   : > { %v4871_v6 = vsel %vm1320_vm13, %v4839_v0, %v4807_v7  ;;  %v5623_v7 = vrot.slane %v5621_v14, 1  ;;  %v5607_v0 = vshrl.u32 %v9167_v2, 16  ;;  %v5647_v14 = vrot.slane %v5645_v15, 1 }
 0x30e   : > { %v4805_v31 = vpop.permute.xlu0 %4804  ;;  %5672 = vrot.lane.b32.xlu1 %v5581_v53, %s7415_s25 }
 0x30f   : > { %v4869_v34 = vsel %vm1320_vm13, %v4837_v16, %v4805_v31  ;;  %v5624_v21 = vor.u32 %v5623_v7, %v5619_v54  ;;  %v5723_v7 = vrot.slane %v9191_v43, 1 }
 0x310   : > { %5670 = vrot.lane.b32.xlu0 %v5569_v4, %s7415_s25  ;;  %6895 = vmatprep.mubr.msk.bf16.mxu1 %vm1907_vm14, %v4869_v34  ;;  %v4731_v22 = vpop.permute.xlu1 %4730  ;;  %v5614_v34 = vshll.u32 %v9191_v43, 16  ;;  %v5721_v4 = vsel %vm1206_vm9, %v5719_v37, %v5720_v55  ;;  %v5722_v37 = vrot.slane %v9167_v2, 1  ;;  %v7316_v55 = vld [vmem:[#allocation3 + $0xc8] ss:$0 sps:$4 sm:$0x11]   ;;  %v5631_v43 = vshrl.u32 %v9205_v5, 16 }
 0x311   : > { %6896 = vmatmul.mubr.msk.bf16.gmra.mrb[20].mxu1 %vm1907_vm14, %v4871_v6  ;;  %v4843_v16 = vsel %vm1287_vm11, %v7361_v17, %v4731_v22  ;;  %v5718_v22 = vsel %vm1206_vm9, %v5716_v25, %v5717_v23  ;;  %v5629_v28 = vsel %vm981_vm10, %v5624_v21, %v5628_v12  ;;  %v7362_v25 = vld [vmem:[#allocation3 + $0xb4] sm:$0xff]   ;;  %v5728_v12 = vrot.slane %v9205_v5, 1 }
 0x312   : > { %v4729_v52 = vpop.permute.xlu0 %4728  ;;  %5752 = vrot.lane.b32.xlu1 %v5715_v58, %s7414_s24  ;;  %v5612_v58 = vor.u32 %v5611_v8, %v5607_v0  ;;  %v5724_v15 = vsel %vm1206_vm9, %v5722_v37, %v5723_v7  ;;  %v5731_v0 = vrot.slane %v9185_v49, 1 }
 0x313   : > { %v4841_v1 = vsel %vm1287_vm11, %v7360_v30, %v4729_v52  ;;  %v5633_v52 = vshll.u32 %v9205_v5, 16  ;;  %v5652_v30 = vrot.slane %v5650_v50, 1  ;;  %v5871_v50 = vsel %vm1940_vm12, %v8971_v63, 0 }
 0x314   : > { %5750 = vrot.lane.b32.xlu0 %v5712_v10, %s7414_s24  ;;  %v4811_v38 = vpop.permute.xlu1 %4810  ;;  %v5616_v10 = vrot.slane %v5614_v34, 1  ;;  %v5732_v34 = vrot.slane %v9199_v24, 1 }
 0x315   : > { %v4875_v20 = vsel %vm1320_vm13, %v4843_v16, %v4811_v38  ;;  %v5726_v38 = vrot.slane %v9181_v19, 1  ;;  %v5648_v19 = vor.u32 %v5647_v14, %v5643_v44  ;;  %v5635_v42 = vrot.slane %v5633_v52, 1  ;;  %v7365_v14 = vld [vmem:[#allocation3 + $0xc] sm:$0xff]  }
 0x316   : > { %v4809_v53 = vpop.permute.xlu0 %4808  ;;  %5676 = vrot.lane.b32.xlu1 %v5605_v56, %s7415_s25  ;;  %v5617_v23 = vsel %vm981_vm10, %v5612_v58, %v5616_v10  ;;  %v5729_v44 = vrot.slane %v7316_v55, 1  ;;  %v5733_v10 = vsel %vm1206_vm9, %v5731_v0, %v5732_v34 }
 0x317   : > { %v4873_v31 = vsel %vm1320_vm13, %v4841_v1, %v4809_v53  ;;  %v7363_v1 = vld [vmem:[#allocation3 + $0xc0] sm:$0xff]   ;;  %v5727_v16 = vsel %vm1206_vm9, %v5725_v45, %v5726_v38 }
 0x318   : > { %5674 = vrot.lane.b32.xlu0 %v5593_v61, %s7415_s25  ;;  %6899 = vmatprep.mubr.msk.bf16.mxu1 %vm1907_vm14, %v4873_v31  ;;  %v4735_v27 = vpop.permute.xlu1 %4734  ;;  %v5638_v31 = vshll.u32 %v7316_v55, 16  ;;  %v5730_v38 = vsel %vm1206_vm9, %v5728_v12, %v5729_v44  ;;  %v7366_v55 = vld [vmem:[#allocation3 + $0x18] sm:$0xff]  }
 0x319   : > { %6900 = vmatmul.mubr.msk.bf16.gmra.mrb[24].mxu1 %vm1907_vm14, %v4875_v20  ;;  %v4847_v53 = vsel %vm1287_vm11, %v7363_v1, %v4735_v27  ;;  %v5653_v20 = vsel %vm981_vm10, %v5648_v19, %v5652_v30  ;;  %v5636_v27 = vor.u32 %v5635_v42, %v5631_v43  ;;  %v7368_v19 = vld [vmem:[#allocation3 + $0x30] sm:$0xff]  }
 0x31a   : > { %v4733_v6 = vpop.permute.xlu0 %4732  ;;  %5756 = vrot.lane.b32.xlu1 %v5721_v4, %s7414_s24  ;;  %v5640_v21 = vrot.slane %v5638_v31, 1 }
 0x31b   : > { %v4845_v56 = vsel %vm1287_vm11, %v7362_v25, %v4733_v6  ;;  %v7364_v6 = vld [vmem:[#allocation3] sm:$0xff]  }
 0x31c   : > { %5754 = vrot.lane.b32.xlu0 %v5718_v22, %s7414_s24  ;;  %v4815_v18 = vpop.permute.xlu1 %4814 }
 0x31d   : > { %v4879_v8 = vsel %vm1320_vm13, %v4847_v53, %v4815_v18  ;;  %v5641_v18 = vsel %vm981_vm10, %v5636_v27, %v5640_v21  ;;  %v7370_v27 = vld [vmem:[#allocation3 + $0x48] sm:$0xff]  }
 0x31e   : > { %v4813_v57 = vpop.permute.xlu0 %4812  ;;  %5680 = vrot.lane.b32.xlu1 %v5629_v28, %s7415_s25 }
 0x31f   : > { %v4877_v54 = vsel %vm1320_vm13, %v4845_v56, %v4813_v57  ;;  %v7367_v57 = vld [vmem:[#allocation3 + $0x24] sm:$0xff]  }
 0x320   : > { %5678 = vrot.lane.b32.xlu0 %v5617_v23, %s7415_s25  ;;  %6903 = vmatprep.mubr.msk.bf16.mxu1 %vm1907_vm14, %v4877_v54  ;;  %v4161_v17 = vpop.permute.xlu1 %4160 }
 0x321   : > { %6904 = vmatmul.mubr.msk.bf16.gmra.mrb[28].mxu1 %vm1907_vm14, %v4879_v8  ;;  %v4273_v52 = vsel %vm1287_vm11, %v7365_v14, %v4161_v17  ;;  %v7369_v17 = vld [vmem:[#allocation3 + $0x3c] sm:$0xff]  }
 0x322   : > { %v4159_v61 = vpop.permute.xlu0 %4158  ;;  %5760 = vrot.lane.b32.xlu1 %v5727_v16, %s7414_s24 }
 0x323   : > { %v4271_v22 = vsel %vm1287_vm11, %v7364_v6, %v4159_v61 }
 0x324   : > { %5758 = vrot.lane.b32.xlu0 %v5724_v15, %s7414_s24  ;;  %v4241_v4 = vpop.permute.xlu1 %4240 }
 0x325   : > { %v4305_v28 = vsel %vm1320_vm13, %v4273_v52, %v4241_v4  ;;  %v7371_v4 = vld [vmem:[#allocation3 + $0x54] sm:$0xff]   ;;  %v7372_v52 = vld [vmem:[#allocation3 + $0x6c] sm:$0xff]  }
 0x326   : > { %v4239_v58 = vpop.permute.xlu0 %4238  ;;  %5684 = vrot.lane.b32.xlu1 %v5653_v20, %s7415_s25 }
 0x327   : > { %v4303_v24 = vsel %vm1320_vm13, %v4271_v22, %v4239_v58 }
 0x328   : > { %5682 = vrot.lane.b32.xlu0 %v5641_v18, %s7415_s25  ;;  %6909 = vmatprep.mubr.msk.bf16.mxu1 %vm1907_vm14, %v4303_v24  ;;  %v4165_v45 = vpop.permute.xlu1 %4164 }
 0x329   : > { %6910 = vmatmul.mubr.msk.bf16.vlgmr.msra.gmra.mrb[0].mxu1 %vm1907_vm14, %v4305_v28  ;;  %v4277_v23 = vsel %vm1287_vm11, %v7367_v57, %v4165_v45 }
 0x32a   : > { %6942 = vmatpush3.bf16.msra.mxu1 %v5871_v50  ;;  %v4163_v63 = vpop.permute.xlu0 %4162  ;;  %5764 = vrot.lane.b32.xlu1 %v5733_v10, %s7414_s24 }
 0x32b   : > { %v4275_v25 = vsel %vm1287_vm11, %v7366_v55, %v4163_v63 }
 0x32c   : > { %5762 = vrot.lane.b32.xlu0 %v5730_v38, %s7414_s24  ;;  %v4245_v37 = vpop.permute.xlu1 %4244 }
 0x32d   : > { %v4309_v30 = vsel %vm1320_vm13, %v4277_v23, %v4245_v37 }
 0x32e   : > { %v4243_v56 = vpop.permute.xlu0 %4242 }
 0x32f   : > { %v4307_v7 = vsel %vm1320_vm13, %v4275_v25, %v4243_v56 }
 0x330   : > { %6913 = vmatprep.mubr.msk.bf16.mxu1 %vm1907_vm14, %v4307_v7  ;;  %v4169_v1 = vpop.permute.xlu1 %4168 }
 0x331   : > { %6914 = vmatmul.mubr.msk.bf16.gmra.mrb[4].mxu1 %vm1907_vm14, %v4309_v30  ;;  %v4281_v16 = vsel %vm1287_vm11, %v7369_v17, %v4169_v1 }
 0x332   : > { %v4167_v53 = vpop.permute.xlu0 %4166 }
 0x333   : > { %v4279_v42 = vsel %vm1287_vm11, %v7368_v19, %v4167_v53 }
 0x334   : > { %v4249_v54 = vpop.permute.xlu1 %4248 }
 0x335   : > { %v4313_v31 = vsel %vm1320_vm13, %v4281_v16, %v4249_v54 }
 0x336   : > { %v4247_v8 = vpop.permute.xlu0 %4246 }
 0x337   : > { %v4311_v43 = vsel %vm1320_vm13, %v4279_v42, %v4247_v8 }
 0x338   : > { %6917 = vmatprep.mubr.msk.bf16.mxu1 %vm1907_vm14, %v4311_v43  ;;  %v4173_v61 = vpop.permute.xlu1 %4172 }
 0x339   : > { %6918 = vmatmul.mubr.msk.bf16.gmra.mrb[8].mxu1 %vm1907_vm14, %v4313_v31  ;;  %v4285_v21 = vsel %vm1287_vm11, %v7371_v4, %v4173_v61 }
 0x33a   : > { %v4171_v15 = vpop.permute.xlu0 %4170 }
 0x33b   : > { %v4283_v0 = vsel %vm1287_vm11, %v7370_v27, %v4171_v15 }
 0x33c   : > { %v4253_v20 = vpop.permute.xlu1 %4252 }
 0x33d   : > { %v4317_v22 = vsel %vm1320_vm13, %v4285_v21, %v4253_v20 }
 0x33e   : > { %v4251_v34 = vpop.permute.xlu0 %4250 }
 0x33f   : > { %v4315_v6 = vsel %vm1320_vm13, %v4283_v0, %v4251_v34 }
 0x340   : > { %6921 = vmatprep.mubr.msk.bf16.mxu1 %vm1907_vm14, %v4315_v6  ;;  %v4177_v58 = vpop.permute.xlu1 %4176 }
 0x341   : > { %6922 = vmatmul.mubr.msk.bf16.gmra.mrb[12].mxu1 %vm1907_vm14, %v4317_v22  ;;  %v4289_v24 = vsel %vm1287_vm11, %v7372_v52, %v4177_v58 }
 0x342   : > { %v4175_v50 = vpop.permute.xlu0 %4174 }
 0x343   : > { %v4287_v44 = vsel %vm1287_vm11, %v8911_v60, %v4175_v50 }
 0x344   : > { %v4257_v12 = vpop.permute.xlu1 %4256 }
 0x345   : > { %v4321_v10 = vsel %vm1320_vm13, %v4289_v24, %v4257_v12 }
 0x346   : > { %v4255_v14 = vpop.permute.xlu0 %4254 }
 0x347   : > { %v4319_v18 = vsel %vm1320_vm13, %v4287_v44, %v4255_v14 }
 0x348   : > { %6925 = vmatprep.mubr.msk.bf16.mxu1 %vm1907_vm14, %v4319_v18  ;;  %v4181_v28 = vpop.permute.xlu1 %4180 }
 0x349   : > { %6926 = vmatmul.mubr.msk.bf16.gmra.mrb[16].mxu1 %vm1907_vm14, %v4321_v10  ;;  %v4293_v60 = vsel %vm1287_vm11, %v8929_v62, %v4181_v28 }
 0x34a   : > { %v4179_v45 = vpop.permute.xlu0 %4178 }
 0x34b   : > { %v4291_v38 = vsel %vm1287_vm11, %v8934_v11, %v4179_v45 }
 0x34c   : > { %v4261_v63 = vpop.permute.xlu1 %4260 }
 0x34d   : > { %v4325_v25 = vsel %vm1320_vm13, %v4293_v60, %v4261_v63 }
 0x34e   : > { %v4259_v37 = vpop.permute.xlu0 %4258 }
 0x34f   : > { %v4323_v55 = vsel %vm1320_vm13, %v4291_v38, %v4259_v37 }
 0x350   : > { %6929 = vmatprep.mubr.msk.bf16.mxu1 %vm1907_vm14, %v4323_v55  ;;  %v4185_v56 = vpop.permute.xlu1 %4184 }
 0x351   : > { %6930 = vmatmul.mubr.msk.bf16.gmra.mrb[20].mxu1 %vm1907_vm14, %v4325_v25  ;;  %v4297_v11 = vsel %vm1287_vm11, %v8950_v29, %v4185_v56 }
 0x352   : > { %v4183_v57 = vpop.permute.xlu0 %4182 }
 0x353   : > { %v4295_v7 = vsel %vm1287_vm11, %v8959_v47, %v4183_v57 }
 0x354   : > { %v4265_v23 = vpop.permute.xlu1 %4264 }
 0x355   : > { %v4329_v1 = vsel %vm1320_vm13, %v4297_v11, %v4265_v23 }
 0x356   : > { %v4263_v30 = vpop.permute.xlu0 %4262 }
 0x357   : > { %v4327_v62 = vsel %vm1320_vm13, %v4295_v7, %v4263_v30 }
 0x358   : > { %6933 = vmatprep.mubr.msk.bf16.mxu1 %vm1907_vm14, %v4327_v62  ;;  %v4189_v53 = vpop.permute.xlu1 %4188 }
 0x359   : > { %6934 = vmatmul.mubr.msk.bf16.gmra.mrb[24].mxu1 %vm1907_vm14, %v4329_v1  ;;  %v4301_v47 = vsel %vm1287_vm11, %v8986_v41, %v4189_v53 }
 0x35a   : > { %v4187_v54 = vpop.permute.xlu0 %4186 }
 0x35b   : > { %v4299_v42 = vsel %vm1287_vm11, %v8992_v39, %v4187_v54 }
 0x35c   : > { %v4269_v19 = vpop.permute.xlu1 %4268 }
 0x35d   : > { %v4333_v17 = vsel %vm1320_vm13, %v4301_v47, %v4269_v19 }
 0x35e   : > { %v4267_v8 = vpop.permute.xlu0 %4266 }
 0x35f   : > { %v4331_v29 = vsel %vm1320_vm13, %v4299_v42, %v4267_v8 }
 0x360   : > { %6937 = vmatprep.mubr.msk.bf16.mxu1 %vm1907_vm14, %v4331_v29  ;;  %v5657_v16 = vpop.permute.xlu1 %5656 }
 0x361   : > { %6938 = vmatmul.mubr.msk.bf16.gmra.mrb[28].mxu1 %vm1907_vm14, %v4333_v17  ;;  %v5769_v39 = vsel %vm1287_vm11, %v9004_v48, %v5657_v16 }
 0x362   : > { %v5655_v43 = vpop.permute.xlu0 %5654 }
 0x363   : > { %v5767_v61 = vsel %vm1287_vm11, %v9011_v32, %v5655_v43 }
 0x364   : > { %v5737_v31 = vpop.permute.xlu1 %5736 }
 0x365   : > { %v5801_v20 = vsel %vm1320_vm13, %v5769_v39, %v5737_v31  ;;  %v9374_v31 = vld [vmem:[%s9517_s4] ss:$0 sm:$0xff] }
 0x366   : > { %v5735_v15 = vpop.permute.xlu0 %5734  ;;  %v7374_v39 = vld [vmem:[%s7490_s23] sm:$0xf] }
 0x367   : > { %v5799_v41 = vsel %vm1320_vm13, %v5767_v61, %v5735_v15 }
 0x368   : > { %6943 = vmatprep.mubr.msk.bf16.mxu1 %vm1907_vm14, %v5799_v41  ;;  %v5661_v27 = vpop.permute.xlu1 %5660 }
 0x369   : > { %6944 = vmatmul.mubr.msk.bf16.vlgmr.msra.gmra.mrb[0].mxu1 %vm1907_vm14, %v5801_v20  ;;  %v5773_v32 = vsel %vm1287_vm11, %v9030_v3, %v5661_v27  ;;  %v7375_v27 = vld [vmem:[%s7490_s23 + $0xc] sm:$0xf] }
 0x36a   : > { %v5659_v0 = vpop.permute.xlu0 %5658 }
 0x36b   : > { %v5771_v4 = vsel %vm1287_vm11, %v9036_v13, %v5659_v0  ;;  %v6108_v0 = vunpack.c.l.bf16 %v7375_v27 }
 0x36c   : > { %v5741_v34 = vpop.permute.xlu1 %5740 }
 0x36d   : > { %v5805_v6 = vsel %vm1320_vm13, %v5773_v32, %v5741_v34 }
 0x36e   : > { %v5739_v21 = vpop.permute.xlu0 %5738 }
 0x36f   : > { %v5803_v48 = vsel %vm1320_vm13, %v5771_v4, %v5739_v21  ;;  %v7376_v21 = vld [vmem:[%s7490_s23 + $0x4] sm:$0xf] }
 0x370   : > { %6947 = vmatprep.mubr.msk.bf16.mxu1 %vm1907_vm14, %v5803_v48  ;;  %v5665_v22 = vpop.permute.xlu1 %5664  ;;  %v6106_v32 = vunpack.c.l.bf16 %v7376_v21 }
 0x371   : > { %6948 = vmatmul.mubr.msk.bf16.gmra.mrb[4].mxu1 %vm1907_vm14, %v5805_v6  ;;  %v5777_v13 = vsel %vm1287_vm11, %v9051_v36, %v5665_v22 }
 0x372   : > { %v5663_v58 = vpop.permute.xlu0 %5662 }
 0x373   : > { %v5775_v12 = vsel %vm1287_vm11, %v9061_v46, %v5663_v58 }
 0x374   : > { %v5745_v50 = vpop.permute.xlu1 %5744 }
 0x375   : > { %v5809_v14 = vsel %vm1320_vm13, %v5777_v13, %v5745_v50 }
 0x376   : > { %v5743_v44 = vpop.permute.xlu0 %5742 }
 0x377   : > { %v5807_v3 = vsel %vm1320_vm13, %v5775_v12, %v5743_v44 }
 0x378   : > { %6951 = vmatprep.mubr.msk.bf16.mxu1 %vm1907_vm14, %v5807_v3  ;;  %v5669_v52 = vpop.permute.xlu1 %5668 }
 0x379   : > { %6952 = vmatmul.mubr.msk.bf16.gmra.mrb[8].mxu1 %vm1907_vm14, %v5809_v14  ;;  %v5781_v46 = vsel %vm1287_vm11, %v9074_v59, %v5669_v52  ;;  %v7377_v52 = vld [vmem:[%s7490_s23 + $0x18] sm:$0xf] }
 0x37a   : > { %v5667_v24 = vpop.permute.xlu0 %5666 }
 0x37b   : > { %v5779_v10 = vsel %vm1287_vm11, %v9080_v35, %v5667_v24  ;;  %v6111_v24 = vunpack.c.l.bf16 %v7377_v52 }
 0x37c   : > { %v5749_v18 = vpop.permute.xlu1 %5748 }
 0x37d   : > { %v5813_v45 = vsel %vm1320_vm13, %v5781_v46, %v5749_v18 }
 0x37e   : > { %v5747_v28 = vpop.permute.xlu0 %5746 }
 0x37f   : > { %v5811_v36 = vsel %vm1320_vm13, %v5779_v10, %v5747_v28  ;;  %v7378_v28 = vld [vmem:[%s7490_s23 + $0x10] sm:$0xf] }
 0x380   : > { %6955 = vmatprep.mubr.msk.bf16.mxu1 %vm1907_vm14, %v5811_v36  ;;  %v5673_v63 = vpop.permute.xlu1 %5672  ;;  %v6109_v46 = vunpack.c.l.bf16 %v7378_v28 }
 0x381   : > { %6956 = vmatmul.mubr.msk.bf16.gmra.mrb[12].mxu1 %vm1907_vm14, %v5813_v45  ;;  %v5785_v35 = vsel %vm1287_vm11, %v9101_v51, %v5673_v63  ;;  %v7379_v63 = vld [vmem:[%s7490_s23 + $0x1c] sm:$0xf] }
 0x382   : > { %v5671_v38 = vpop.permute.xlu0 %5670 }
 0x383   : > { %v5783_v60 = vsel %vm1287_vm11, %v9109_v26, %v5671_v38  ;;  %v6112_v38 = vunpack.c.l.bf16 %v7379_v63 }
 0x384   : > { %v5753_v37 = vpop.permute.xlu1 %5752 }
 0x385   : > { %v5817_v25 = vsel %vm1320_vm13, %v5785_v35, %v5753_v37 }
 0x386   : > { %v5751_v55 = vpop.permute.xlu0 %5750 }
 0x387   : > { %v5815_v59 = vsel %vm1320_vm13, %v5783_v60, %v5751_v55  ;;  %v7380_v55 = vld [vmem:[%s7490_s23 + $0x14] sm:$0xf] }
 0x388   : > { %6959 = vmatprep.mubr.msk.bf16.mxu1 %vm1907_vm14, %v5815_v59  ;;  %v5677_v56 = vpop.permute.xlu1 %5676  ;;  %v6110_v35 = vunpack.c.l.bf16 %v7380_v55 }
 0x389   : > { %6960 = vmatmul.mubr.msk.bf16.gmra.mrb[16].mxu1 %vm1907_vm14, %v5817_v25  ;;  %v5789_v26 = vsel %vm1287_vm11, %v9124_v9, %v5677_v56 }
 0x38a   : > { %v5675_v57 = vpop.permute.xlu0 %5674 }
 0x38b   : > { %v5787_v7 = vsel %vm1287_vm11, %v9138_v40, %v5675_v57 }
 0x38c   : > { %v5757_v23 = vpop.permute.xlu1 %5756 }
 0x38d   : > { %v5821_v11 = vsel %vm1320_vm13, %v5789_v26, %v5757_v23 }
 0x38e   : > { %v5755_v30 = vpop.permute.xlu0 %5754 }
 0x38f   : > { %v5819_v51 = vsel %vm1320_vm13, %v5787_v7, %v5755_v30 }
 0x390   : > { %6963 = vmatprep.mubr.msk.bf16.mxu1 %vm1907_vm14, %v5819_v51  ;;  %v5681_v62 = vpop.permute.xlu1 %5680 }
 0x391   : > { %6964 = vmatmul.mubr.msk.bf16.gmra.mrb[20].mxu1 %vm1907_vm14, %v5821_v11  ;;  %v5793_v40 = vsel %vm1287_vm11, %v9156_v33, %v5681_v62  ;;  %v7381_v62 = vld [vmem:[%s7490_s23 + $0x28] sm:$0xf] }
 0x392   : > { %v5679_v1 = vpop.permute.xlu0 %5678 }
 0x393   : > { %v5791_v54 = vsel %vm1287_vm11, %v9167_v2, %v5679_v1  ;;  %v6115_v1 = vunpack.c.l.bf16 %v7381_v62 }
 0x394   : > { %v5761_v53 = vpop.permute.xlu1 %5760 }
 0x395   : > { %v5825_v42 = vsel %vm1320_vm13, %v5793_v40, %v5761_v53 }
 0x396   : > { %v5759_v19 = vpop.permute.xlu0 %5758 }
 0x397   : > { %v5823_v9 = vsel %vm1320_vm13, %v5791_v54, %v5759_v19  ;;  %v7382_v19 = vld [vmem:[%s7490_s23 + $0x20] sm:$0xf] }
 0x398   : > { %6967 = vmatprep.mubr.msk.bf16.mxu1 %vm1907_vm14, %v5823_v9  ;;  %v5685_v8 = vpop.permute.xlu1 %5684  ;;  %v6113_v40 = vunpack.c.l.bf16 %v7382_v19 }
 0x399   : > { %6968 = vmatmul.mubr.msk.bf16.gmra.mrb[24].mxu1 %vm1907_vm14, %v5825_v42  ;;  %v5797_v2 = vsel %vm1287_vm11, %v9185_v49, %v5685_v8  ;;  %v7373_v49 = vld [vmem:[%s7490_s23 + $0x8] sm:$0xf]  ;;  %v7383_v8 = vld [vmem:[%s7490_s23 + $0x2c] sm:$0xf] }
 0x39a   : > { %v5683_v47 = vpop.permute.xlu0 %5682  ;;  %v6107_v61 = vunpack.c.l.bf16 %v7373_v49 }
 0x39b   : > { %v5795_v33 = vsel %vm1287_vm11, %v9205_v5, %v5683_v47  ;;  %v6105_v5 = vunpack.c.l.bf16 %v7374_v39  ;;  %v6116_v47 = vunpack.c.l.bf16 %v7383_v8 }
 0x39c   : > { %v5765_v29 = vpop.permute.xlu1 %5764 }
 0x39d   : > { %v5829_v43 = vsel %vm1320_vm13, %v5797_v2, %v5765_v29 }
 0x39e   : > { %v5763_v17 = vpop.permute.xlu0 %5762 }
 0x39f   : > { %v5827_v16 = vsel %vm1320_vm13, %v5795_v33, %v5763_v17  ;;  %v7384_v33 = vld [vmem:[%s7490_s23 + $0x24] sm:$0xf] }
 0x3a0   : > { %6971 = vmatprep.mubr.msk.bf16.mxu1 %vm1907_vm14, %v5827_v16  ;;  %v6114_v17 = vunpack.c.l.bf16 %v7384_v33 }
 0x3a1   : > { %6972 = vmatmul.mubr.msk.bf16.gmra.mrb[28].mxu1 %vm1907_vm14, %v5829_v43 }
 0x43c   : > { %v6945_v15 = vpop.f32.mrb[0].mxu1 }
 0x43d   : > { %v6075_v41 = vadd.f32 %v6945_v15, %v9374_v31  ;;  %v5907_v20 = vpop.f32.mrb[1].mxu1 }
 0x43e   : > { %v6073_v34 = vadd.f32 %v9374_v31, %v5907_v20  ;;  %v6946_v4 = vpop.f32.mrb[2].mxu1 }
 0x43f   : > { %v6139_v48 = vadd.f32 %v6107_v61, %v6075_v41  ;;  %v6076_v6 = vadd.f32 %v6946_v4, %v9374_v31  ;;  %v5910_v22 = vpop.f32.mrb[3].mxu1 }
 0x440   : > { %v6137_v58 = vadd.f32 %v6105_v5, %v6073_v34  ;;  %v6074_v50 = vadd.f32 %v9374_v31, %v5910_v22 }
 0x441   : > { %v6171_v12 = vmax.f32 %v6139_v48, 0.0  ;;  %v6140_v44 = vadd.f32 %v6108_v0, %v6076_v6  ;;  %v7385_v0 = vld [vmem:[%s7490_s23 + $0x38] sm:$0xf] }
 0x442   : > { %v6169_v13 = vmax.f32 %v6137_v58, 0.0  ;;  %v6138_v3 = vadd.f32 %v6106_v32, %v6074_v50  ;;  %v6119_v34 = vunpack.c.l.bf16 %v7385_v0  ;;  %v7386_v32 = vld [vmem:[%s7490_s23 + $0x30] sm:$0xf]  ;;  %v7387_v58 = vld [vmem:[%s7490_s23 + $0x3c] sm:$0xf] }
 0x443   : > { %6203 = vst.msk [vmem:[%s9387_s19 + $0x10] sm:$0xff] %vm1287_vm11, %v6171_v12  ;;  %v6172_v14 = vmax.f32 %v6140_v44, 0.0  ;;  %v6117_v48 = vunpack.c.l.bf16 %v7386_v32  ;;  %v6120_v50 = vunpack.c.l.bf16 %v7387_v58 }
 0x444   : > { %6201 = vst.msk [vmem:[%s9387_s19] sm:$0xff] %vm1287_vm11, %v6169_v13  ;;  %v6170_v18 = vmax.f32 %v6138_v3, 0.0  ;;  %v6949_v10 = vpop.f32.mrb[4].mxu1  ;;  %v7388_v13 = vld [vmem:[%s7490_s23 + $0x34] sm:$0xf] }
 0x445   : > { %6204 = vst.msk [vmem:[%s9387_s19 + $0x18] sm:$0xff] %vm1287_vm11, %v6172_v14  ;;  %v6079_v36 = vadd.f32 %v6949_v10, %v9374_v31  ;;  %v5923_v45 = vpop.f32.mrb[5].mxu1  ;;  %v6118_v3 = vunpack.c.l.bf16 %v7388_v13 }
 0x446   : > { %6202 = vst.msk [vmem:[%s9387_s19 + $0x8] sm:$0xff] %vm1287_vm11, %v6170_v18  ;;  %v6077_v37 = vadd.f32 %v9374_v31, %v5923_v45  ;;  %v6950_v60 = vpop.f32.mrb[6].mxu1 }
 0x447   : > { %v6143_v59 = vadd.f32 %v6111_v24, %v6079_v36  ;;  %v6080_v25 = vadd.f32 %v6950_v60, %v9374_v31  ;;  %v5926_v56 = vpop.f32.mrb[7].mxu1 }
 0x448   : > { %v6141_v57 = vadd.f32 %v6109_v46, %v6077_v37  ;;  %v6078_v23 = vadd.f32 %v9374_v31, %v5926_v56 }
 0x449   : > { %v6175_v7 = vmax.f32 %v6143_v59, 0.0  ;;  %v6144_v30 = vadd.f32 %v6112_v38, %v6080_v25  ;;  %v7389_v38 = vld [vmem:[%s7490_s23 + $0x48] sm:$0xf] }
 0x44a   : > { %v6173_v26 = vmax.f32 %v6141_v57, 0.0  ;;  %v6142_v51 = vadd.f32 %v6110_v35, %v6078_v23  ;;  %v6123_v37 = vunpack.c.l.bf16 %v7389_v38  ;;  %v7390_v35 = vld [vmem:[%s7490_s23 + $0x40] sm:$0xf]  ;;  %v7391_v57 = vld [vmem:[%s7490_s23 + $0x4c] sm:$0xf] }
 0x44b   : > { %6207 = vst.msk [vmem:[%s9387_s19 + $0x30] sm:$0xff] %vm1287_vm11, %v6175_v7  ;;  %v6176_v11 = vmax.f32 %v6144_v30, 0.0  ;;  %v6121_v59 = vunpack.c.l.bf16 %v7390_v35  ;;  %v6124_v23 = vunpack.c.l.bf16 %v7391_v57 }
 0x44c   : > { %6205 = vst.msk [vmem:[%s9387_s19 + $0x20] sm:$0xff] %vm1287_vm11, %v6173_v26  ;;  %v6174_v53 = vmax.f32 %v6142_v51, 0.0  ;;  %v6953_v54 = vpop.f32.mrb[8].mxu1  ;;  %v7392_v26 = vld [vmem:[%s7490_s23 + $0x44] sm:$0xf] }
 0x44d   : > { %6208 = vst.msk [vmem:[%s9387_s19 + $0x38] sm:$0xff] %vm1287_vm11, %v6176_v11  ;;  %v6083_v9 = vadd.f32 %v6953_v54, %v9374_v31  ;;  %v5939_v42 = vpop.f32.mrb[9].mxu1  ;;  %v6122_v51 = vunpack.c.l.bf16 %v7392_v26 }
 0x44e   : > { %6206 = vst.msk [vmem:[%s9387_s19 + $0x28] sm:$0xff] %vm1287_vm11, %v6174_v53  ;;  %v6081_v2 = vadd.f32 %v9374_v31, %v5939_v42  ;;  %v6954_v29 = vpop.f32.mrb[10].mxu1 }
 0x44f   : > { %v6147_v16 = vadd.f32 %v6115_v1, %v6083_v9  ;;  %v6084_v43 = vadd.f32 %v6954_v29, %v9374_v31  ;;  %v5942_v49 = vpop.f32.mrb[11].mxu1 }
 0x450   : > { %v6145_v61 = vadd.f32 %v6113_v40, %v6081_v2  ;;  %v6082_v15 = vadd.f32 %v9374_v31, %v5942_v49 }
 0x451   : > { %v6179_v39 = vmax.f32 %v6147_v16, 0.0  ;;  %v6148_v5 = vadd.f32 %v6116_v47, %v6084_v43  ;;  %v7393_v47 = vld [vmem:[%s7490_s23 + $0x58] sm:$0xf] }
 0x452   : > { %v6177_v41 = vmax.f32 %v6145_v61, 0.0  ;;  %v6146_v20 = vadd.f32 %v6114_v17, %v6082_v15  ;;  %v6127_v2 = vunpack.c.l.bf16 %v7393_v47  ;;  %v7394_v17 = vld [vmem:[%s7490_s23 + $0x50] sm:$0xf]  ;;  %v7395_v61 = vld [vmem:[%s7490_s23 + $0x5c] sm:$0xf] }
 0x453   : > { %6211 = vst.msk [vmem:[%s9387_s19 + $0x50] sm:$0xff] %vm1287_vm11, %v6179_v39  ;;  %v6180_v27 = vmax.f32 %v6148_v5, 0.0  ;;  %v6125_v16 = vunpack.c.l.bf16 %v7394_v17  ;;  %v6128_v15 = vunpack.c.l.bf16 %v7395_v61 }
 0x454   : > { %6209 = vst.msk [vmem:[%s9387_s19 + $0x40] sm:$0xff] %vm1287_vm11, %v6177_v41  ;;  %v6178_v4 = vmax.f32 %v6146_v20, 0.0  ;;  %v6957_v21 = vpop.f32.mrb[12].mxu1  ;;  %v7396_v41 = vld [vmem:[%s7490_s23 + $0x54] sm:$0xf] }
 0x455   : > { %6212 = vst.msk [vmem:[%s9387_s19 + $0x58] sm:$0xff] %vm1287_vm11, %v6180_v27  ;;  %v6087_v6 = vadd.f32 %v6957_v21, %v9374_v31  ;;  %v5955_v22 = vpop.f32.mrb[13].mxu1  ;;  %v6126_v20 = vunpack.c.l.bf16 %v7396_v41 }
 0x456   : > { %6210 = vst.msk [vmem:[%s9387_s19 + $0x48] sm:$0xff] %vm1287_vm11, %v6178_v4  ;;  %v6085_v12 = vadd.f32 %v9374_v31, %v5955_v22  ;;  %v6958_v44 = vpop.f32.mrb[14].mxu1 }
 0x457   : > { %v6151_v14 = vadd.f32 %v6119_v34, %v6087_v6  ;;  %v6088_v52 = vadd.f32 %v6958_v44, %v9374_v31  ;;  %v5958_v24 = vpop.f32.mrb[15].mxu1 }
 0x458   : > { %v6149_v18 = vadd.f32 %v6117_v48, %v6085_v12  ;;  %v6086_v10 = vadd.f32 %v9374_v31, %v5958_v24 }
 0x459   : > { %v6183_v28 = vmax.f32 %v6151_v14, 0.0  ;;  %v6152_v46 = vadd.f32 %v6120_v50, %v6088_v52  ;;  %v7397_v50 = vld [vmem:[%s7490_s23 + $0x68] sm:$0xf] }
 0x45a   : > { %v6181_v36 = vmax.f32 %v6149_v18, 0.0  ;;  %v6150_v45 = vadd.f32 %v6118_v3, %v6086_v10  ;;  %v6131_v12 = vunpack.c.l.bf16 %v7397_v50  ;;  %v7398_v3 = vld [vmem:[%s7490_s23 + $0x60] sm:$0xf]  ;;  %v7399_v18 = vld [vmem:[%s7490_s23 + $0x6c] sm:$0xf] }
 0x45b   : > { %6215 = vst.msk [vmem:[%s9387_s19 + $0x70] sm:$0xff] %vm1287_vm11, %v6183_v28  ;;  %v6184_v63 = vmax.f32 %v6152_v46, 0.0  ;;  %v6129_v14 = vunpack.c.l.bf16 %v7398_v3  ;;  %v6132_v10 = vunpack.c.l.bf16 %v7399_v18 }
 0x45c   : > { %6213 = vst.msk [vmem:[%s9387_s19 + $0x60] sm:$0xff] %vm1287_vm11, %v6181_v36  ;;  %v6182_v60 = vmax.f32 %v6150_v45, 0.0  ;;  %v6961_v55 = vpop.f32.mrb[16].mxu1  ;;  %v7400_v36 = vld [vmem:[%s7490_s23 + $0x64] sm:$0xf] }
 0x45d   : > { %6216 = vst.msk [vmem:[%s9387_s19 + $0x78] sm:$0xff] %vm1287_vm11, %v6184_v63  ;;  %v6091_v25 = vadd.f32 %v6961_v55, %v9374_v31  ;;  %v5971_v56 = vpop.f32.mrb[17].mxu1  ;;  %v6130_v45 = vunpack.c.l.bf16 %v7400_v36 }
 0x45e   : > { %6214 = vst.msk [vmem:[%s9387_s19 + $0x68] sm:$0xff] %vm1287_vm11, %v6182_v60  ;;  %v6089_v7 = vadd.f32 %v9374_v31, %v5971_v56  ;;  %v6962_v30 = vpop.f32.mrb[18].mxu1 }
 0x45f   : > { %v6155_v11 = vadd.f32 %v6123_v37, %v6091_v25  ;;  %v6092_v62 = vadd.f32 %v6962_v30, %v9374_v31  ;;  %v5974_v1 = vpop.f32.mrb[19].mxu1 }
 0x460   : > { %v6153_v53 = vadd.f32 %v6121_v59, %v6089_v7  ;;  %v6090_v54 = vadd.f32 %v9374_v31, %v5974_v1 }
 0x461   : > { %v6187_v19 = vmax.f32 %v6155_v11, 0.0  ;;  %v6156_v40 = vadd.f32 %v6124_v23, %v6092_v62  ;;  %v7401_v23 = vld [vmem:[%s7490_s23 + $0x78] sm:$0xf] }
 0x462   : > { %v6185_v9 = vmax.f32 %v6153_v53, 0.0  ;;  %v6154_v42 = vadd.f32 %v6122_v51, %v6090_v54  ;;  %v6135_v7 = vunpack.c.l.bf16 %v7401_v23  ;;  %v7402_v51 = vld [vmem:[%s7490_s23 + $0x70] sm:$0xf]  ;;  %v7403_v53 = vld [vmem:[%s7490_s23 + $0x7c] sm:$0xf] }
 0x463   : > { %6219 = vst.msk [vmem:[%s9387_s19 + $0x90] sm:$0xff] %vm1287_vm11, %v6187_v19  ;;  %v6188_v8 = vmax.f32 %v6156_v40, 0.0  ;;  %v6133_v11 = vunpack.c.l.bf16 %v7402_v51  ;;  %v6136_v54 = vunpack.c.l.bf16 %v7403_v53 }
 0x464   : > { %6217 = vst.msk [vmem:[%s9387_s19 + $0x80] sm:$0xff] %vm1287_vm11, %v6185_v9  ;;  %v6186_v29 = vmax.f32 %v6154_v42, 0.0  ;;  %v6965_v33 = vpop.f32.mrb[20].mxu1  ;;  %v7404_v9 = vld [vmem:[%s7490_s23 + $0x74] sm:$0xf] }
 0x465   : > { %6220 = vst.msk [vmem:[%s9387_s19 + $0x98] sm:$0xff] %vm1287_vm11, %v6188_v8  ;;  %v6095_v43 = vadd.f32 %v6965_v33, %v9374_v31  ;;  %v5987_v49 = vpop.f32.mrb[21].mxu1  ;;  %v6134_v42 = vunpack.c.l.bf16 %v7404_v9 }
 0x466   : > { %6218 = vst.msk [vmem:[%s9387_s19 + $0x88] sm:$0xff] %vm1287_vm11, %v6186_v29  ;;  %v6093_v39 = vadd.f32 %v9374_v31, %v5987_v49  ;;  %v6966_v5 = vpop.f32.mrb[22].mxu1 }
 0x467   : > { %v6159_v27 = vadd.f32 %v6127_v2, %v6095_v43  ;;  %v6096_v0 = vadd.f32 %v6966_v5, %v9374_v31  ;;  %v5990_v34 = vpop.f32.mrb[23].mxu1 }
 0x468   : > { %v6157_v4 = vadd.f32 %v6125_v16, %v6093_v39  ;;  %v6094_v21 = vadd.f32 %v9374_v31, %v5990_v34 }
 0x469   : > { %v6191_v32 = vmax.f32 %v6159_v27, 0.0  ;;  %v6160_v48 = vadd.f32 %v6128_v15, %v6096_v0 }
 0x46a   : > { %v6189_v6 = vmax.f32 %v6157_v4, 0.0  ;;  %v6158_v22 = vadd.f32 %v6126_v20, %v6094_v21 }
 0x46b   : > { %6223 = vst.msk [vmem:[%s9387_s19 + $0xb0] sm:$0xff] %vm1287_vm11, %v6191_v32  ;;  %v6192_v58 = vmax.f32 %v6160_v48, 0.0 }
 0x46c   : > { %6221 = vst.msk [vmem:[%s9387_s19 + $0xa0] sm:$0xff] %vm1287_vm11, %v6189_v6  ;;  %v6190_v44 = vmax.f32 %v6158_v22, 0.0  ;;  %v6969_v13 = vpop.f32.mrb[24].mxu1 }
 0x46d   : > { %6224 = vst.msk [vmem:[%s9387_s19 + $0xb8] sm:$0xff] %vm1287_vm11, %v6192_v58  ;;  %v6099_v52 = vadd.f32 %v6969_v13, %v9374_v31  ;;  %v6003_v24 = vpop.f32.mrb[25].mxu1 }
 0x46e   : > { %6222 = vst.msk [vmem:[%s9387_s19 + $0xa8] sm:$0xff] %vm1287_vm11, %v6190_v44  ;;  %v6097_v28 = vadd.f32 %v9374_v31, %v6003_v24  ;;  %v6970_v46 = vpop.f32.mrb[26].mxu1 }
 0x46f   : > { %v6163_v63 = vadd.f32 %v6131_v12, %v6099_v52  ;;  %v6100_v38 = vadd.f32 %v6970_v46, %v9374_v31  ;;  %v6006_v37 = vpop.f32.mrb[27].mxu1 }
 0x470   : > { %v6161_v60 = vadd.f32 %v6129_v14, %v6097_v28  ;;  %v6098_v55 = vadd.f32 %v9374_v31, %v6006_v37 }
 0x471   : > { %v6195_v35 = vmax.f32 %v6163_v63, 0.0  ;;  %v6164_v59 = vadd.f32 %v6132_v10, %v6100_v38 }
 0x472   : > { %v6193_v25 = vmax.f32 %v6161_v60, 0.0  ;;  %v6162_v56 = vadd.f32 %v6130_v45, %v6098_v55 }
 0x473   : > { %6227 = vst.msk [vmem:[%s9387_s19 + $0xd0] sm:$0xff] %vm1287_vm11, %v6195_v35  ;;  %v6196_v57 = vmax.f32 %v6164_v59, 0.0 }
 0x474   : > { %6225 = vst.msk [vmem:[%s9387_s19 + $0xc0] sm:$0xff] %vm1287_vm11, %v6193_v25  ;;  %v6194_v30 = vmax.f32 %v6162_v56, 0.0  ;;  %v6973_v26 = vpop.f32.mrb[28].mxu1 }
 0x475   : > { %6228 = vst.msk [vmem:[%s9387_s19 + $0xd8] sm:$0xff] %vm1287_vm11, %v6196_v57  ;;  %v6103_v62 = vadd.f32 %v6973_v26, %v9374_v31  ;;  %v6019_v1 = vpop.f32.mrb[29].mxu1 }
 0x476   : > { %6226 = vst.msk [vmem:[%s9387_s19 + $0xc8] sm:$0xff] %vm1287_vm11, %v6194_v30  ;;  %v6101_v19 = vadd.f32 %v9374_v31, %v6019_v1  ;;  %v6974_v40 = vpop.f32.mrb[30].mxu1 }
 0x477   : > { %v6167_v8 = vadd.f32 %v6135_v7, %v6103_v62  ;;  %v6104_v47 = vadd.f32 %v6974_v40, %v9374_v31  ;;  %v6022_v2 = vpop.f32.mrb[31].mxu1 }
 0x478   : > { %v6165_v29 = vadd.f32 %v6133_v11, %v6101_v19  ;;  %v6102_v33 = vadd.f32 %v9374_v31, %v6022_v2 }
 0x479   : > { %v6199_v17 = vmax.f32 %v6167_v8, 0.0  ;;  %v6168_v16 = vadd.f32 %v6136_v54, %v6104_v47 }
 0x47a   : > { %v6197_v43 = vmax.f32 %v6165_v29, 0.0  ;;  %v6166_v49 = vadd.f32 %v6134_v42, %v6102_v33 }
 0x47b   : > { %6231 = vst.msk [vmem:[%s9387_s19 + $0xf0] sm:$0xff] %vm1287_vm11, %v6199_v17  ;;  %v6200_v61 = vmax.f32 %v6168_v16, 0.0 }
 0x47c   : > { %6229 = vst.msk [vmem:[%s9387_s19 + $0xe0] sm:$0xff] %vm1287_vm11, %v6197_v43  ;;  %v6198_v15 = vmax.f32 %v6166_v49, 0.0 }
 0x47d   : > { %6232 = vst.msk [vmem:[%s9387_s19 + $0xf8] sm:$0xff] %vm1287_vm11, %v6200_v61 }
 0x47e   : > { %6230 = vst.msk [vmem:[%s9387_s19 + $0xe8] sm:$0xff] %vm1287_vm11, %v6198_v15 }
 0x47f PF: > { %s15_s18 = sadd.s32 1, %s7411_s18  }
 0x480   : > { %p12_p4 = scmp.ge.s32.totalorder %s15_s18, 4  }
 0x482   :  { %14 = sbr.rel (!%p12_p4) target bundleno = 1 (0x1), region = 80 }

</bundles_post_ra>
